<compile_context>
chip_gen: v7x
topology: tpu7x:2x2x1
jax: 0.10.0
libtpu: 0.0.40
codegen_flags: <defaults>
</compile_context>

<pallas_src>
import functools

import jax
import jax.numpy as jnp
import numpy as np
from jax.experimental import pallas as pl
from jax.experimental.pallas import tpu as pltpu

EPS = 1e-5  # nn.LayerNorm default eps


# -----------------------------------------------------------------------------
# Fully fused decoder-layer kernel (one grid step per batch element):
#   self-MHA + residual + LN  ->  cross-MHA + residual + LN  ->  FFN + residual + LN
# plus KV-cache writeback for both attentions, directly in (B, H, L, hd) layout.
# -----------------------------------------------------------------------------
def _decoder_layer_kernel(
        x_ref, enc_ref, smask_ref, cmask_ref,
        s_wq, s_bq, s_wkv, s_bkv, s_wo, s_bo, s_g, s_b,
        c_wq, c_bq, c_wkv, c_bkv, c_wo, c_bo, c_g, c_b,
        w1_ref, b1_ref, w2_ref, b2_ref, f_g, f_b,
        out_ref, sk_ref, sv_ref, ck_ref, cv_ref,
        *, num_heads, head_dim, scaling, f_tiles):
    E = num_heads * head_dim
    T = x_ref.shape[1]

    def layer_norm(y, g_ref, b_ref):
        mean = jnp.mean(y, axis=-1, keepdims=True)
        var = jnp.mean((y - mean) ** 2, axis=-1, keepdims=True)
        return (y - mean) * jax.lax.rsqrt(var + EPS) * g_ref[...] + b_ref[...]

    def mha(q_bf, kv_bf, mask, wq, bq, wkv, bkv, wo, bo, k_out, v_out):
        tgt = q_bf.shape[0]

        def head_body(h, o_acc):
            # per-head Q projection (scaled, incl. bias) and fused K|V projection
            # (single matmul, N = 2*hd — lane-dense at real head_dim=64).
            qh = (jnp.dot(q_bf, wq[h], preferred_element_type=jnp.float32)
                  + bq[h]) * scaling
            kvh = jnp.dot(kv_bf, wkv[h], preferred_element_type=jnp.float32) + bkv[h]
            kh = kvh[:, :head_dim]
            vh = kvh[:, head_dim:]

            # KV-cache writeback directly in the PyTorch (B, H, L, hd) layout;
            # avoids a reshape/transpose HBM round trip in the wrapper.
            k_out[0, h] = kh.astype(k_out.dtype)
            v_out[0, h] = vh.astype(v_out.dtype)

            # scores = qh @ kh^T (+ additive mask), softmax with EUP approx reciprocal
            s = jax.lax.dot_general(qh.astype(jnp.bfloat16), kh.astype(jnp.bfloat16),
                                    (((1,), (1,)), ((), ())),
                                    preferred_element_type=jnp.float32)
            s = s + mask
            s = s - jnp.max(s, axis=-1, keepdims=True)
            p = jnp.exp(s)
            p = p * pl.reciprocal(jnp.sum(p, axis=-1, keepdims=True), approx=True)

            ctx = jnp.dot(p.astype(jnp.bfloat16), vh.astype(jnp.bfloat16),
                          preferred_element_type=jnp.float32)
            # Accumulate the output projection per head into a full-lane-width
            # (T, E) f32 accumulator (lane-dense; replaces masked ctx-slice stores).
            return o_acc + jnp.dot(ctx.astype(jnp.bfloat16), wo[h],
                                   preferred_element_type=jnp.float32)

        o = jax.lax.fori_loop(0, num_heads, head_body,
                              jnp.zeros((tgt, E), jnp.float32))
        return o + bo[...]

    def ffn(h_f32):
        h_bf = h_f32.astype(jnp.bfloat16)

        def tile_body(f, acc):
            t = jnp.dot(h_bf, w1_ref[f], preferred_element_type=jnp.float32) + b1_ref[f]
            t = jax.nn.gelu(t, approximate=True)                   # tanh GELU
            return acc + jnp.dot(t.astype(jnp.bfloat16), w2_ref[f],
                                 preferred_element_type=jnp.float32)

        acc = jax.lax.fori_loop(0, f_tiles, tile_body,
                                jnp.zeros((T, E), jnp.float32))
        return acc + b2_ref[...]

    x = x_ref[0]                              # (T, E) f32 — also the residual
    x_bf = x.astype(jnp.bfloat16)             # cast once per value
    enc_bf = enc_ref[0].astype(jnp.bfloat16)

    # --- self attention + residual + self_attn_layer_norm ---
    a = mha(x_bf, x_bf, smask_ref[0, 0],
            s_wq, s_bq, s_wkv, s_bkv, s_wo, s_bo, sk_ref, sv_ref)
    h = layer_norm(x + a, s_g, s_b)

    # --- cross attention + residual + encoder_attn_layer_norm ---
    a = mha(h.astype(jnp.bfloat16), enc_bf, cmask_ref[0, 0],
            c_wq, c_bq, c_wkv, c_bkv, c_wo, c_bo, ck_ref, cv_ref)
    h = layer_norm(h + a, c_g, c_b)

    # --- feed forward (tiled over F) + residual + final_layer_norm ---
    f = ffn(h)
    h = layer_norm(h + f, f_g, f_b)

    out_ref[0] = h.astype(out_ref.dtype)


def bart_decoder_layer(hidden_states, attention_mask,
                       encoder_hidden_states, encoder_attention_mask,
                       params, num_heads, *, f_tiles=1,
                       cache_dtype=jnp.float32,
                       vmem_limit_bytes=64 * 1024 * 1024):
    """Full BartDecoderLayer forward (eval mode, use_cache=True, past_key_value=None)."""
    B, T, E = hidden_states.shape
    S = encoder_hidden_states.shape[1]
    hd = E // num_heads
    assert hd * num_heads == E
    scaling = float(hd) ** -0.5
    F_dim = params['ffn']['w1'].shape[1]
    assert F_dim % f_tiles == 0
    fc = F_dim // f_tiles

    # ---- pre-block weights per head / per FFN tile, cast to bf16 (wrapper-side) ----
    def attn_weights(p):
        per_head = lambda w: w.reshape(E, num_heads, hd).transpose(1, 0, 2)   # (H, E, hd)
        wq = per_head(p['wq']).astype(jnp.bfloat16)
        wkv = jnp.concatenate([per_head(p['wk']), per_head(p['wv'])],
                              axis=-1).astype(jnp.bfloat16)                   # (H, E, 2hd)
        bq = p['bq'].reshape(num_heads, 1, hd)
        bkv = jnp.concatenate([p['bk'].reshape(num_heads, 1, hd),
                               p['bv'].reshape(num_heads, 1, hd)], axis=-1)   # (H, 1, 2hd)
        wo = p['wo'].reshape(num_heads, hd, E).astype(jnp.bfloat16)           # (H, hd, E)
        return [wq, bq, wkv, bkv, wo, p['bo'], p['ln_g'], p['ln_b']]

    ffp = params['ffn']
    w1 = ffp['w1'].reshape(E, f_tiles, fc).transpose(1, 0, 2).astype(jnp.bfloat16)  # (nF,E,fc)
    b1 = ffp['b1'].reshape(f_tiles, 1, fc)
    w2 = ffp['w2'].reshape(f_tiles, fc, E).astype(jnp.bfloat16)                      # (nF,fc,E)
    weight_args = (attn_weights(params['self_attn'])
                   + attn_weights(params['cross_attn'])
                   + [w1, b1, w2, ffp['b2'], ffp['ln_g'], ffp['ln_b']])

    kernel = functools.partial(_decoder_layer_kernel, num_heads=num_heads,
                               head_dim=hd, scaling=scaling, f_tiles=f_tiles)

    out_shape = (jax.ShapeDtypeStruct((B, T, E), jnp.float32),
                 jax.ShapeDtypeStruct((B, num_heads, T, hd), cache_dtype),   # self K
                 jax.ShapeDtypeStruct((B, num_heads, T, hd), cache_dtype),   # self V
                 jax.ShapeDtypeStruct((B, num_heads, S, hd), cache_dtype),   # cross K
                 jax.ShapeDtypeStruct((B, num_heads, S, hd), cache_dtype))   # cross V
    out_specs = (pl.BlockSpec((1, T, E), lambda b: (b, 0, 0)),
                 pl.BlockSpec((1, num_heads, T, hd), lambda b: (b, 0, 0, 0)),
                 pl.BlockSpec((1, num_heads, T, hd), lambda b: (b, 0, 0, 0)),
                 pl.BlockSpec((1, num_heads, S, hd), lambda b: (b, 0, 0, 0)),
                 pl.BlockSpec((1, num_heads, S, hd), lambda b: (b, 0, 0, 0)))

    # Advisory cost hint so XLA can schedule neighbouring ops around this long call.
    flops = B * (12 * T * E * E + 4 * S * E * E + 4 * T * T * E + 4 * T * S * E
                 + 4 * T * E * F_dim)
    transcendentals = B * (num_heads * T * (T + S) + T * F_dim)
    w_bytes = int(sum(a.size * a.dtype.itemsize for a in weight_args))
    act_bytes = 4 * B * (2 * T * E + S * E + T * T + T * S + 2 * (T + S) * E)
    cost = pl.CostEstimate(flops=flops, transcendentals=transcendentals,
                           bytes_accessed=w_bytes + act_bytes)

    def build(single_buffer_weights):
        def wspec(arr):
            idx = lambda b, n=arr.ndim: (0,) * n
            if single_buffer_weights:
                # Constant index_map -> block never changes across the grid;
                # one buffer is enough (halves weight VMEM residency).
                return pl.BlockSpec(arr.shape, idx,
                                    pipeline_mode=pl.Buffered(buffer_count=1))
            return pl.BlockSpec(arr.shape, idx)

        in_specs = ([pl.BlockSpec((1, T, E), lambda b: (b, 0, 0)),
                     pl.BlockSpec((1, S, E), lambda b: (b, 0, 0)),
                     pl.BlockSpec((1, 1, T, T), lambda b: (b, 0, 0, 0)),
                     pl.BlockSpec((1, 1, T, S), lambda b: (b, 0, 0, 0))]
                    + [wspec(a) for a in weight_args])

        return pl.pallas_call(
            kernel,
            out_shape=out_shape,
            grid=(B,),
            in_specs=in_specs,
            out_specs=out_specs,
            cost_estimate=cost,
            compiler_params=pltpu.CompilerParams(
                dimension_semantics=("parallel",),
                vmem_limit_bytes=vmem_limit_bytes))

    args = (hidden_states, encoder_hidden_states, attention_mask,
            encoder_attention_mask, *weight_args)
    try:
        outs = jax.block_until_ready(build(True)(*args))
    except Exception:
        # pipeline_mode=Buffered(1) not supported by this jax/backend combination:
        # fall back to default double-buffered weight specs (same kernel body).
        outs = build(False)(*args)

    out, sk, sv, ck, cv = outs
    # Caches are produced directly in (B, H, L, hd), matching PyTorch _shape().
    present_key_value = (sk, sv, ck, cv)
    return out, present_key_value


# -----------------------------------------------------------------------------
# Pure-JAX reference (mirrors the PyTorch code) for correctness checking
# -----------------------------------------------------------------------------
def _mha_ref(x, kv, mask, p, num_heads):
    B, T, E = x.shape
    S = kv.shape[1]
    hd = E // num_heads
    q = (x @ p['wq'] + p['bq']) * (float(hd) ** -0.5)
    k = kv @ p['wk'] + p['bk']
    v = kv @ p['wv'] + p['bv']
    shp = lambda t, L: t.reshape(B, L, num_heads, hd).transpose(0, 2, 1, 3)
    qh, kh, vh = shp(q, T), shp(k, S), shp(v, S)
    w = jnp.einsum('bhtd,bhsd->bhts', qh, kh) + mask
    w = jax.nn.softmax(w, axis=-1)
    o = jnp.einsum('bhts,bhsd->bhtd', w, vh)
    o = o.transpose(0, 2, 1, 3).reshape(B, T, E)
    return o @ p['wo'] + p['bo'], kh, vh


def _ln_ref(x, g, b):
    m = x.mean(-1, keepdims=True)
    v = ((x - m) ** 2).mean(-1, keepdims=True)
    return (x - m) / jnp.sqrt(v + EPS) * g + b


def bart_decoder_layer_ref(x, mask, enc, enc_mask, params, num_heads):
    a, sk, sv = _mha_ref(x, x, mask, params['self_attn'], num_heads)
    h = _ln_ref(x + a, params['self_attn']['ln_g'], params['self_attn']['ln_b'])
    a, ck, cv = _mha_ref(h, enc, enc_mask, params['cross_attn'], num_heads)
    h = _ln_ref(h + a, params['cross_attn']['ln_g'], params['cross_attn']['ln_b'])
    p = params['ffn']
    f = jax.nn.gelu(h @ p['w1'] + p['b1'], approximate=True) @ p['w2'] + p['b2']
    h = _ln_ref(h + f, p['ln_g'], p['ln_b'])
    return h, (sk, sv, ck, cv)


# -----------------------------------------------------------------------------
# Deterministic parameter construction (synthetic, stands in for nn.Linear/LayerNorm init)
# -----------------------------------------------------------------------------
def make_params(key, E, F):
    def linear(k, din, dout):
        k1, k2 = jax.random.split(k)
        w = jax.random.normal(k1, (din, dout), jnp.float32) * 0.05
        b = jax.random.normal(k2, (1, dout), jnp.float32) * 0.05
        return w, b

    ks = jax.random.split(key, 13)

    def attn_params(ks5):
        wq, bq = linear(ks5[0], E, E)
        wk, bk = linear(ks5[1], E, E)
        wv, bv = linear(ks5[2], E, E)
        wo, bo = linear(ks5[3], E, E)
        kg, kb = jax.random.split(ks5[4])
        ln_g = 1.0 + 0.1 * jax.random.normal(kg, (1, E), jnp.float32)
        ln_b = 0.05 * jax.random.normal(kb, (1, E), jnp.float32)
        return dict(wq=wq, bq=bq, wk=wk, bk=bk, wv=wv, bv=bv, wo=wo, bo=bo,
                    ln_g=ln_g, ln_b=ln_b)

    w1, b1 = linear(ks[10], E, F)
    w2, b2 = linear(ks[11], F, E)
    kg, kb = jax.random.split(ks[12])
    ffn = dict(w1=w1, b1=b1, w2=w2, b2=b2,
               ln_g=1.0 + 0.1 * jax.random.normal(kg, (1, E), jnp.float32),
               ln_b=0.05 * jax.random.normal(kb, (1, E), jnp.float32))

    return dict(self_attn=attn_params(ks[0:5]),
                cross_attn=attn_params(ks[5:10]),
                ffn=ffn)


if __name__ == "__main__":
    # small BART-like config: d_model=32, heads=4, ffn=64, tgt_len=8, src_len=8, batch=2
    # (correctness-only config; do not use for performance tuning)
    B, T, S, E, H, F = 2, 8, 8, 32, 4, 64

    key = jax.random.PRNGKey(0)
    k_p, k_x, k_e = jax.random.split(key, 3)
    params = make_params(k_p, E, F)

    hidden_states = jax.random.normal(k_x, (B, T, E), jnp.float32)
    encoder_hidden_states = jax.random.normal(k_e, (B, S, E), jnp.float32)

    # causal additive mask for self-attention, all-visible mask for cross-attention
    # (finite -1e9, never -inf, so fully-masked rows cannot NaN)
    causal = jnp.where(jnp.arange(T)[:, None] >= jnp.arange(T)[None, :], 0.0, -1e9)
    attention_mask = jnp.broadcast_to(causal, (B, 1, T, T)).astype(jnp.float32)
    encoder_attention_mask = jnp.zeros((B, 1, T, S), jnp.float32)

    out, present_kv = bart_decoder_layer(hidden_states, attention_mask,
                                         encoder_hidden_states, encoder_attention_mask,
                                         params, H, f_tiles=2)   # fc=32 exercises FFN tiling
    out = jax.block_until_ready(out)
    present_kv = jax.block_until_ready(present_kv)

    ref_out, ref_kv = bart_decoder_layer_ref(hidden_states, attention_mask,
                                             encoder_hidden_states, encoder_attention_mask,
                                             params, H)

    # tolerance accounts for bf16 MXU operands + EUP approx-reciprocal softmax denom
    np.testing.assert_allclose(np.asarray(out), np.asarray(ref_out), rtol=2e-2, atol=2e-2)
    for a, b in zip(present_kv, ref_kv):
        np.testing.assert_allclose(np.asarray(a), np.asarray(b), rtol=1e-2, atol=1e-2)

    print("KERNEL_OK")
</pallas_src>

<mosaic_0001>
module attributes {stable_mosaic.version = 11 : i64} {
  func.func @_decoder_layer_kernel(%arg0: i32, %arg1: memref<1x8x32xf32, #tpu.memory_space<vmem>>, %arg2: memref<1x8x32xf32, #tpu.memory_space<vmem>>, %arg3: memref<1x1x8x8xf32, #tpu.memory_space<vmem>>, %arg4: memref<1x1x8x8xf32, #tpu.memory_space<vmem>>, %arg5: memref<4x32x8xbf16, #tpu.memory_space<vmem>>, %arg6: memref<4x1x8xf32, #tpu.memory_space<vmem>>, %arg7: memref<4x32x16xbf16, #tpu.memory_space<vmem>>, %arg8: memref<4x1x16xf32, #tpu.memory_space<vmem>>, %arg9: memref<4x8x32xbf16, #tpu.memory_space<vmem>>, %arg10: memref<1x32xf32, #tpu.memory_space<vmem>>, %arg11: memref<1x32xf32, #tpu.memory_space<vmem>>, %arg12: memref<1x32xf32, #tpu.memory_space<vmem>>, %arg13: memref<4x32x8xbf16, #tpu.memory_space<vmem>>, %arg14: memref<4x1x8xf32, #tpu.memory_space<vmem>>, %arg15: memref<4x32x16xbf16, #tpu.memory_space<vmem>>, %arg16: memref<4x1x16xf32, #tpu.memory_space<vmem>>, %arg17: memref<4x8x32xbf16, #tpu.memory_space<vmem>>, %arg18: memref<1x32xf32, #tpu.memory_space<vmem>>, %arg19: memref<1x32xf32, #tpu.memory_space<vmem>>, %arg20: memref<1x32xf32, #tpu.memory_space<vmem>>, %arg21: memref<2x32x32xbf16, #tpu.memory_space<vmem>>, %arg22: memref<2x1x32xf32, #tpu.memory_space<vmem>>, %arg23: memref<2x32x32xbf16, #tpu.memory_space<vmem>>, %arg24: memref<1x32xf32, #tpu.memory_space<vmem>>, %arg25: memref<1x32xf32, #tpu.memory_space<vmem>>, %arg26: memref<1x32xf32, #tpu.memory_space<vmem>>, %arg27: memref<1x8x32xf32, #tpu.memory_space<vmem>>, %arg28: memref<1x4x8x8xf32, #tpu.memory_space<vmem>>, %arg29: memref<1x4x8x8xf32, #tpu.memory_space<vmem>>, %arg30: memref<1x4x8x8xf32, #tpu.memory_space<vmem>>, %arg31: memref<1x4x8x8xf32, #tpu.memory_space<vmem>>) attributes {dimension_semantics = [#tpu.dimension_semantics<parallel>], iteration_bounds = array<i64: 2>, scalar_prefetch = 0 : i64, scratch_operands = 0 : i64, tpu.core_type = #tpu.core_type<tc>, window_params = [{transform_indices = @transform_0, window_bounds = array<i64: 1, 8, 32>}, {transform_indices = @transform_1, window_bounds = array<i64: 1, 8, 32>}, {transform_indices = @transform_2, window_bounds = array<i64: 1, 1, 8, 8>}, {transform_indices = @transform_3, window_bounds = array<i64: 1, 1, 8, 8>}, {pipeline_mode = #tpu.pipeline_mode<synchronous>, transform_indices = @transform_4, window_bounds = array<i64: 4, 32, 8>}, {pipeline_mode = #tpu.pipeline_mode<synchronous>, transform_indices = @transform_5, window_bounds = array<i64: 4, 1, 8>}, {pipeline_mode = #tpu.pipeline_mode<synchronous>, transform_indices = @transform_6, window_bounds = array<i64: 4, 32, 16>}, {pipeline_mode = #tpu.pipeline_mode<synchronous>, transform_indices = @transform_7, window_bounds = array<i64: 4, 1, 16>}, {pipeline_mode = #tpu.pipeline_mode<synchronous>, transform_indices = @transform_8, window_bounds = array<i64: 4, 8, 32>}, {pipeline_mode = #tpu.pipeline_mode<synchronous>, transform_indices = @transform_9, window_bounds = array<i64: 1, 32>}, {pipeline_mode = #tpu.pipeline_mode<synchronous>, transform_indices = @transform_10, window_bounds = array<i64: 1, 32>}, {pipeline_mode = #tpu.pipeline_mode<synchronous>, transform_indices = @transform_11, window_bounds = array<i64: 1, 32>}, {pipeline_mode = #tpu.pipeline_mode<synchronous>, transform_indices = @transform_12, window_bounds = array<i64: 4, 32, 8>}, {pipeline_mode = #tpu.pipeline_mode<synchronous>, transform_indices = @transform_13, window_bounds = array<i64: 4, 1, 8>}, {pipeline_mode = #tpu.pipeline_mode<synchronous>, transform_indices = @transform_14, window_bounds = array<i64: 4, 32, 16>}, {pipeline_mode = #tpu.pipeline_mode<synchronous>, transform_indices = @transform_15, window_bounds = array<i64: 4, 1, 16>}, {pipeline_mode = #tpu.pipeline_mode<synchronous>, transform_indices = @transform_16, window_bounds = array<i64: 4, 8, 32>}, {pipeline_mode = #tpu.pipeline_mode<synchronous>, transform_indices = @transform_17, window_bounds = array<i64: 1, 32>}, {pipeline_mode = #tpu.pipeline_mode<synchronous>, transform_indices = @transform_18, window_bounds = array<i64: 1, 32>}, {pipeline_mode = #tpu.pipeline_mode<synchronous>, transform_indices = @transform_19, window_bounds = array<i64: 1, 32>}, {pipeline_mode = #tpu.pipeline_mode<synchronous>, transform_indices = @transform_20, window_bounds = array<i64: 2, 32, 32>}, {pipeline_mode = #tpu.pipeline_mode<synchronous>, transform_indices = @transform_21, window_bounds = array<i64: 2, 1, 32>}, {pipeline_mode = #tpu.pipeline_mode<synchronous>, transform_indices = @transform_22, window_bounds = array<i64: 2, 32, 32>}, {pipeline_mode = #tpu.pipeline_mode<synchronous>, transform_indices = @transform_23, window_bounds = array<i64: 1, 32>}, {pipeline_mode = #tpu.pipeline_mode<synchronous>, transform_indices = @transform_24, window_bounds = array<i64: 1, 32>}, {pipeline_mode = #tpu.pipeline_mode<synchronous>, transform_indices = @transform_25, window_bounds = array<i64: 1, 32>}, {transform_indices = @transform_26, window_bounds = array<i64: 1, 8, 32>}, {transform_indices = @transform_27, window_bounds = array<i64: 1, 4, 8, 8>}, {transform_indices = @transform_28, window_bounds = array<i64: 1, 4, 8, 8>}, {transform_indices = @transform_29, window_bounds = array<i64: 1, 4, 8, 8>}, {transform_indices = @transform_30, window_bounds = array<i64: 1, 4, 8, 8>}]} {
    %c0 = arith.constant 0 : index
    %c0_0 = arith.constant 0 : index
    %c0_1 = arith.constant 0 : index
    %0 = vector.load %arg1[%c0, %c0_0, %c0_1] : memref<1x8x32xf32, #tpu.memory_space<vmem>>, vector<1x8x32xf32>
    %1 = vector.shape_cast %0 : vector<1x8x32xf32> to vector<8x32xf32>
    %2 = arith.truncf %1 : vector<8x32xf32> to vector<8x32xbf16>
    %c0_2 = arith.constant 0 : index
    %c0_3 = arith.constant 0 : index
    %c0_4 = arith.constant 0 : index
    %3 = vector.load %arg2[%c0_2, %c0_3, %c0_4] : memref<1x8x32xf32, #tpu.memory_space<vmem>>, vector<1x8x32xf32>
    %4 = vector.shape_cast %3 : vector<1x8x32xf32> to vector<8x32xf32>
    %5 = arith.truncf %4 : vector<8x32xf32> to vector<8x32xbf16>
    %c0_5 = arith.constant 0 : index
    %c0_6 = arith.constant 0 : index
    %c0_7 = arith.constant 0 : index
    %c0_8 = arith.constant 0 : index
    %6 = vector.load %arg3[%c0_5, %c0_6, %c0_7, %c0_8] : memref<1x1x8x8xf32, #tpu.memory_space<vmem>>, vector<1x1x8x8xf32>
    %7 = vector.shape_cast %6 : vector<1x1x8x8xf32> to vector<8x8xf32>
    %cst = arith.constant 0.000000e+00 : f32
    %8 = vector.broadcast %cst : f32 to vector<8x32xf32>
    %c0_i32 = arith.constant 0 : i32
    %c4_i32 = arith.constant 4 : i32
    %9 = arith.addi %c0_i32, %c4_i32 : i32
    %c1_i32 = arith.constant 1 : i32
    %10 = scf.for %arg32 = %c0_i32 to %9 step %c1_i32 iter_args(%arg33 = %8) -> (vector<8x32xf32>)  : i32 {
      %108 = arith.index_cast %arg32 : i32 to index
      %c0_59 = arith.constant 0 : index
      %c0_60 = arith.constant 0 : index
      %109 = vector.load %arg5[%108, %c0_59, %c0_60] : memref<4x32x8xbf16, #tpu.memory_space<vmem>>, vector<1x32x8xbf16>
      %110 = vector.shape_cast %109 : vector<1x32x8xbf16> to vector<32x8xbf16>
      %cst_61 = arith.constant dense<0.000000e+00> : vector<8x8xf32>
      %111 = tpu.matmul %2, %110, %cst_61 {dimension_numbers = #tpu.dot_dimension_numbers<[1], [0], [0], [1], [0, 0, 1, 1], [], []>} : vector<8x32xbf16>, vector<32x8xbf16>, vector<8x8xf32> -> vector<8x8xf32>
      %112 = arith.index_cast %arg32 : i32 to index
      %c0_62 = arith.constant 0 : index
      %c0_63 = arith.constant 0 : index
      %113 = vector.load %arg6[%112, %c0_62, %c0_63] : memref<4x1x8xf32, #tpu.memory_space<vmem>>, vector<1x1x8xf32>
      %114 = vector.shape_cast %113 : vector<1x1x8xf32> to vector<1x8xf32>
      %115 = vector.broadcast %114 : vector<1x8xf32> to vector<8x8xf32>
      %116 = arith.addf %111, %115 : vector<8x8xf32>
      %cst_64 = arith.constant 0.353553385 : f32
      %117 = vector.broadcast %cst_64 : f32 to vector<8x8xf32>
      %118 = arith.mulf %116, %117 : vector<8x8xf32>
      %119 = arith.index_cast %arg32 : i32 to index
      %c0_65 = arith.constant 0 : index
      %c0_66 = arith.constant 0 : index
      %120 = vector.load %arg7[%119, %c0_65, %c0_66] : memref<4x32x16xbf16, #tpu.memory_space<vmem>>, vector<1x32x16xbf16>
      %121 = vector.shape_cast %120 : vector<1x32x16xbf16> to vector<32x16xbf16>
      %cst_67 = arith.constant dense<0.000000e+00> : vector<8x16xf32>
      %122 = tpu.matmul %2, %121, %cst_67 {dimension_numbers = #tpu.dot_dimension_numbers<[1], [0], [0], [1], [0, 0, 1, 1], [], []>} : vector<8x32xbf16>, vector<32x16xbf16>, vector<8x16xf32> -> vector<8x16xf32>
      %123 = arith.index_cast %arg32 : i32 to index
      %c0_68 = arith.constant 0 : index
      %c0_69 = arith.constant 0 : index
      %124 = vector.load %arg8[%123, %c0_68, %c0_69] : memref<4x1x16xf32, #tpu.memory_space<vmem>>, vector<1x1x16xf32>
      %125 = vector.shape_cast %124 : vector<1x1x16xf32> to vector<1x16xf32>
      %126 = vector.broadcast %125 : vector<1x16xf32> to vector<8x16xf32>
      %127 = arith.addf %122, %126 : vector<8x16xf32>
      %128 = vector.extract_strided_slice %127 {offsets = [0, 0], sizes = [8, 8], strides = [1, 1]} : vector<8x16xf32> to vector<8x8xf32>
      %129 = vector.extract_strided_slice %127 {offsets = [0, 8], sizes = [8, 8], strides = [1, 1]} : vector<8x16xf32> to vector<8x8xf32>
      %c0_70 = arith.constant 0 : index
      %130 = arith.index_cast %arg32 : i32 to index
      %c0_71 = arith.constant 0 : index
      %c0_72 = arith.constant 0 : index
      %131 = vector.load %arg28[%c0_70, %130, %c0_71, %c0_72] : memref<1x4x8x8xf32, #tpu.memory_space<vmem>>, vector<1x1x8x8xf32>
      %132 = vector.shape_cast %131 : vector<1x1x8x8xf32> to vector<8x8xf32>
      %133 = vector.shape_cast %128 : vector<8x8xf32> to vector<1x1x8x8xf32>
      tpu.vector_store %arg28[%c0_70, %130, %c0_71, %c0_72], %133 {strides = array<i32>} : memref<1x4x8x8xf32, #tpu.memory_space<vmem>>, vector<1x1x8x8xf32>,
      %c0_73 = arith.constant 0 : index
      %134 = arith.index_cast %arg32 : i32 to index
      %c0_74 = arith.constant 0 : index
      %c0_75 = arith.constant 0 : index
      %135 = vector.load %arg29[%c0_73, %134, %c0_74, %c0_75] : memref<1x4x8x8xf32, #tpu.memory_space<vmem>>, vector<1x1x8x8xf32>
      %136 = vector.shape_cast %135 : vector<1x1x8x8xf32> to vector<8x8xf32>
      %137 = vector.shape_cast %129 : vector<8x8xf32> to vector<1x1x8x8xf32>
      tpu.vector_store %arg29[%c0_73, %134, %c0_74, %c0_75], %137 {strides = array<i32>} : memref<1x4x8x8xf32, #tpu.memory_space<vmem>>, vector<1x1x8x8xf32>,
      %138 = arith.truncf %118 : vector<8x8xf32> to vector<8x8xbf16>
      %139 = arith.truncf %128 : vector<8x8xf32> to vector<8x8xbf16>
      %cst_76 = arith.constant dense<0.000000e+00> : vector<8x8xf32>
      %140 = tpu.matmul %138, %139, %cst_76 {dimension_numbers = #tpu.dot_dimension_numbers<[1], [1], [0], [0], [0, 0, 1, 0], [], []>} : vector<8x8xbf16>, vector<8x8xbf16>, vector<8x8xf32> -> vector<8x8xf32>
      %141 = arith.addf %140, %7 : vector<8x8xf32>
      %cst_77 = arith.constant dense<0xFF800000> : vector<8xf32>
      %142 = vector.multi_reduction <maximumf>, %141, %cst_77 [1] : vector<8x8xf32> to vector<8xf32>
      %143 = vector.shape_cast %142 : vector<8xf32> to vector<8x1xf32>
      %144 = vector.broadcast %143 : vector<8x1xf32> to vector<8x8xf32>
      %145 = arith.subf %141, %144 : vector<8x8xf32>
      %146 = math.exp %145 : vector<8x8xf32>
      %cst_78 = arith.constant dense<0.000000e+00> : vector<8xf32>
      %147 = vector.multi_reduction <add>, %146, %cst_78 [1] : vector<8x8xf32> to vector<8xf32>
      %148 = vector.shape_cast %147 : vector<8xf32> to vector<8x1xf32>
      %149 = tpu.reciprocal %148 {approx = true} : vector<8x1xf32> -> vector<8x1xf32>
      %150 = vector.broadcast %149 : vector<8x1xf32> to vector<8x8xf32>
      %151 = arith.mulf %146, %150 : vector<8x8xf32>
      %152 = arith.truncf %151 : vector<8x8xf32> to vector<8x8xbf16>
      %153 = arith.truncf %129 : vector<8x8xf32> to vector<8x8xbf16>
      %cst_79 = arith.constant dense<0.000000e+00> : vector<8x8xf32>
      %154 = tpu.matmul %152, %153, %cst_79 {dimension_numbers = #tpu.dot_dimension_numbers<[1], [0], [0], [1], [0, 0, 1, 1], [], []>} : vector<8x8xbf16>, vector<8x8xbf16>, vector<8x8xf32> -> vector<8x8xf32>
      %155 = arith.truncf %154 : vector<8x8xf32> to vector<8x8xbf16>
      %156 = arith.index_cast %arg32 : i32 to index
      %c0_80 = arith.constant 0 : index
      %c0_81 = arith.constant 0 : index
      %157 = vector.load %arg9[%156, %c0_80, %c0_81] : memref<4x8x32xbf16, #tpu.memory_space<vmem>>, vector<1x8x32xbf16>
      %158 = vector.shape_cast %157 : vector<1x8x32xbf16> to vector<8x32xbf16>
      %cst_82 = arith.constant dense<0.000000e+00> : vector<8x32xf32>
      %159 = tpu.matmul %155, %158, %cst_82 {dimension_numbers = #tpu.dot_dimension_numbers<[1], [0], [0], [1], [0, 0, 1, 1], [], []>} : vector<8x8xbf16>, vector<8x32xbf16>, vector<8x32xf32> -> vector<8x32xf32>
      %160 = arith.addf %arg33, %159 : vector<8x32xf32>
      scf.yield %160 : vector<8x32xf32>
    }
    %c4_i32_9 = arith.constant 4 : i32
    %c0_10 = arith.constant 0 : index
    %c0_11 = arith.constant 0 : index
    %11 = vector.load %arg10[%c0_10, %c0_11] : memref<1x32xf32, #tpu.memory_space<vmem>>, vector<1x32xf32>
    %12 = vector.broadcast %11 : vector<1x32xf32> to vector<8x32xf32>
    %13 = arith.addf %10, %12 : vector<8x32xf32>
    %14 = arith.addf %1, %13 : vector<8x32xf32>
    %cst_12 = arith.constant dense<0.000000e+00> : vector<8xf32>
    %15 = vector.multi_reduction <add>, %14, %cst_12 [1] : vector<8x32xf32> to vector<8xf32>
    %16 = vector.shape_cast %15 : vector<8xf32> to vector<8x1xf32>
    %cst_13 = arith.constant 3.200000e+01 : f32
    %17 = vector.broadcast %cst_13 : f32 to vector<8x1xf32>
    %18 = arith.divf %16, %17 : vector<8x1xf32>
    %19 = vector.broadcast %18 : vector<8x1xf32> to vector<8x32xf32>
    %20 = arith.subf %14, %19 : vector<8x32xf32>
    %21 = arith.mulf %20, %20 : vector<8x32xf32>
    %cst_14 = arith.constant dense<0.000000e+00> : vector<8xf32>
    %22 = vector.multi_reduction <add>, %21, %cst_14 [1] : vector<8x32xf32> to vector<8xf32>
    %23 = vector.shape_cast %22 : vector<8xf32> to vector<8x1xf32>
    %cst_15 = arith.constant 3.200000e+01 : f32
    %24 = vector.broadcast %cst_15 : f32 to vector<8x1xf32>
    %25 = arith.divf %23, %24 : vector<8x1xf32>
    %26 = vector.broadcast %18 : vector<8x1xf32> to vector<8x32xf32>
    %27 = arith.subf %14, %26 : vector<8x32xf32>
    %cst_16 = arith.constant 9.99999974E-6 : f32
    %28 = vector.broadcast %cst_16 : f32 to vector<8x1xf32>
    %29 = arith.addf %25, %28 : vector<8x1xf32>
    %30 = math.rsqrt %29 : vector<8x1xf32>
    %31 = vector.broadcast %30 : vector<8x1xf32> to vector<8x32xf32>
    %32 = arith.mulf %27, %31 : vector<8x32xf32>
    %c0_17 = arith.constant 0 : index
    %c0_18 = arith.constant 0 : index
    %33 = vector.load %arg11[%c0_17, %c0_18] : memref<1x32xf32, #tpu.memory_space<vmem>>, vector<1x32xf32>
    %34 = vector.broadcast %33 : vector<1x32xf32> to vector<8x32xf32>
    %35 = arith.mulf %32, %34 : vector<8x32xf32>
    %c0_19 = arith.constant 0 : index
    %c0_20 = arith.constant 0 : index
    %36 = vector.load %arg12[%c0_19, %c0_20] : memref<1x32xf32, #tpu.memory_space<vmem>>, vector<1x32xf32>
    %37 = vector.broadcast %36 : vector<1x32xf32> to vector<8x32xf32>
    %38 = arith.addf %35, %37 : vector<8x32xf32>
    %39 = arith.truncf %38 : vector<8x32xf32> to vector<8x32xbf16>
    %c0_21 = arith.constant 0 : index
    %c0_22 = arith.constant 0 : index
    %c0_23 = arith.constant 0 : index
    %c0_24 = arith.constant 0 : index
    %40 = vector.load %arg4[%c0_21, %c0_22, %c0_23, %c0_24] : memref<1x1x8x8xf32, #tpu.memory_space<vmem>>, vector<1x1x8x8xf32>
    %41 = vector.shape_cast %40 : vector<1x1x8x8xf32> to vector<8x8xf32>
    %cst_25 = arith.constant 0.000000e+00 : f32
    %42 = vector.broadcast %cst_25 : f32 to vector<8x32xf32>
    %c0_i32_26 = arith.constant 0 : i32
    %c4_i32_27 = arith.constant 4 : i32
    %43 = arith.addi %c0_i32_26, %c4_i32_27 : i32
    %c1_i32_28 = arith.constant 1 : i32
    %44 = scf.for %arg32 = %c0_i32_26 to %43 step %c1_i32_28 iter_args(%arg33 = %42) -> (vector<8x32xf32>)  : i32 {
      %108 = arith.index_cast %arg32 : i32 to index
      %c0_59 = arith.constant 0 : index
      %c0_60 = arith.constant 0 : index
      %109 = vector.load %arg13[%108, %c0_59, %c0_60] : memref<4x32x8xbf16, #tpu.memory_space<vmem>>, vector<1x32x8xbf16>
      %110 = vector.shape_cast %109 : vector<1x32x8xbf16> to vector<32x8xbf16>
      %cst_61 = arith.constant dense<0.000000e+00> : vector<8x8xf32>
      %111 = tpu.matmul %39, %110, %cst_61 {dimension_numbers = #tpu.dot_dimension_numbers<[1], [0], [0], [1], [0, 0, 1, 1], [], []>} : vector<8x32xbf16>, vector<32x8xbf16>, vector<8x8xf32> -> vector<8x8xf32>
      %112 = arith.index_cast %arg32 : i32 to index
      %c0_62 = arith.constant 0 : index
      %c0_63 = arith.constant 0 : index
      %113 = vector.load %arg14[%112, %c0_62, %c0_63] : memref<4x1x8xf32, #tpu.memory_space<vmem>>, vector<1x1x8xf32>
      %114 = vector.shape_cast %113 : vector<1x1x8xf32> to vector<1x8xf32>
      %115 = vector.broadcast %114 : vector<1x8xf32> to vector<8x8xf32>
      %116 = arith.addf %111, %115 : vector<8x8xf32>
      %cst_64 = arith.constant 0.353553385 : f32
      %117 = vector.broadcast %cst_64 : f32 to vector<8x8xf32>
      %118 = arith.mulf %116, %117 : vector<8x8xf32>
      %119 = arith.index_cast %arg32 : i32 to index
      %c0_65 = arith.constant 0 : index
      %c0_66 = arith.constant 0 : index
      %120 = vector.load %arg15[%119, %c0_65, %c0_66] : memref<4x32x16xbf16, #tpu.memory_space<vmem>>, vector<1x32x16xbf16>
      %121 = vector.shape_cast %120 : vector<1x32x16xbf16> to vector<32x16xbf16>
      %cst_67 = arith.constant dense<0.000000e+00> : vector<8x16xf32>
      %122 = tpu.matmul %5, %121, %cst_67 {dimension_numbers = #tpu.dot_dimension_numbers<[1], [0], [0], [1], [0, 0, 1, 1], [], []>} : vector<8x32xbf16>, vector<32x16xbf16>, vector<8x16xf32> -> vector<8x16xf32>
      %123 = arith.index_cast %arg32 : i32 to index
      %c0_68 = arith.constant 0 : index
      %c0_69 = arith.constant 0 : index
      %124 = vector.load %arg16[%123, %c0_68, %c0_69] : memref<4x1x16xf32, #tpu.memory_space<vmem>>, vector<1x1x16xf32>
      %125 = vector.shape_cast %124 : vector<1x1x16xf32> to vector<1x16xf32>
      %126 = vector.broadcast %125 : vector<1x16xf32> to vector<8x16xf32>
      %127 = arith.addf %122, %126 : vector<8x16xf32>
      %128 = vector.extract_strided_slice %127 {offsets = [0, 0], sizes = [8, 8], strides = [1, 1]} : vector<8x16xf32> to vector<8x8xf32>
      %129 = vector.extract_strided_slice %127 {offsets = [0, 8], sizes = [8, 8], strides = [1, 1]} : vector<8x16xf32> to vector<8x8xf32>
      %c0_70 = arith.constant 0 : index
      %130 = arith.index_cast %arg32 : i32 to index
      %c0_71 = arith.constant 0 : index
      %c0_72 = arith.constant 0 : index
      %131 = vector.load %arg30[%c0_70, %130, %c0_71, %c0_72] : memref<1x4x8x8xf32, #tpu.memory_space<vmem>>, vector<1x1x8x8xf32>
      %132 = vector.shape_cast %131 : vector<1x1x8x8xf32> to vector<8x8xf32>
      %133 = vector.shape_cast %128 : vector<8x8xf32> to vector<1x1x8x8xf32>
      tpu.vector_store %arg30[%c0_70, %130, %c0_71, %c0_72], %133 {strides = array<i32>} : memref<1x4x8x8xf32, #tpu.memory_space<vmem>>, vector<1x1x8x8xf32>,
      %c0_73 = arith.constant 0 : index
      %134 = arith.index_cast %arg32 : i32 to index
      %c0_74 = arith.constant 0 : index
      %c0_75 = arith.constant 0 : index
      %135 = vector.load %arg31[%c0_73, %134, %c0_74, %c0_75] : memref<1x4x8x8xf32, #tpu.memory_space<vmem>>, vector<1x1x8x8xf32>
      %136 = vector.shape_cast %135 : vector<1x1x8x8xf32> to vector<8x8xf32>
      %137 = vector.shape_cast %129 : vector<8x8xf32> to vector<1x1x8x8xf32>
      tpu.vector_store %arg31[%c0_73, %134, %c0_74, %c0_75], %137 {strides = array<i32>} : memref<1x4x8x8xf32, #tpu.memory_space<vmem>>, vector<1x1x8x8xf32>,
      %138 = arith.truncf %118 : vector<8x8xf32> to vector<8x8xbf16>
      %139 = arith.truncf %128 : vector<8x8xf32> to vector<8x8xbf16>
      %cst_76 = arith.constant dense<0.000000e+00> : vector<8x8xf32>
      %140 = tpu.matmul %138, %139, %cst_76 {dimension_numbers = #tpu.dot_dimension_numbers<[1], [1], [0], [0], [0, 0, 1, 0], [], []>} : vector<8x8xbf16>, vector<8x8xbf16>, vector<8x8xf32> -> vector<8x8xf32>
      %141 = arith.addf %140, %41 : vector<8x8xf32>
      %cst_77 = arith.constant dense<0xFF800000> : vector<8xf32>
      %142 = vector.multi_reduction <maximumf>, %141, %cst_77 [1] : vector<8x8xf32> to vector<8xf32>
      %143 = vector.shape_cast %142 : vector<8xf32> to vector<8x1xf32>
      %144 = vector.broadcast %143 : vector<8x1xf32> to vector<8x8xf32>
      %145 = arith.subf %141, %144 : vector<8x8xf32>
      %146 = math.exp %145 : vector<8x8xf32>
      %cst_78 = arith.constant dense<0.000000e+00> : vector<8xf32>
      %147 = vector.multi_reduction <add>, %146, %cst_78 [1] : vector<8x8xf32> to vector<8xf32>
      %148 = vector.shape_cast %147 : vector<8xf32> to vector<8x1xf32>
      %149 = tpu.reciprocal %148 {approx = true} : vector<8x1xf32> -> vector<8x1xf32>
      %150 = vector.broadcast %149 : vector<8x1xf32> to vector<8x8xf32>
      %151 = arith.mulf %146, %150 : vector<8x8xf32>
      %152 = arith.truncf %151 : vector<8x8xf32> to vector<8x8xbf16>
      %153 = arith.truncf %129 : vector<8x8xf32> to vector<8x8xbf16>
      %cst_79 = arith.constant dense<0.000000e+00> : vector<8x8xf32>
      %154 = tpu.matmul %152, %153, %cst_79 {dimension_numbers = #tpu.dot_dimension_numbers<[1], [0], [0], [1], [0, 0, 1, 1], [], []>} : vector<8x8xbf16>, vector<8x8xbf16>, vector<8x8xf32> -> vector<8x8xf32>
      %155 = arith.truncf %154 : vector<8x8xf32> to vector<8x8xbf16>
      %156 = arith.index_cast %arg32 : i32 to index
      %c0_80 = arith.constant 0 : index
      %c0_81 = arith.constant 0 : index
      %157 = vector.load %arg17[%156, %c0_80, %c0_81] : memref<4x8x32xbf16, #tpu.memory_space<vmem>>, vector<1x8x32xbf16>
      %158 = vector.shape_cast %157 : vector<1x8x32xbf16> to vector<8x32xbf16>
      %cst_82 = arith.constant dense<0.000000e+00> : vector<8x32xf32>
      %159 = tpu.matmul %155, %158, %cst_82 {dimension_numbers = #tpu.dot_dimension_numbers<[1], [0], [0], [1], [0, 0, 1, 1], [], []>} : vector<8x8xbf16>, vector<8x32xbf16>, vector<8x32xf32> -> vector<8x32xf32>
      %160 = arith.addf %arg33, %159 : vector<8x32xf32>
      scf.yield %160 : vector<8x32xf32>
    }
    %c4_i32_29 = arith.constant 4 : i32
    %c0_30 = arith.constant 0 : index
    %c0_31 = arith.constant 0 : index
    %45 = vector.load %arg18[%c0_30, %c0_31] : memref<1x32xf32, #tpu.memory_space<vmem>>, vector<1x32xf32>
    %46 = vector.broadcast %45 : vector<1x32xf32> to vector<8x32xf32>
    %47 = arith.addf %44, %46 : vector<8x32xf32>
    %48 = arith.addf %38, %47 : vector<8x32xf32>
    %cst_32 = arith.constant dense<0.000000e+00> : vector<8xf32>
    %49 = vector.multi_reduction <add>, %48, %cst_32 [1] : vector<8x32xf32> to vector<8xf32>
    %50 = vector.shape_cast %49 : vector<8xf32> to vector<8x1xf32>
    %cst_33 = arith.constant 3.200000e+01 : f32
    %51 = vector.broadcast %cst_33 : f32 to vector<8x1xf32>
    %52 = arith.divf %50, %51 : vector<8x1xf32>
    %53 = vector.broadcast %52 : vector<8x1xf32> to vector<8x32xf32>
    %54 = arith.subf %48, %53 : vector<8x32xf32>
    %55 = arith.mulf %54, %54 : vector<8x32xf32>
    %cst_34 = arith.constant dense<0.000000e+00> : vector<8xf32>
    %56 = vector.multi_reduction <add>, %55, %cst_34 [1] : vector<8x32xf32> to vector<8xf32>
    %57 = vector.shape_cast %56 : vector<8xf32> to vector<8x1xf32>
    %cst_35 = arith.constant 3.200000e+01 : f32
    %58 = vector.broadcast %cst_35 : f32 to vector<8x1xf32>
    %59 = arith.divf %57, %58 : vector<8x1xf32>
    %60 = vector.broadcast %52 : vector<8x1xf32> to vector<8x32xf32>
    %61 = arith.subf %48, %60 : vector<8x32xf32>
    %cst_36 = arith.constant 9.99999974E-6 : f32
    %62 = vector.broadcast %cst_36 : f32 to vector<8x1xf32>
    %63 = arith.addf %59, %62 : vector<8x1xf32>
    %64 = math.rsqrt %63 : vector<8x1xf32>
    %65 = vector.broadcast %64 : vector<8x1xf32> to vector<8x32xf32>
    %66 = arith.mulf %61, %65 : vector<8x32xf32>
    %c0_37 = arith.constant 0 : index
    %c0_38 = arith.constant 0 : index
    %67 = vector.load %arg19[%c0_37, %c0_38] : memref<1x32xf32, #tpu.memory_space<vmem>>, vector<1x32xf32>
    %68 = vector.broadcast %67 : vector<1x32xf32> to vector<8x32xf32>
    %69 = arith.mulf %66, %68 : vector<8x32xf32>
    %c0_39 = arith.constant 0 : index
    %c0_40 = arith.constant 0 : index
    %70 = vector.load %arg20[%c0_39, %c0_40] : memref<1x32xf32, #tpu.memory_space<vmem>>, vector<1x32xf32>
    %71 = vector.broadcast %70 : vector<1x32xf32> to vector<8x32xf32>
    %72 = arith.addf %69, %71 : vector<8x32xf32>
    %73 = arith.truncf %72 : vector<8x32xf32> to vector<8x32xbf16>
    %cst_41 = arith.constant 0.000000e+00 : f32
    %74 = vector.broadcast %cst_41 : f32 to vector<8x32xf32>
    %c0_i32_42 = arith.constant 0 : i32
    %c2_i32 = arith.constant 2 : i32
    %75 = arith.addi %c0_i32_42, %c2_i32 : i32
    %c1_i32_43 = arith.constant 1 : i32
    %76 = scf.for %arg32 = %c0_i32_42 to %75 step %c1_i32_43 iter_args(%arg33 = %74) -> (vector<8x32xf32>)  : i32 {
      %108 = arith.index_cast %arg32 : i32 to index
      %c0_59 = arith.constant 0 : index
      %c0_60 = arith.constant 0 : index
      %109 = vector.load %arg21[%108, %c0_59, %c0_60] : memref<2x32x32xbf16, #tpu.memory_space<vmem>>, vector<1x32x32xbf16>
      %110 = vector.shape_cast %109 : vector<1x32x32xbf16> to vector<32x32xbf16>
      %cst_61 = arith.constant dense<0.000000e+00> : vector<8x32xf32>
      %111 = tpu.matmul %73, %110, %cst_61 {dimension_numbers = #tpu.dot_dimension_numbers<[1], [0], [0], [1], [0, 0, 1, 1], [], []>} : vector<8x32xbf16>, vector<32x32xbf16>, vector<8x32xf32> -> vector<8x32xf32>
      %112 = arith.index_cast %arg32 : i32 to index
      %c0_62 = arith.constant 0 : index
      %c0_63 = arith.constant 0 : index
      %113 = vector.load %arg22[%112, %c0_62, %c0_63] : memref<2x1x32xf32, #tpu.memory_space<vmem>>, vector<1x1x32xf32>
      %114 = vector.shape_cast %113 : vector<1x1x32xf32> to vector<1x32xf32>
      %115 = vector.broadcast %114 : vector<1x32xf32> to vector<8x32xf32>
      %116 = arith.addf %111, %115 : vector<8x32xf32>
      %117 = arith.mulf %116, %116 : vector<8x32xf32>
      %118 = arith.mulf %116, %117 : vector<8x32xf32>
      %cst_64 = arith.constant 4.471500e-02 : f32
      %119 = vector.broadcast %cst_64 : f32 to vector<8x32xf32>
      %120 = arith.mulf %119, %118 : vector<8x32xf32>
      %121 = arith.addf %116, %120 : vector<8x32xf32>
      %cst_65 = arith.constant 0.797884583 : f32
      %122 = vector.broadcast %cst_65 : f32 to vector<8x32xf32>
      %123 = arith.mulf %122, %121 : vector<8x32xf32>
      %124 = math.tanh %123 : vector<8x32xf32>
      %cst_66 = arith.constant 1.000000e+00 : f32
      %125 = vector.broadcast %cst_66 : f32 to vector<8x32xf32>
      %126 = arith.addf %125, %124 : vector<8x32xf32>
      %cst_67 = arith.constant 5.000000e-01 : f32
      %127 = vector.broadcast %cst_67 : f32 to vector<8x32xf32>
      %128 = arith.mulf %127, %126 : vector<8x32xf32>
      %129 = arith.mulf %116, %128 : vector<8x32xf32>
      %130 = arith.truncf %129 : vector<8x32xf32> to vector<8x32xbf16>
      %131 = arith.index_cast %arg32 : i32 to index
      %c0_68 = arith.constant 0 : index
      %c0_69 = arith.constant 0 : index
      %132 = vector.load %arg23[%131, %c0_68, %c0_69] : memref<2x32x32xbf16, #tpu.memory_space<vmem>>, vector<1x32x32xbf16>
      %133 = vector.shape_cast %132 : vector<1x32x32xbf16> to vector<32x32xbf16>
      %cst_70 = arith.constant dense<0.000000e+00> : vector<8x32xf32>
      %134 = tpu.matmul %130, %133, %cst_70 {dimension_numbers = #tpu.dot_dimension_numbers<[1], [0], [0], [1], [0, 0, 1, 1], [], []>} : vector<8x32xbf16>, vector<32x32xbf16>, vector<8x32xf32> -> vector<8x32xf32>
      %135 = arith.addf %arg33, %134 : vector<8x32xf32>
      scf.yield %135 : vector<8x32xf32>
    }
    %c2_i32_44 = arith.constant 2 : i32
    %c0_45 = arith.constant 0 : index
    %c0_46 = arith.constant 0 : index
    %77 = vector.load %arg24[%c0_45, %c0_46] : memref<1x32xf32, #tpu.memory_space<vmem>>, vector<1x32xf32>
    %78 = vector.broadcast %77 : vector<1x32xf32> to vector<8x32xf32>
    %79 = arith.addf %76, %78 : vector<8x32xf32>
    %80 = arith.addf %72, %79 : vector<8x32xf32>
    %cst_47 = arith.constant dense<0.000000e+00> : vector<8xf32>
    %81 = vector.multi_reduction <add>, %80, %cst_47 [1] : vector<8x32xf32> to vector<8xf32>
    %82 = vector.shape_cast %81 : vector<8xf32> to vector<8x1xf32>
    %cst_48 = arith.constant 3.200000e+01 : f32
    %83 = vector.broadcast %cst_48 : f32 to vector<8x1xf32>
    %84 = arith.divf %82, %83 : vector<8x1xf32>
    %85 = vector.broadcast %84 : vector<8x1xf32> to vector<8x32xf32>
    %86 = arith.subf %80, %85 : vector<8x32xf32>
    %87 = arith.mulf %86, %86 : vector<8x32xf32>
    %cst_49 = arith.constant dense<0.000000e+00> : vector<8xf32>
    %88 = vector.multi_reduction <add>, %87, %cst_49 [1] : vector<8x32xf32> to vector<8xf32>
    %89 = vector.shape_cast %88 : vector<8xf32> to vector<8x1xf32>
    %cst_50 = arith.constant 3.200000e+01 : f32
    %90 = vector.broadcast %cst_50 : f32 to vector<8x1xf32>
    %91 = arith.divf %89, %90 : vector<8x1xf32>
    %92 = vector.broadcast %84 : vector<8x1xf32> to vector<8x32xf32>
    %93 = arith.subf %80, %92 : vector<8x32xf32>
    %cst_51 = arith.constant 9.99999974E-6 : f32
    %94 = vector.broadcast %cst_51 : f32 to vector<8x1xf32>
    %95 = arith.addf %91, %94 : vector<8x1xf32>
    %96 = math.rsqrt %95 : vector<8x1xf32>
    %97 = vector.broadcast %96 : vector<8x1xf32> to vector<8x32xf32>
    %98 = arith.mulf %93, %97 : vector<8x32xf32>
    %c0_52 = arith.constant 0 : index
    %c0_53 = arith.constant 0 : index
    %99 = vector.load %arg25[%c0_52, %c0_53] : memref<1x32xf32, #tpu.memory_space<vmem>>, vector<1x32xf32>
    %100 = vector.broadcast %99 : vector<1x32xf32> to vector<8x32xf32>
    %101 = arith.mulf %98, %100 : vector<8x32xf32>
    %c0_54 = arith.constant 0 : index
    %c0_55 = arith.constant 0 : index
    %102 = vector.load %arg26[%c0_54, %c0_55] : memref<1x32xf32, #tpu.memory_space<vmem>>, vector<1x32xf32>
    %103 = vector.broadcast %102 : vector<1x32xf32> to vector<8x32xf32>
    %104 = arith.addf %101, %103 : vector<8x32xf32>
    %c0_56 = arith.constant 0 : index
    %c0_57 = arith.constant 0 : index
    %c0_58 = arith.constant 0 : index
    %105 = vector.load %arg27[%c0_56, %c0_57, %c0_58] : memref<1x8x32xf32, #tpu.memory_space<vmem>>, vector<1x8x32xf32>
    %106 = vector.shape_cast %105 : vector<1x8x32xf32> to vector<8x32xf32>
    %107 = vector.shape_cast %104 : vector<8x32xf32> to vector<1x8x32xf32>
    tpu.vector_store %arg27[%c0_56, %c0_57, %c0_58], %107 {strides = array<i32>} : memref<1x8x32xf32, #tpu.memory_space<vmem>>, vector<1x8x32xf32>,
    return
  }
  func.func @transform_0(%arg0: i32) -> (i32, i32, i32) {
    %c0_i32 = arith.constant 0 : i32
    %c0_i32_0 = arith.constant 0 : i32
    %c0_i32_1 = arith.constant 0 : i32
    return %arg0, %c0_i32, %c0_i32_0 : i32, i32, i32
  }
  func.func @transform_1(%arg0: i32) -> (i32, i32, i32) {
    %c0_i32 = arith.constant 0 : i32
    %c0_i32_0 = arith.constant 0 : i32
    %c0_i32_1 = arith.constant 0 : i32
    return %arg0, %c0_i32, %c0_i32_0 : i32, i32, i32
  }
  func.func @transform_2(%arg0: i32) -> (i32, i32, i32, i32) {
    %c0_i32 = arith.constant 0 : i32
    %c0_i32_0 = arith.constant 0 : i32
    %c0_i32_1 = arith.constant 0 : i32
    %c0_i32_2 = arith.constant 0 : i32
    return %arg0, %c0_i32, %c0_i32_0, %c0_i32_1 : i32, i32, i32, i32
  }
  func.func @transform_3(%arg0: i32) -> (i32, i32, i32, i32) {
    %c0_i32 = arith.constant 0 : i32
    %c0_i32_0 = arith.constant 0 : i32
    %c0_i32_1 = arith.constant 0 : i32
    %c0_i32_2 = arith.constant 0 : i32
    return %arg0, %c0_i32, %c0_i32_0, %c0_i32_1 : i32, i32, i32, i32
  }
  func.func @transform_4(%arg0: i32) -> (i32, i32, i32) {
    %c0_i32 = arith.constant 0 : i32
    %c0_i32_0 = arith.constant 0 : i32
    %c0_i32_1 = arith.constant 0 : i32
    %c0_i32_2 = arith.constant 0 : i32
    return %c0_i32, %c0_i32_0, %c0_i32_1 : i32, i32, i32
  }
  func.func @transform_5(%arg0: i32) -> (i32, i32, i32) {
    %c0_i32 = arith.constant 0 : i32
    %c0_i32_0 = arith.constant 0 : i32
    %c0_i32_1 = arith.constant 0 : i32
    %c0_i32_2 = arith.constant 0 : i32
    return %c0_i32, %c0_i32_0, %c0_i32_1 : i32, i32, i32
  }
  func.func @transform_6(%arg0: i32) -> (i32, i32, i32) {
    %c0_i32 = arith.constant 0 : i32
    %c0_i32_0 = arith.constant 0 : i32
    %c0_i32_1 = arith.constant 0 : i32
    %c0_i32_2 = arith.constant 0 : i32
    return %c0_i32, %c0_i32_0, %c0_i32_1 : i32, i32, i32
  }
  func.func @transform_7(%arg0: i32) -> (i32, i32, i32) {
    %c0_i32 = arith.constant 0 : i32
    %c0_i32_0 = arith.constant 0 : i32
    %c0_i32_1 = arith.constant 0 : i32
    %c0_i32_2 = arith.constant 0 : i32
    return %c0_i32, %c0_i32_0, %c0_i32_1 : i32, i32, i32
  }
  func.func @transform_8(%arg0: i32) -> (i32, i32, i32) {
    %c0_i32 = arith.constant 0 : i32
    %c0_i32_0 = arith.constant 0 : i32
    %c0_i32_1 = arith.constant 0 : i32
    %c0_i32_2 = arith.constant 0 : i32
    return %c0_i32, %c0_i32_0, %c0_i32_1 : i32, i32, i32
  }
  func.func @transform_9(%arg0: i32) -> (i32, i32) {
    %c0_i32 = arith.constant 0 : i32
    %c0_i32_0 = arith.constant 0 : i32
    %c0_i32_1 = arith.constant 0 : i32
    return %c0_i32, %c0_i32_0 : i32, i32
  }
  func.func @transform_10(%arg0: i32) -> (i32, i32) {
    %c0_i32 = arith.constant 0 : i32
    %c0_i32_0 = arith.constant 0 : i32
    %c0_i32_1 = arith.constant 0 : i32
    return %c0_i32, %c0_i32_0 : i32, i32
  }
  func.func @transform_11(%arg0: i32) -> (i32, i32) {
    %c0_i32 = arith.constant 0 : i32
    %c0_i32_0 = arith.constant 0 : i32
    %c0_i32_1 = arith.constant 0 : i32
    return %c0_i32, %c0_i32_0 : i32, i32
  }
  func.func @transform_12(%arg0: i32) -> (i32, i32, i32) {
    %c0_i32 = arith.constant 0 : i32
    %c0_i32_0 = arith.constant 0 : i32
    %c0_i32_1 = arith.constant 0 : i32
    %c0_i32_2 = arith.constant 0 : i32
    return %c0_i32, %c0_i32_0, %c0_i32_1 : i32, i32, i32
  }
  func.func @transform_13(%arg0: i32) -> (i32, i32, i32) {
    %c0_i32 = arith.constant 0 : i32
    %c0_i32_0 = arith.constant 0 : i32
    %c0_i32_1 = arith.constant 0 : i32
    %c0_i32_2 = arith.constant 0 : i32
    return %c0_i32, %c0_i32_0, %c0_i32_1 : i32, i32, i32
  }
  func.func @transform_14(%arg0: i32) -> (i32, i32, i32) {
    %c0_i32 = arith.constant 0 : i32
    %c0_i32_0 = arith.constant 0 : i32
    %c0_i32_1 = arith.constant 0 : i32
    %c0_i32_2 = arith.constant 0 : i32
    return %c0_i32, %c0_i32_0, %c0_i32_1 : i32, i32, i32
  }
  func.func @transform_15(%arg0: i32) -> (i32, i32, i32) {
    %c0_i32 = arith.constant 0 : i32
    %c0_i32_0 = arith.constant 0 : i32
    %c0_i32_1 = arith.constant 0 : i32
    %c0_i32_2 = arith.constant 0 : i32
    return %c0_i32, %c0_i32_0, %c0_i32_1 : i32, i32, i32
  }
  func.func @transform_16(%arg0: i32) -> (i32, i32, i32) {
    %c0_i32 = arith.constant 0 : i32
    %c0_i32_0 = arith.constant 0 : i32
    %c0_i32_1 = arith.constant 0 : i32
    %c0_i32_2 = arith.constant 0 : i32
    return %c0_i32, %c0_i32_0, %c0_i32_1 : i32, i32, i32
  }
  func.func @transform_17(%arg0: i32) -> (i32, i32) {
    %c0_i32 = arith.constant 0 : i32
    %c0_i32_0 = arith.constant 0 : i32
    %c0_i32_1 = arith.constant 0 : i32
    return %c0_i32, %c0_i32_0 : i32, i32
  }
  func.func @transform_18(%arg0: i32) -> (i32, i32) {
    %c0_i32 = arith.constant 0 : i32
    %c0_i32_0 = arith.constant 0 : i32
    %c0_i32_1 = arith.constant 0 : i32
    return %c0_i32, %c0_i32_0 : i32, i32
  }
  func.func @transform_19(%arg0: i32) -> (i32, i32) {
    %c0_i32 = arith.constant 0 : i32
    %c0_i32_0 = arith.constant 0 : i32
    %c0_i32_1 = arith.constant 0 : i32
    return %c0_i32, %c0_i32_0 : i32, i32
  }
  func.func @transform_20(%arg0: i32) -> (i32, i32, i32) {
    %c0_i32 = arith.constant 0 : i32
    %c0_i32_0 = arith.constant 0 : i32
    %c0_i32_1 = arith.constant 0 : i32
    %c0_i32_2 = arith.constant 0 : i32
    return %c0_i32, %c0_i32_0, %c0_i32_1 : i32, i32, i32
  }
  func.func @transform_21(%arg0: i32) -> (i32, i32, i32) {
    %c0_i32 = arith.constant 0 : i32
    %c0_i32_0 = arith.constant 0 : i32
    %c0_i32_1 = arith.constant 0 : i32
    %c0_i32_2 = arith.constant 0 : i32
    return %c0_i32, %c0_i32_0, %c0_i32_1 : i32, i32, i32
  }
  func.func @transform_22(%arg0: i32) -> (i32, i32, i32) {
    %c0_i32 = arith.constant 0 : i32
    %c0_i32_0 = arith.constant 0 : i32
    %c0_i32_1 = arith.constant 0 : i32
    %c0_i32_2 = arith.constant 0 : i32
    return %c0_i32, %c0_i32_0, %c0_i32_1 : i32, i32, i32
  }
  func.func @transform_23(%arg0: i32) -> (i32, i32) {
    %c0_i32 = arith.constant 0 : i32
    %c0_i32_0 = arith.constant 0 : i32
    %c0_i32_1 = arith.constant 0 : i32
    return %c0_i32, %c0_i32_0 : i32, i32
  }
  func.func @transform_24(%arg0: i32) -> (i32, i32) {
    %c0_i32 = arith.constant 0 : i32
    %c0_i32_0 = arith.constant 0 : i32
    %c0_i32_1 = arith.constant 0 : i32
    return %c0_i32, %c0_i32_0 : i32, i32
  }
  func.func @transform_25(%arg0: i32) -> (i32, i32) {
    %c0_i32 = arith.constant 0 : i32
    %c0_i32_0 = arith.constant 0 : i32
    %c0_i32_1 = arith.constant 0 : i32
    return %c0_i32, %c0_i32_0 : i32, i32
  }
  func.func @transform_26(%arg0: i32) -> (i32, i32, i32) {
    %c0_i32 = arith.constant 0 : i32
    %c0_i32_0 = arith.constant 0 : i32
    %c0_i32_1 = arith.constant 0 : i32
    return %arg0, %c0_i32, %c0_i32_0 : i32, i32, i32
  }
  func.func @transform_27(%arg0: i32) -> (i32, i32, i32, i32) {
    %c0_i32 = arith.constant 0 : i32
    %c0_i32_0 = arith.constant 0 : i32
    %c0_i32_1 = arith.constant 0 : i32
    %c0_i32_2 = arith.constant 0 : i32
    return %arg0, %c0_i32, %c0_i32_0, %c0_i32_1 : i32, i32, i32, i32
  }
  func.func @transform_28(%arg0: i32) -> (i32, i32, i32, i32) {
    %c0_i32 = arith.constant 0 : i32
    %c0_i32_0 = arith.constant 0 : i32
    %c0_i32_1 = arith.constant 0 : i32
    %c0_i32_2 = arith.constant 0 : i32
    return %arg0, %c0_i32, %c0_i32_0, %c0_i32_1 : i32, i32, i32, i32
  }
  func.func @transform_29(%arg0: i32) -> (i32, i32, i32, i32) {
    %c0_i32 = arith.constant 0 : i32
    %c0_i32_0 = arith.constant 0 : i32
    %c0_i32_1 = arith.constant 0 : i32
    %c0_i32_2 = arith.constant 0 : i32
    return %arg0, %c0_i32, %c0_i32_0, %c0_i32_1 : i32, i32, i32, i32
  }
  func.func @transform_30(%arg0: i32) -> (i32, i32, i32, i32) {
    %c0_i32 = arith.constant 0 : i32
    %c0_i32_0 = arith.constant 0 : i32
    %c0_i32_1 = arith.constant 0 : i32
    %c0_i32_2 = arith.constant 0 : i32
    return %arg0, %c0_i32, %c0_i32_0, %c0_i32_1 : i32, i32, i32, i32
  }
}

module attributes {stable_mosaic.version = 11 : i64} {
  func.func @_decoder_layer_kernel(%arg0: i32, %arg1: memref<1x8x32xf32, #tpu.memory_space<vmem>>, %arg2: memref<1x8x32xf32, #tpu.memory_space<vmem>>, %arg3: memref<1x1x8x8xf32, #tpu.memory_space<vmem>>, %arg4: memref<1x1x8x8xf32, #tpu.memory_space<vmem>>, %arg5: memref<4x32x8xbf16, #tpu.memory_space<vmem>>, %arg6: memref<4x1x8xf32, #tpu.memory_space<vmem>>, %arg7: memref<4x32x16xbf16, #tpu.memory_space<vmem>>, %arg8: memref<4x1x16xf32, #tpu.memory_space<vmem>>, %arg9: memref<4x8x32xbf16, #tpu.memory_space<vmem>>, %arg10: memref<1x32xf32, #tpu.memory_space<vmem>>, %arg11: memref<1x32xf32, #tpu.memory_space<vmem>>, %arg12: memref<1x32xf32, #tpu.memory_space<vmem>>, %arg13: memref<4x32x8xbf16, #tpu.memory_space<vmem>>, %arg14: memref<4x1x8xf32, #tpu.memory_space<vmem>>, %arg15: memref<4x32x16xbf16, #tpu.memory_space<vmem>>, %arg16: memref<4x1x16xf32, #tpu.memory_space<vmem>>, %arg17: memref<4x8x32xbf16, #tpu.memory_space<vmem>>, %arg18: memref<1x32xf32, #tpu.memory_space<vmem>>, %arg19: memref<1x32xf32, #tpu.memory_space<vmem>>, %arg20: memref<1x32xf32, #tpu.memory_space<vmem>>, %arg21: memref<2x32x32xbf16, #tpu.memory_space<vmem>>, %arg22: memref<2x1x32xf32, #tpu.memory_space<vmem>>, %arg23: memref<2x32x32xbf16, #tpu.memory_space<vmem>>, %arg24: memref<1x32xf32, #tpu.memory_space<vmem>>, %arg25: memref<1x32xf32, #tpu.memory_space<vmem>>, %arg26: memref<1x32xf32, #tpu.memory_space<vmem>>, %arg27: memref<1x8x32xf32, #tpu.memory_space<vmem>>, %arg28: memref<1x4x8x8xf32, #tpu.memory_space<vmem>>, %arg29: memref<1x4x8x8xf32, #tpu.memory_space<vmem>>, %arg30: memref<1x4x8x8xf32, #tpu.memory_space<vmem>>, %arg31: memref<1x4x8x8xf32, #tpu.memory_space<vmem>>) attributes {dimension_semantics = [#tpu.dimension_semantics<parallel>], iteration_bounds = array<i64: 2>, scalar_prefetch = 0 : i64, scratch_operands = 0 : i64, tpu.core_type = #tpu.core_type<tc>, window_params = [{transform_indices = @transform_0, window_bounds = array<i64: 1, 8, 32>}, {transform_indices = @transform_1, window_bounds = array<i64: 1, 8, 32>}, {transform_indices = @transform_2, window_bounds = array<i64: 1, 1, 8, 8>}, {transform_indices = @transform_3, window_bounds = array<i64: 1, 1, 8, 8>}, {pipeline_mode = #tpu.pipeline_mode<synchronous>, transform_indices = @transform_4, window_bounds = array<i64: 4, 32, 8>}, {pipeline_mode = #tpu.pipeline_mode<synchronous>, transform_indices = @transform_5, window_bounds = array<i64: 4, 1, 8>}, {pipeline_mode = #tpu.pipeline_mode<synchronous>, transform_indices = @transform_6, window_bounds = array<i64: 4, 32, 16>}, {pipeline_mode = #tpu.pipeline_mode<synchronous>, transform_indices = @transform_7, window_bounds = array<i64: 4, 1, 16>}, {pipeline_mode = #tpu.pipeline_mode<synchronous>, transform_indices = @transform_8, window_bounds = array<i64: 4, 8, 32>}, {pipeline_mode = #tpu.pipeline_mode<synchronous>, transform_indices = @transform_9, window_bounds = array<i64: 1, 32>}, {pipeline_mode = #tpu.pipeline_mode<synchronous>, transform_indices = @transform_10, window_bounds = array<i64: 1, 32>}, {pipeline_mode = #tpu.pipeline_mode<synchronous>, transform_indices = @transform_11, window_bounds = array<i64: 1, 32>}, {pipeline_mode = #tpu.pipeline_mode<synchronous>, transform_indices = @transform_12, window_bounds = array<i64: 4, 32, 8>}, {pipeline_mode = #tpu.pipeline_mode<synchronous>, transform_indices = @transform_13, window_bounds = array<i64: 4, 1, 8>}, {pipeline_mode = #tpu.pipeline_mode<synchronous>, transform_indices = @transform_14, window_bounds = array<i64: 4, 32, 16>}, {pipeline_mode = #tpu.pipeline_mode<synchronous>, transform_indices = @transform_15, window_bounds = array<i64: 4, 1, 16>}, {pipeline_mode = #tpu.pipeline_mode<synchronous>, transform_indices = @transform_16, window_bounds = array<i64: 4, 8, 32>}, {pipeline_mode = #tpu.pipeline_mode<synchronous>, transform_indices = @transform_17, window_bounds = array<i64: 1, 32>}, {pipeline_mode = #tpu.pipeline_mode<synchronous>, transform_indices = @transform_18, window_bounds = array<i64: 1, 32>}, {pipeline_mode = #tpu.pipeline_mode<synchronous>, transform_indices = @transform_19, window_bounds = array<i64: 1, 32>}, {pipeline_mode = #tpu.pipeline_mode<synchronous>, transform_indices = @transform_20, window_bounds = array<i64: 2, 32, 32>}, {pipeline_mode = #tpu.pipeline_mode<synchronous>, transform_indices = @transform_21, window_bounds = array<i64: 2, 1, 32>}, {pipeline_mode = #tpu.pipeline_mode<synchronous>, transform_indices = @transform_22, window_bounds = array<i64: 2, 32, 32>}, {pipeline_mode = #tpu.pipeline_mode<synchronous>, transform_indices = @transform_23, window_bounds = array<i64: 1, 32>}, {pipeline_mode = #tpu.pipeline_mode<synchronous>, transform_indices = @transform_24, window_bounds = array<i64: 1, 32>}, {pipeline_mode = #tpu.pipeline_mode<synchronous>, transform_indices = @transform_25, window_bounds = array<i64: 1, 32>}, {transform_indices = @transform_26, window_bounds = array<i64: 1, 8, 32>}, {transform_indices = @transform_27, window_bounds = array<i64: 1, 4, 8, 8>}, {transform_indices = @transform_28, window_bounds = array<i64: 1, 4, 8, 8>}, {transform_indices = @transform_29, window_bounds = array<i64: 1, 4, 8, 8>}, {transform_indices = @transform_30, window_bounds = array<i64: 1, 4, 8, 8>}]} {
    %c0 = arith.constant 0 : index
    %c0_0 = arith.constant 0 : index
    %c0_1 = arith.constant 0 : index
    %0 = vector.load %arg1[%c0, %c0_0, %c0_1] : memref<1x8x32xf32, #tpu.memory_space<vmem>>, vector<1x8x32xf32>
    %1 = vector.shape_cast %0 : vector<1x8x32xf32> to vector<8x32xf32>
    %2 = arith.truncf %1 : vector<8x32xf32> to vector<8x32xbf16>
    %c0_2 = arith.constant 0 : index
    %c0_3 = arith.constant 0 : index
    %c0_4 = arith.constant 0 : index
    %3 = vector.load %arg2[%c0_2, %c0_3, %c0_4] : memref<1x8x32xf32, #tpu.memory_space<vmem>>, vector<1x8x32xf32>
    %4 = vector.shape_cast %3 : vector<1x8x32xf32> to vector<8x32xf32>
    %5 = arith.truncf %4 : vector<8x32xf32> to vector<8x32xbf16>
    %c0_5 = arith.constant 0 : index
    %c0_6 = arith.constant 0 : index
    %c0_7 = arith.constant 0 : index
    %c0_8 = arith.constant 0 : index
    %6 = vector.load %arg3[%c0_5, %c0_6, %c0_7, %c0_8] : memref<1x1x8x8xf32, #tpu.memory_space<vmem>>, vector<1x1x8x8xf32>
    %7 = vector.shape_cast %6 : vector<1x1x8x8xf32> to vector<8x8xf32>
    %cst = arith.constant 0.000000e+00 : f32
    %8 = vector.broadcast %cst : f32 to vector<8x32xf32>
    %c0_i32 = arith.constant 0 : i32
    %c4_i32 = arith.constant 4 : i32
    %9 = arith.addi %c0_i32, %c4_i32 : i32
    %c1_i32 = arith.constant 1 : i32
    %10 = scf.for %arg32 = %c0_i32 to %9 step %c1_i32 iter_args(%arg33 = %8) -> (vector<8x32xf32>)  : i32 {
      %108 = arith.index_cast %arg32 : i32 to index
      %c0_59 = arith.constant 0 : index
      %c0_60 = arith.constant 0 : index
      %109 = vector.load %arg5[%108, %c0_59, %c0_60] : memref<4x32x8xbf16, #tpu.memory_space<vmem>>, vector<1x32x8xbf16>
      %110 = vector.shape_cast %109 : vector<1x32x8xbf16> to vector<32x8xbf16>
      %cst_61 = arith.constant dense<0.000000e+00> : vector<8x8xf32>
      %111 = tpu.matmul %2, %110, %cst_61 {dimension_numbers = #tpu.dot_dimension_numbers<[1], [0], [0], [1], [0, 0, 1, 1], [], []>} : vector<8x32xbf16>, vector<32x8xbf16>, vector<8x8xf32> -> vector<8x8xf32>
      %112 = arith.index_cast %arg32 : i32 to index
      %c0_62 = arith.constant 0 : index
      %c0_63 = arith.constant 0 : index
      %113 = vector.load %arg6[%112, %c0_62, %c0_63] : memref<4x1x8xf32, #tpu.memory_space<vmem>>, vector<1x1x8xf32>
      %114 = vector.shape_cast %113 : vector<1x1x8xf32> to vector<1x8xf32>
      %115 = vector.broadcast %114 : vector<1x8xf32> to vector<8x8xf32>
      %116 = arith.addf %111, %115 : vector<8x8xf32>
      %cst_64 = arith.constant 0.353553385 : f32
      %117 = vector.broadcast %cst_64 : f32 to vector<8x8xf32>
      %118 = arith.mulf %116, %117 : vector<8x8xf32>
      %119 = arith.index_cast %arg32 : i32 to index
      %c0_65 = arith.constant 0 : index
      %c0_66 = arith.constant 0 : index
      %120 = vector.load %arg7[%119, %c0_65, %c0_66] : memref<4x32x16xbf16, #tpu.memory_space<vmem>>, vector<1x32x16xbf16>
      %121 = vector.shape_cast %120 : vector<1x32x16xbf16> to vector<32x16xbf16>
      %cst_67 = arith.constant dense<0.000000e+00> : vector<8x16xf32>
      %122 = tpu.matmul %2, %121, %cst_67 {dimension_numbers = #tpu.dot_dimension_numbers<[1], [0], [0], [1], [0, 0, 1, 1], [], []>} : vector<8x32xbf16>, vector<32x16xbf16>, vector<8x16xf32> -> vector<8x16xf32>
      %123 = arith.index_cast %arg32 : i32 to index
      %c0_68 = arith.constant 0 : index
      %c0_69 = arith.constant 0 : index
      %124 = vector.load %arg8[%123, %c0_68, %c0_69] : memref<4x1x16xf32, #tpu.memory_space<vmem>>, vector<1x1x16xf32>
      %125 = vector.shape_cast %124 : vector<1x1x16xf32> to vector<1x16xf32>
      %126 = vector.broadcast %125 : vector<1x16xf32> to vector<8x16xf32>
      %127 = arith.addf %122, %126 : vector<8x16xf32>
      %128 = vector.extract_strided_slice %127 {offsets = [0, 0], sizes = [8, 8], strides = [1, 1]} : vector<8x16xf32> to vector<8x8xf32>
      %129 = vector.extract_strided_slice %127 {offsets = [0, 8], sizes = [8, 8], strides = [1, 1]} : vector<8x16xf32> to vector<8x8xf32>
      %c0_70 = arith.constant 0 : index
      %130 = arith.index_cast %arg32 : i32 to index
      %c0_71 = arith.constant 0 : index
      %c0_72 = arith.constant 0 : index
      %131 = vector.load %arg28[%c0_70, %130, %c0_71, %c0_72] : memref<1x4x8x8xf32, #tpu.memory_space<vmem>>, vector<1x1x8x8xf32>
      %132 = vector.shape_cast %131 : vector<1x1x8x8xf32> to vector<8x8xf32>
      %133 = vector.shape_cast %128 : vector<8x8xf32> to vector<1x1x8x8xf32>
      tpu.vector_store %arg28[%c0_70, %130, %c0_71, %c0_72], %133 {strides = array<i32>} : memref<1x4x8x8xf32, #tpu.memory_space<vmem>>, vector<1x1x8x8xf32>,
      %c0_73 = arith.constant 0 : index
      %134 = arith.index_cast %arg32 : i32 to index
      %c0_74 = arith.constant 0 : index
      %c0_75 = arith.constant 0 : index
      %135 = vector.load %arg29[%c0_73, %134, %c0_74, %c0_75] : memref<1x4x8x8xf32, #tpu.memory_space<vmem>>, vector<1x1x8x8xf32>
      %136 = vector.shape_cast %135 : vector<1x1x8x8xf32> to vector<8x8xf32>
      %137 = vector.shape_cast %129 : vector<8x8xf32> to vector<1x1x8x8xf32>
      tpu.vector_store %arg29[%c0_73, %134, %c0_74, %c0_75], %137 {strides = array<i32>} : memref<1x4x8x8xf32, #tpu.memory_space<vmem>>, vector<1x1x8x8xf32>,
      %138 = arith.truncf %118 : vector<8x8xf32> to vector<8x8xbf16>
      %139 = arith.truncf %128 : vector<8x8xf32> to vector<8x8xbf16>
      %cst_76 = arith.constant dense<0.000000e+00> : vector<8x8xf32>
      %140 = tpu.matmul %138, %139, %cst_76 {dimension_numbers = #tpu.dot_dimension_numbers<[1], [1], [0], [0], [0, 0, 1, 0], [], []>} : vector<8x8xbf16>, vector<8x8xbf16>, vector<8x8xf32> -> vector<8x8xf32>
      %141 = arith.addf %140, %7 : vector<8x8xf32>
      %cst_77 = arith.constant dense<0xFF800000> : vector<8xf32>
      %142 = vector.multi_reduction <maximumf>, %141, %cst_77 [1] : vector<8x8xf32> to vector<8xf32>
      %143 = vector.shape_cast %142 : vector<8xf32> to vector<8x1xf32>
      %144 = vector.broadcast %143 : vector<8x1xf32> to vector<8x8xf32>
      %145 = arith.subf %141, %144 : vector<8x8xf32>
      %146 = math.exp %145 : vector<8x8xf32>
      %cst_78 = arith.constant dense<0.000000e+00> : vector<8xf32>
      %147 = vector.multi_reduction <add>, %146, %cst_78 [1] : vector<8x8xf32> to vector<8xf32>
      %148 = vector.shape_cast %147 : vector<8xf32> to vector<8x1xf32>
      %149 = tpu.reciprocal %148 {approx = true} : vector<8x1xf32> -> vector<8x1xf32>
      %150 = vector.broadcast %149 : vector<8x1xf32> to vector<8x8xf32>
      %151 = arith.mulf %146, %150 : vector<8x8xf32>
      %152 = arith.truncf %151 : vector<8x8xf32> to vector<8x8xbf16>
      %153 = arith.truncf %129 : vector<8x8xf32> to vector<8x8xbf16>
      %cst_79 = arith.constant dense<0.000000e+00> : vector<8x8xf32>
      %154 = tpu.matmul %152, %153, %cst_79 {dimension_numbers = #tpu.dot_dimension_numbers<[1], [0], [0], [1], [0, 0, 1, 1], [], []>} : vector<8x8xbf16>, vector<8x8xbf16>, vector<8x8xf32> -> vector<8x8xf32>
      %155 = arith.truncf %154 : vector<8x8xf32> to vector<8x8xbf16>
      %156 = arith.index_cast %arg32 : i32 to index
      %c0_80 = arith.constant 0 : index
      %c0_81 = arith.constant 0 : index
      %157 = vector.load %arg9[%156, %c0_80, %c0_81] : memref<4x8x32xbf16, #tpu.memory_space<vmem>>, vector<1x8x32xbf16>
      %158 = vector.shape_cast %157 : vector<1x8x32xbf16> to vector<8x32xbf16>
      %cst_82 = arith.constant dense<0.000000e+00> : vector<8x32xf32>
      %159 = tpu.matmul %155, %158, %cst_82 {dimension_numbers = #tpu.dot_dimension_numbers<[1], [0], [0], [1], [0, 0, 1, 1], [], []>} : vector<8x8xbf16>, vector<8x32xbf16>, vector<8x32xf32> -> vector<8x32xf32>
      %160 = arith.addf %arg33, %159 : vector<8x32xf32>
      scf.yield %160 : vector<8x32xf32>
    }
    %c4_i32_9 = arith.constant 4 : i32
    %c0_10 = arith.constant 0 : index
    %c0_11 = arith.constant 0 : index
    %11 = vector.load %arg10[%c0_10, %c0_11] : memref<1x32xf32, #tpu.memory_space<vmem>>, vector<1x32xf32>
    %12 = vector.broadcast %11 : vector<1x32xf32> to vector<8x32xf32>
    %13 = arith.addf %10, %12 : vector<8x32xf32>
    %14 = arith.addf %1, %13 : vector<8x32xf32>
    %cst_12 = arith.constant dense<0.000000e+00> : vector<8xf32>
    %15 = vector.multi_reduction <add>, %14, %cst_12 [1] : vector<8x32xf32> to vector<8xf32>
    %16 = vector.shape_cast %15 : vector<8xf32> to vector<8x1xf32>
    %cst_13 = arith.constant 3.200000e+01 : f32
    %17 = vector.broadcast %cst_13 : f32 to vector<8x1xf32>
    %18 = arith.divf %16, %17 : vector<8x1xf32>
    %19 = vector.broadcast %18 : vector<8x1xf32> to vector<8x32xf32>
    %20 = arith.subf %14, %19 : vector<8x32xf32>
    %21 = arith.mulf %20, %20 : vector<8x32xf32>
    %cst_14 = arith.constant dense<0.000000e+00> : vector<8xf32>
    %22 = vector.multi_reduction <add>, %21, %cst_14 [1] : vector<8x32xf32> to vector<8xf32>
    %23 = vector.shape_cast %22 : vector<8xf32> to vector<8x1xf32>
    %cst_15 = arith.constant 3.200000e+01 : f32
    %24 = vector.broadcast %cst_15 : f32 to vector<8x1xf32>
    %25 = arith.divf %23, %24 : vector<8x1xf32>
    %26 = vector.broadcast %18 : vector<8x1xf32> to vector<8x32xf32>
    %27 = arith.subf %14, %26 : vector<8x32xf32>
    %cst_16 = arith.constant 9.99999974E-6 : f32
    %28 = vector.broadcast %cst_16 : f32 to vector<8x1xf32>
    %29 = arith.addf %25, %28 : vector<8x1xf32>
    %30 = math.rsqrt %29 : vector<8x1xf32>
    %31 = vector.broadcast %30 : vector<8x1xf32> to vector<8x32xf32>
    %32 = arith.mulf %27, %31 : vector<8x32xf32>
    %c0_17 = arith.constant 0 : index
    %c0_18 = arith.constant 0 : index
    %33 = vector.load %arg11[%c0_17, %c0_18] : memref<1x32xf32, #tpu.memory_space<vmem>>, vector<1x32xf32>
    %34 = vector.broadcast %33 : vector<1x32xf32> to vector<8x32xf32>
    %35 = arith.mulf %32, %34 : vector<8x32xf32>
    %c0_19 = arith.constant 0 : index
    %c0_20 = arith.constant 0 : index
    %36 = vector.load %arg12[%c0_19, %c0_20] : memref<1x32xf32, #tpu.memory_space<vmem>>, vector<1x32xf32>
    %37 = vector.broadcast %36 : vector<1x32xf32> to vector<8x32xf32>
    %38 = arith.addf %35, %37 : vector<8x32xf32>
    %39 = arith.truncf %38 : vector<8x32xf32> to vector<8x32xbf16>
    %c0_21 = arith.constant 0 : index
    %c0_22 = arith.constant 0 : index
    %c0_23 = arith.constant 0 : index
    %c0_24 = arith.constant 0 : index
    %40 = vector.load %arg4[%c0_21, %c0_22, %c0_23, %c0_24] : memref<1x1x8x8xf32, #tpu.memory_space<vmem>>, vector<1x1x8x8xf32>
    %41 = vector.shape_cast %40 : vector<1x1x8x8xf32> to vector<8x8xf32>
    %cst_25 = arith.constant 0.000000e+00 : f32
    %42 = vector.broadcast %cst_25 : f32 to vector<8x32xf32>
    %c0_i32_26 = arith.constant 0 : i32
    %c4_i32_27 = arith.constant 4 : i32
    %43 = arith.addi %c0_i32_26, %c4_i32_27 : i32
    %c1_i32_28 = arith.constant 1 : i32
    %44 = scf.for %arg32 = %c0_i32_26 to %43 step %c1_i32_28 iter_args(%arg33 = %42) -> (vector<8x32xf32>)  : i32 {
      %108 = arith.index_cast %arg32 : i32 to index
      %c0_59 = arith.constant 0 : index
      %c0_60 = arith.constant 0 : index
      %109 = vector.load %arg13[%108, %c0_59, %c0_60] : memref<4x32x8xbf16, #tpu.memory_space<vmem>>, vector<1x32x8xbf16>
      %110 = vector.shape_cast %109 : vector<1x32x8xbf16> to vector<32x8xbf16>
      %cst_61 = arith.constant dense<0.000000e+00> : vector<8x8xf32>
      %111 = tpu.matmul %39, %110, %cst_61 {dimension_numbers = #tpu.dot_dimension_numbers<[1], [0], [0], [1], [0, 0, 1, 1], [], []>} : vector<8x32xbf16>, vector<32x8xbf16>, vector<8x8xf32> -> vector<8x8xf32>
      %112 = arith.index_cast %arg32 : i32 to index
      %c0_62 = arith.constant 0 : index
      %c0_63 = arith.constant 0 : index
      %113 = vector.load %arg14[%112, %c0_62, %c0_63] : memref<4x1x8xf32, #tpu.memory_space<vmem>>, vector<1x1x8xf32>
      %114 = vector.shape_cast %113 : vector<1x1x8xf32> to vector<1x8xf32>
      %115 = vector.broadcast %114 : vector<1x8xf32> to vector<8x8xf32>
      %116 = arith.addf %111, %115 : vector<8x8xf32>
      %cst_64 = arith.constant 0.353553385 : f32
      %117 = vector.broadcast %cst_64 : f32 to vector<8x8xf32>
      %118 = arith.mulf %116, %117 : vector<8x8xf32>
      %119 = arith.index_cast %arg32 : i32 to index
      %c0_65 = arith.constant 0 : index
      %c0_66 = arith.constant 0 : index
      %120 = vector.load %arg15[%119, %c0_65, %c0_66] : memref<4x32x16xbf16, #tpu.memory_space<vmem>>, vector<1x32x16xbf16>
      %121 = vector.shape_cast %120 : vector<1x32x16xbf16> to vector<32x16xbf16>
      %cst_67 = arith.constant dense<0.000000e+00> : vector<8x16xf32>
      %122 = tpu.matmul %5, %121, %cst_67 {dimension_numbers = #tpu.dot_dimension_numbers<[1], [0], [0], [1], [0, 0, 1, 1], [], []>} : vector<8x32xbf16>, vector<32x16xbf16>, vector<8x16xf32> -> vector<8x16xf32>
      %123 = arith.index_cast %arg32 : i32 to index
      %c0_68 = arith.constant 0 : index
      %c0_69 = arith.constant 0 : index
      %124 = vector.load %arg16[%123, %c0_68, %c0_69] : memref<4x1x16xf32, #tpu.memory_space<vmem>>, vector<1x1x16xf32>
      %125 = vector.shape_cast %124 : vector<1x1x16xf32> to vector<1x16xf32>
      %126 = vector.broadcast %125 : vector<1x16xf32> to vector<8x16xf32>
      %127 = arith.addf %122, %126 : vector<8x16xf32>
      %128 = vector.extract_strided_slice %127 {offsets = [0, 0], sizes = [8, 8], strides = [1, 1]} : vector<8x16xf32> to vector<8x8xf32>
      %129 = vector.extract_strided_slice %127 {offsets = [0, 8], sizes = [8, 8], strides = [1, 1]} : vector<8x16xf32> to vector<8x8xf32>
      %c0_70 = arith.constant 0 : index
      %130 = arith.index_cast %arg32 : i32 to index
      %c0_71 = arith.constant 0 : index
      %c0_72 = arith.constant 0 : index
      %131 = vector.load %arg30[%c0_70, %130, %c0_71, %c0_72] : memref<1x4x8x8xf32, #tpu.memory_space<vmem>>, vector<1x1x8x8xf32>
      %132 = vector.shape_cast %131 : vector<1x1x8x8xf32> to vector<8x8xf32>
      %133 = vector.shape_cast %128 : vector<8x8xf32> to vector<1x1x8x8xf32>
      tpu.vector_store %arg30[%c0_70, %130, %c0_71, %c0_72], %133 {strides = array<i32>} : memref<1x4x8x8xf32, #tpu.memory_space<vmem>>, vector<1x1x8x8xf32>,
      %c0_73 = arith.constant 0 : index
      %134 = arith.index_cast %arg32 : i32 to index
      %c0_74 = arith.constant 0 : index
      %c0_75 = arith.constant 0 : index
      %135 = vector.load %arg31[%c0_73, %134, %c0_74, %c0_75] : memref<1x4x8x8xf32, #tpu.memory_space<vmem>>, vector<1x1x8x8xf32>
      %136 = vector.shape_cast %135 : vector<1x1x8x8xf32> to vector<8x8xf32>
      %137 = vector.shape_cast %129 : vector<8x8xf32> to vector<1x1x8x8xf32>
      tpu.vector_store %arg31[%c0_73, %134, %c0_74, %c0_75], %137 {strides = array<i32>} : memref<1x4x8x8xf32, #tpu.memory_space<vmem>>, vector<1x1x8x8xf32>,
      %138 = arith.truncf %118 : vector<8x8xf32> to vector<8x8xbf16>
      %139 = arith.truncf %128 : vector<8x8xf32> to vector<8x8xbf16>
      %cst_76 = arith.constant dense<0.000000e+00> : vector<8x8xf32>
      %140 = tpu.matmul %138, %139, %cst_76 {dimension_numbers = #tpu.dot_dimension_numbers<[1], [1], [0], [0], [0, 0, 1, 0], [], []>} : vector<8x8xbf16>, vector<8x8xbf16>, vector<8x8xf32> -> vector<8x8xf32>
      %141 = arith.addf %140, %41 : vector<8x8xf32>
      %cst_77 = arith.constant dense<0xFF800000> : vector<8xf32>
      %142 = vector.multi_reduction <maximumf>, %141, %cst_77 [1] : vector<8x8xf32> to vector<8xf32>
      %143 = vector.shape_cast %142 : vector<8xf32> to vector<8x1xf32>
      %144 = vector.broadcast %143 : vector<8x1xf32> to vector<8x8xf32>
      %145 = arith.subf %141, %144 : vector<8x8xf32>
      %146 = math.exp %145 : vector<8x8xf32>
      %cst_78 = arith.constant dense<0.000000e+00> : vector<8xf32>
      %147 = vector.multi_reduction <add>, %146, %cst_78 [1] : vector<8x8xf32> to vector<8xf32>
      %148 = vector.shape_cast %147 : vector<8xf32> to vector<8x1xf32>
      %149 = tpu.reciprocal %148 {approx = true} : vector<8x1xf32> -> vector<8x1xf32>
      %150 = vector.broadcast %149 : vector<8x1xf32> to vector<8x8xf32>
      %151 = arith.mulf %146, %150 : vector<8x8xf32>
      %152 = arith.truncf %151 : vector<8x8xf32> to vector<8x8xbf16>
      %153 = arith.truncf %129 : vector<8x8xf32> to vector<8x8xbf16>
      %cst_79 = arith.constant dense<0.000000e+00> : vector<8x8xf32>
      %154 = tpu.matmul %152, %153, %cst_79 {dimension_numbers = #tpu.dot_dimension_numbers<[1], [0], [0], [1], [0, 0, 1, 1], [], []>} : vector<8x8xbf16>, vector<8x8xbf16>, vector<8x8xf32> -> vector<8x8xf32>
      %155 = arith.truncf %154 : vector<8x8xf32> to vector<8x8xbf16>
      %156 = arith.index_cast %arg32 : i32 to index
      %c0_80 = arith.constant 0 : index
      %c0_81 = arith.constant 0 : index
      %157 = vector.load %arg17[%156, %c0_80, %c0_81] : memref<4x8x32xbf16, #tpu.memory_space<vmem>>, vector<1x8x32xbf16>
      %158 = vector.shape_cast %157 : vector<1x8x32xbf16> to vector<8x32xbf16>
      %cst_82 = arith.constant dense<0.000000e+00> : vector<8x32xf32>
      %159 = tpu.matmul %155, %158, %cst_82 {dimension_numbers = #tpu.dot_dimension_numbers<[1], [0], [0], [1], [0, 0, 1, 1], [], []>} : vector<8x8xbf16>, vector<8x32xbf16>, vector<8x32xf32> -> vector<8x32xf32>
      %160 = arith.addf %arg33, %159 : vector<8x32xf32>
      scf.yield %160 : vector<8x32xf32>
    }
    %c4_i32_29 = arith.constant 4 : i32
    %c0_30 = arith.constant 0 : index
    %c0_31 = arith.constant 0 : index
    %45 = vector.load %arg18[%c0_30, %c0_31] : memref<1x32xf32, #tpu.memory_space<vmem>>, vector<1x32xf32>
    %46 = vector.broadcast %45 : vector<1x32xf32> to vector<8x32xf32>
    %47 = arith.addf %44, %46 : vector<8x32xf32>
    %48 = arith.addf %38, %47 : vector<8x32xf32>
    %cst_32 = arith.constant dense<0.000000e+00> : vector<8xf32>
    %49 = vector.multi_reduction <add>, %48, %cst_32 [1] : vector<8x32xf32> to vector<8xf32>
    %50 = vector.shape_cast %49 : vector<8xf32> to vector<8x1xf32>
    %cst_33 = arith.constant 3.200000e+01 : f32
    %51 = vector.broadcast %cst_33 : f32 to vector<8x1xf32>
    %52 = arith.divf %50, %51 : vector<8x1xf32>
    %53 = vector.broadcast %52 : vector<8x1xf32> to vector<8x32xf32>
    %54 = arith.subf %48, %53 : vector<8x32xf32>
    %55 = arith.mulf %54, %54 : vector<8x32xf32>
    %cst_34 = arith.constant dense<0.000000e+00> : vector<8xf32>
    %56 = vector.multi_reduction <add>, %55, %cst_34 [1] : vector<8x32xf32> to vector<8xf32>
    %57 = vector.shape_cast %56 : vector<8xf32> to vector<8x1xf32>
    %cst_35 = arith.constant 3.200000e+01 : f32
    %58 = vector.broadcast %cst_35 : f32 to vector<8x1xf32>
    %59 = arith.divf %57, %58 : vector<8x1xf32>
    %60 = vector.broadcast %52 : vector<8x1xf32> to vector<8x32xf32>
    %61 = arith.subf %48, %60 : vector<8x32xf32>
    %cst_36 = arith.constant 9.99999974E-6 : f32
    %62 = vector.broadcast %cst_36 : f32 to vector<8x1xf32>
    %63 = arith.addf %59, %62 : vector<8x1xf32>
    %64 = math.rsqrt %63 : vector<8x1xf32>
    %65 = vector.broadcast %64 : vector<8x1xf32> to vector<8x32xf32>
    %66 = arith.mulf %61, %65 : vector<8x32xf32>
    %c0_37 = arith.constant 0 : index
    %c0_38 = arith.constant 0 : index
    %67 = vector.load %arg19[%c0_37, %c0_38] : memref<1x32xf32, #tpu.memory_space<vmem>>, vector<1x32xf32>
    %68 = vector.broadcast %67 : vector<1x32xf32> to vector<8x32xf32>
    %69 = arith.mulf %66, %68 : vector<8x32xf32>
    %c0_39 = arith.constant 0 : index
    %c0_40 = arith.constant 0 : index
    %70 = vector.load %arg20[%c0_39, %c0_40] : memref<1x32xf32, #tpu.memory_space<vmem>>, vector<1x32xf32>
    %71 = vector.broadcast %70 : vector<1x32xf32> to vector<8x32xf32>
    %72 = arith.addf %69, %71 : vector<8x32xf32>
    %73 = arith.truncf %72 : vector<8x32xf32> to vector<8x32xbf16>
    %cst_41 = arith.constant 0.000000e+00 : f32
    %74 = vector.broadcast %cst_41 : f32 to vector<8x32xf32>
    %c0_i32_42 = arith.constant 0 : i32
    %c2_i32 = arith.constant 2 : i32
    %75 = arith.addi %c0_i32_42, %c2_i32 : i32
    %c1_i32_43 = arith.constant 1 : i32
    %76 = scf.for %arg32 = %c0_i32_42 to %75 step %c1_i32_43 iter_args(%arg33 = %74) -> (vector<8x32xf32>)  : i32 {
      %108 = arith.index_cast %arg32 : i32 to index
      %c0_59 = arith.constant 0 : index
      %c0_60 = arith.constant 0 : index
      %109 = vector.load %arg21[%108, %c0_59, %c0_60] : memref<2x32x32xbf16, #tpu.memory_space<vmem>>, vector<1x32x32xbf16>
      %110 = vector.shape_cast %109 : vector<1x32x32xbf16> to vector<32x32xbf16>
      %cst_61 = arith.constant dense<0.000000e+00> : vector<8x32xf32>
      %111 = tpu.matmul %73, %110, %cst_61 {dimension_numbers = #tpu.dot_dimension_numbers<[1], [0], [0], [1], [0, 0, 1, 1], [], []>} : vector<8x32xbf16>, vector<32x32xbf16>, vector<8x32xf32> -> vector<8x32xf32>
      %112 = arith.index_cast %arg32 : i32 to index
      %c0_62 = arith.constant 0 : index
      %c0_63 = arith.constant 0 : index
      %113 = vector.load %arg22[%112, %c0_62, %c0_63] : memref<2x1x32xf32, #tpu.memory_space<vmem>>, vector<1x1x32xf32>
      %114 = vector.shape_cast %113 : vector<1x1x32xf32> to vector<1x32xf32>
      %115 = vector.broadcast %114 : vector<1x32xf32> to vector<8x32xf32>
      %116 = arith.addf %111, %115 : vector<8x32xf32>
      %117 = arith.mulf %116, %116 : vector<8x32xf32>
      %118 = arith.mulf %116, %117 : vector<8x32xf32>
      %cst_64 = arith.constant 4.471500e-02 : f32
      %119 = vector.broadcast %cst_64 : f32 to vector<8x32xf32>
      %120 = arith.mulf %119, %118 : vector<8x32xf32>
      %121 = arith.addf %116, %120 : vector<8x32xf32>
      %cst_65 = arith.constant 0.797884583 : f32
      %122 = vector.broadcast %cst_65 : f32 to vector<8x32xf32>
      %123 = arith.mulf %122, %121 : vector<8x32xf32>
      %124 = math.tanh %123 : vector<8x32xf32>
      %cst_66 = arith.constant 1.000000e+00 : f32
      %125 = vector.broadcast %cst_66 : f32 to vector<8x32xf32>
      %126 = arith.addf %125, %124 : vector<8x32xf32>
      %cst_67 = arith.constant 5.000000e-01 : f32
      %127 = vector.broadcast %cst_67 : f32 to vector<8x32xf32>
      %128 = arith.mulf %127, %126 : vector<8x32xf32>
      %129 = arith.mulf %116, %128 : vector<8x32xf32>
      %130 = arith.truncf %129 : vector<8x32xf32> to vector<8x32xbf16>
      %131 = arith.index_cast %arg32 : i32 to index
      %c0_68 = arith.constant 0 : index
      %c0_69 = arith.constant 0 : index
      %132 = vector.load %arg23[%131, %c0_68, %c0_69] : memref<2x32x32xbf16, #tpu.memory_space<vmem>>, vector<1x32x32xbf16>
      %133 = vector.shape_cast %132 : vector<1x32x32xbf16> to vector<32x32xbf16>
      %cst_70 = arith.constant dense<0.000000e+00> : vector<8x32xf32>
      %134 = tpu.matmul %130, %133, %cst_70 {dimension_numbers = #tpu.dot_dimension_numbers<[1], [0], [0], [1], [0, 0, 1, 1], [], []>} : vector<8x32xbf16>, vector<32x32xbf16>, vector<8x32xf32> -> vector<8x32xf32>
      %135 = arith.addf %arg33, %134 : vector<8x32xf32>
      scf.yield %135 : vector<8x32xf32>
    }
    %c2_i32_44 = arith.constant 2 : i32
    %c0_45 = arith.constant 0 : index
    %c0_46 = arith.constant 0 : index
    %77 = vector.load %arg24[%c0_45, %c0_46] : memref<1x32xf32, #tpu.memory_space<vmem>>, vector<1x32xf32>
    %78 = vector.broadcast %77 : vector<1x32xf32> to vector<8x32xf32>
    %79 = arith.addf %76, %78 : vector<8x32xf32>
    %80 = arith.addf %72, %79 : vector<8x32xf32>
    %cst_47 = arith.constant dense<0.000000e+00> : vector<8xf32>
    %81 = vector.multi_reduction <add>, %80, %cst_47 [1] : vector<8x32xf32> to vector<8xf32>
    %82 = vector.shape_cast %81 : vector<8xf32> to vector<8x1xf32>
    %cst_48 = arith.constant 3.200000e+01 : f32
    %83 = vector.broadcast %cst_48 : f32 to vector<8x1xf32>
    %84 = arith.divf %82, %83 : vector<8x1xf32>
    %85 = vector.broadcast %84 : vector<8x1xf32> to vector<8x32xf32>
    %86 = arith.subf %80, %85 : vector<8x32xf32>
    %87 = arith.mulf %86, %86 : vector<8x32xf32>
    %cst_49 = arith.constant dense<0.000000e+00> : vector<8xf32>
    %88 = vector.multi_reduction <add>, %87, %cst_49 [1] : vector<8x32xf32> to vector<8xf32>
    %89 = vector.shape_cast %88 : vector<8xf32> to vector<8x1xf32>
    %cst_50 = arith.constant 3.200000e+01 : f32
    %90 = vector.broadcast %cst_50 : f32 to vector<8x1xf32>
    %91 = arith.divf %89, %90 : vector<8x1xf32>
    %92 = vector.broadcast %84 : vector<8x1xf32> to vector<8x32xf32>
    %93 = arith.subf %80, %92 : vector<8x32xf32>
    %cst_51 = arith.constant 9.99999974E-6 : f32
    %94 = vector.broadcast %cst_51 : f32 to vector<8x1xf32>
    %95 = arith.addf %91, %94 : vector<8x1xf32>
    %96 = math.rsqrt %95 : vector<8x1xf32>
    %97 = vector.broadcast %96 : vector<8x1xf32> to vector<8x32xf32>
    %98 = arith.mulf %93, %97 : vector<8x32xf32>
    %c0_52 = arith.constant 0 : index
    %c0_53 = arith.constant 0 : index
    %99 = vector.load %arg25[%c0_52, %c0_53] : memref<1x32xf32, #tpu.memory_space<vmem>>, vector<1x32xf32>
    %100 = vector.broadcast %99 : vector<1x32xf32> to vector<8x32xf32>
    %101 = arith.mulf %98, %100 : vector<8x32xf32>
    %c0_54 = arith.constant 0 : index
    %c0_55 = arith.constant 0 : index
    %102 = vector.load %arg26[%c0_54, %c0_55] : memref<1x32xf32, #tpu.memory_space<vmem>>, vector<1x32xf32>
    %103 = vector.broadcast %102 : vector<1x32xf32> to vector<8x32xf32>
    %104 = arith.addf %101, %103 : vector<8x32xf32>
    %c0_56 = arith.constant 0 : index
    %c0_57 = arith.constant 0 : index
    %c0_58 = arith.constant 0 : index
    %105 = vector.load %arg27[%c0_56, %c0_57, %c0_58] : memref<1x8x32xf32, #tpu.memory_space<vmem>>, vector<1x8x32xf32>
    %106 = vector.shape_cast %105 : vector<1x8x32xf32> to vector<8x32xf32>
    %107 = vector.shape_cast %104 : vector<8x32xf32> to vector<1x8x32xf32>
    tpu.vector_store %arg27[%c0_56, %c0_57, %c0_58], %107 {strides = array<i32>} : memref<1x8x32xf32, #tpu.memory_space<vmem>>, vector<1x8x32xf32>,
    return
  }
  func.func @transform_0(%arg0: i32) -> (i32, i32, i32) {
    %c0_i32 = arith.constant 0 : i32
    %c0_i32_0 = arith.constant 0 : i32
    %c0_i32_1 = arith.constant 0 : i32
    return %arg0, %c0_i32, %c0_i32_0 : i32, i32, i32
  }
  func.func @transform_1(%arg0: i32) -> (i32, i32, i32) {
    %c0_i32 = arith.constant 0 : i32
    %c0_i32_0 = arith.constant 0 : i32
    %c0_i32_1 = arith.constant 0 : i32
    return %arg0, %c0_i32, %c0_i32_0 : i32, i32, i32
  }
  func.func @transform_2(%arg0: i32) -> (i32, i32, i32, i32) {
    %c0_i32 = arith.constant 0 : i32
    %c0_i32_0 = arith.constant 0 : i32
    %c0_i32_1 = arith.constant 0 : i32
    %c0_i32_2 = arith.constant 0 : i32
    return %arg0, %c0_i32, %c0_i32_0, %c0_i32_1 : i32, i32, i32, i32
  }
  func.func @transform_3(%arg0: i32) -> (i32, i32, i32, i32) {
    %c0_i32 = arith.constant 0 : i32
    %c0_i32_0 = arith.constant 0 : i32
    %c0_i32_1 = arith.constant 0 : i32
    %c0_i32_2 = arith.constant 0 : i32
    return %arg0, %c0_i32, %c0_i32_0, %c0_i32_1 : i32, i32, i32, i32
  }
  func.func @transform_4(%arg0: i32) -> (i32, i32, i32) {
    %c0_i32 = arith.constant 0 : i32
    %c0_i32_0 = arith.constant 0 : i32
    %c0_i32_1 = arith.constant 0 : i32
    %c0_i32_2 = arith.constant 0 : i32
    return %c0_i32, %c0_i32_0, %c0_i32_1 : i32, i32, i32
  }
  func.func @transform_5(%arg0: i32) -> (i32, i32, i32) {
    %c0_i32 = arith.constant 0 : i32
    %c0_i32_0 = arith.constant 0 : i32
    %c0_i32_1 = arith.constant 0 : i32
    %c0_i32_2 = arith.constant 0 : i32
    return %c0_i32, %c0_i32_0, %c0_i32_1 : i32, i32, i32
  }
  func.func @transform_6(%arg0: i32) -> (i32, i32, i32) {
    %c0_i32 = arith.constant 0 : i32
    %c0_i32_0 = arith.constant 0 : i32
    %c0_i32_1 = arith.constant 0 : i32
    %c0_i32_2 = arith.constant 0 : i32
    return %c0_i32, %c0_i32_0, %c0_i32_1 : i32, i32, i32
  }
  func.func @transform_7(%arg0: i32) -> (i32, i32, i32) {
    %c0_i32 = arith.constant 0 : i32
    %c0_i32_0 = arith.constant 0 : i32
    %c0_i32_1 = arith.constant 0 : i32
    %c0_i32_2 = arith.constant 0 : i32
    return %c0_i32, %c0_i32_0, %c0_i32_1 : i32, i32, i32
  }
  func.func @transform_8(%arg0: i32) -> (i32, i32, i32) {
    %c0_i32 = arith.constant 0 : i32
    %c0_i32_0 = arith.constant 0 : i32
    %c0_i32_1 = arith.constant 0 : i32
    %c0_i32_2 = arith.constant 0 : i32
    return %c0_i32, %c0_i32_0, %c0_i32_1 : i32, i32, i32
  }
  func.func @transform_9(%arg0: i32) -> (i32, i32) {
    %c0_i32 = arith.constant 0 : i32
    %c0_i32_0 = arith.constant 0 : i32
    %c0_i32_1 = arith.constant 0 : i32
    return %c0_i32, %c0_i32_0 : i32, i32
  }
  func.func @transform_10(%arg0: i32) -> (i32, i32) {
    %c0_i32 = arith.constant 0 : i32
    %c0_i32_0 = arith.constant 0 : i32
    %c0_i32_1 = arith.constant 0 : i32
    return %c0_i32, %c0_i32_0 : i32, i32
  }
  func.func @transform_11(%arg0: i32) -> (i32, i32) {
    %c0_i32 = arith.constant 0 : i32
    %c0_i32_0 = arith.constant 0 : i32
    %c0_i32_1 = arith.constant 0 : i32
    return %c0_i32, %c0_i32_0 : i32, i32
  }
  func.func @transform_12(%arg0: i32) -> (i32, i32, i32) {
    %c0_i32 = arith.constant 0 : i32
    %c0_i32_0 = arith.constant 0 : i32
    %c0_i32_1 = arith.constant 0 : i32
    %c0_i32_2 = arith.constant 0 : i32
    return %c0_i32, %c0_i32_0, %c0_i32_1 : i32, i32, i32
  }
  func.func @transform_13(%arg0: i32) -> (i32, i32, i32) {
    %c0_i32 = arith.constant 0 : i32
    %c0_i32_0 = arith.constant 0 : i32
    %c0_i32_1 = arith.constant 0 : i32
    %c0_i32_2 = arith.constant 0 : i32
    return %c0_i32, %c0_i32_0, %c0_i32_1 : i32, i32, i32
  }
  func.func @transform_14(%arg0: i32) -> (i32, i32, i32) {
    %c0_i32 = arith.constant 0 : i32
    %c0_i32_0 = arith.constant 0 : i32
    %c0_i32_1 = arith.constant 0 : i32
    %c0_i32_2 = arith.constant 0 : i32
    return %c0_i32, %c0_i32_0, %c0_i32_1 : i32, i32, i32
  }
  func.func @transform_15(%arg0: i32) -> (i32, i32, i32) {
    %c0_i32 = arith.constant 0 : i32
    %c0_i32_0 = arith.constant 0 : i32
    %c0_i32_1 = arith.constant 0 : i32
    %c0_i32_2 = arith.constant 0 : i32
    return %c0_i32, %c0_i32_0, %c0_i32_1 : i32, i32, i32
  }
  func.func @transform_16(%arg0: i32) -> (i32, i32, i32) {
    %c0_i32 = arith.constant 0 : i32
    %c0_i32_0 = arith.constant 0 : i32
    %c0_i32_1 = arith.constant 0 : i32
    %c0_i32_2 = arith.constant 0 : i32
    return %c0_i32, %c0_i32_0, %c0_i32_1 : i32, i32, i32
  }
  func.func @transform_17(%arg0: i32) -> (i32, i32) {
    %c0_i32 = arith.constant 0 : i32
    %c0_i32_0 = arith.constant 0 : i32
    %c0_i32_1 = arith.constant 0 : i32
    return %c0_i32, %c0_i32_0 : i32, i32
  }
  func.func @transform_18(%arg0: i32) -> (i32, i32) {
    %c0_i32 = arith.constant 0 : i32
    %c0_i32_0 = arith.constant 0 : i32
    %c0_i32_1 = arith.constant 0 : i32
    return %c0_i32, %c0_i32_0 : i32, i32
  }
  func.func @transform_19(%arg0: i32) -> (i32, i32) {
    %c0_i32 = arith.constant 0 : i32
    %c0_i32_0 = arith.constant 0 : i32
    %c0_i32_1 = arith.constant 0 : i32
    return %c0_i32, %c0_i32_0 : i32, i32
  }
  func.func @transform_20(%arg0: i32) -> (i32, i32, i32) {
    %c0_i32 = arith.constant 0 : i32
    %c0_i32_0 = arith.constant 0 : i32
    %c0_i32_1 = arith.constant 0 : i32
    %c0_i32_2 = arith.constant 0 : i32
    return %c0_i32, %c0_i32_0, %c0_i32_1 : i32, i32, i32
  }
  func.func @transform_21(%arg0: i32) -> (i32, i32, i32) {
    %c0_i32 = arith.constant 0 : i32
    %c0_i32_0 = arith.constant 0 : i32
    %c0_i32_1 = arith.constant 0 : i32
    %c0_i32_2 = arith.constant 0 : i32
    return %c0_i32, %c0_i32_0, %c0_i32_1 : i32, i32, i32
  }
  func.func @transform_22(%arg0: i32) -> (i32, i32, i32) {
    %c0_i32 = arith.constant 0 : i32
    %c0_i32_0 = arith.constant 0 : i32
    %c0_i32_1 = arith.constant 0 : i32
    %c0_i32_2 = arith.constant 0 : i32
    return %c0_i32, %c0_i32_0, %c0_i32_1 : i32, i32, i32
  }
  func.func @transform_23(%arg0: i32) -> (i32, i32) {
    %c0_i32 = arith.constant 0 : i32
    %c0_i32_0 = arith.constant 0 : i32
    %c0_i32_1 = arith.constant 0 : i32
    return %c0_i32, %c0_i32_0 : i32, i32
  }
  func.func @transform_24(%arg0: i32) -> (i32, i32) {
    %c0_i32 = arith.constant 0 : i32
    %c0_i32_0 = arith.constant 0 : i32
    %c0_i32_1 = arith.constant 0 : i32
    return %c0_i32, %c0_i32_0 : i32, i32
  }
  func.func @transform_25(%arg0: i32) -> (i32, i32) {
    %c0_i32 = arith.constant 0 : i32
    %c0_i32_0 = arith.constant 0 : i32
    %c0_i32_1 = arith.constant 0 : i32
    return %c0_i32, %c0_i32_0 : i32, i32
  }
  func.func @transform_26(%arg0: i32) -> (i32, i32, i32) {
    %c0_i32 = arith.constant 0 : i32
    %c0_i32_0 = arith.constant 0 : i32
    %c0_i32_1 = arith.constant 0 : i32
    return %arg0, %c0_i32, %c0_i32_0 : i32, i32, i32
  }
  func.func @transform_27(%arg0: i32) -> (i32, i32, i32, i32) {
    %c0_i32 = arith.constant 0 : i32
    %c0_i32_0 = arith.constant 0 : i32
    %c0_i32_1 = arith.constant 0 : i32
    %c0_i32_2 = arith.constant 0 : i32
    return %arg0, %c0_i32, %c0_i32_0, %c0_i32_1 : i32, i32, i32, i32
  }
  func.func @transform_28(%arg0: i32) -> (i32, i32, i32, i32) {
    %c0_i32 = arith.constant 0 : i32
    %c0_i32_0 = arith.constant 0 : i32
    %c0_i32_1 = arith.constant 0 : i32
    %c0_i32_2 = arith.constant 0 : i32
    return %arg0, %c0_i32, %c0_i32_0, %c0_i32_1 : i32, i32, i32, i32
  }
  func.func @transform_29(%arg0: i32) -> (i32, i32, i32, i32) {
    %c0_i32 = arith.constant 0 : i32
    %c0_i32_0 = arith.constant 0 : i32
    %c0_i32_1 = arith.constant 0 : i32
    %c0_i32_2 = arith.constant 0 : i32
    return %arg0, %c0_i32, %c0_i32_0, %c0_i32_1 : i32, i32, i32, i32
  }
  func.func @transform_30(%arg0: i32) -> (i32, i32, i32, i32) {
    %c0_i32 = arith.constant 0 : i32
    %c0_i32_0 = arith.constant 0 : i32
    %c0_i32_1 = arith.constant 0 : i32
    %c0_i32_2 = arith.constant 0 : i32
    return %arg0, %c0_i32, %c0_i32_0, %c0_i32_1 : i32, i32, i32, i32
  }
}

</mosaic_0001>

<bundles_post_ra>
// kernel: tpu_custom_call.1
= control target key start
LH: loop header
LB: loop body
LE: loop exit
PB: predicated region body
PF: predicated region fallthrough
CT: control target
= control target key end

     0   :  { %s4653_s6 = smov 1   ;;  %s4654_s10 = smov 2   ;;  %s5807_s0 = inlined_call_operand.smem [shape: u32[31], index: -1, kind: input, shape index: {}] }
   0x1   :  { %s4736_s5 = sld [smem:[%s5807_s0]]   ;;  %s4655_s14 = smov 3  }
   0x2   :  { %s4741_s9 = sld [smem:[%s5807_s0 + %s4653_s6]]   ;;  %s4656_s18 = smov 4  }
   0x3   :  { %s4746_s13 = sld [smem:[%s5807_s0 + %s4654_s10]]   ;;  %s4657_s22 = smov 5  }
   0x4   :  { %s4751_s17 = sld [smem:[%s5807_s0 + %s4655_s14]]   ;;  %s4658_s26 = smov 6  }
   0x5   :  { %s4756_s21 = sld [smem:[%s5807_s0 + %s4656_s18]]   ;;  %s4659_s30 = smov 7  }
   0x6   :  { %s4761_s25 = sld [smem:[%s5807_s0 + %s4657_s22]]   ;;  %s4660_s4 = smov 8  }
   0x7   :  { %5874 = sst [smem:[#allocation68_spill]] %s4736_s5  ;;  %s4661_s10 = smov 9  }
   0x8   :  { %5875 = sst [smem:[#allocation69_spill]] %s4741_s9  ;;  %s4662_s15 = smov 10  }
   0x9   :  { %5876 = sst [smem:[#allocation70_spill]] %s4746_s13  ;;  %s4663_s20 = smov 11  }
   0xa   :  { %5877 = sst [smem:[#allocation71_spill]] %s4751_s17  ;;  %s4665_s1 = smov 13  }
   0xb   :  { %5878 = sst [smem:[#allocation72_spill]] %s4756_s21  ;;  %s4666_s7 = smov 14  }
   0xc   :  { %5879 = sst [smem:[#allocation73_spill]] %s4761_s25  ;;  %s4668_s22 = smov 16  }
   0xd   :  { %s4766_s29 = sld [smem:[%s5807_s0 + %s4658_s26]]   ;;  %s4664_s26 = smov 12  }
   0xe   :  { %s4771_s3 = sld [smem:[%s5807_s0 + %s4659_s30]]   ;;  %s4669_s28 = smov 17  }
   0xf   :  { %s4776_s8 = sld [smem:[%s5807_s0 + %s4660_s4]]  }
  0x10   :  { %s4781_s14 = sld [smem:[%s5807_s0 + %s4661_s10]]  }
  0x11   :  { %s4786_s19 = sld [smem:[%s5807_s0 + %s4662_s15]]   ;;  %s4667_s15 = smov 15  }
  0x12   :  { %s4791_s24 = sld [smem:[%s5807_s0 + %s4663_s20]]  }
  0x13   :  { %5880 = sst [smem:[#allocation74_spill]] %s4766_s29 }
  0x14   :  { %5881 = sst [smem:[#allocation75_spill]] %s4771_s3 }
  0x15   :  { %5882 = sst [smem:[#allocation76_spill]] %s4776_s8 }
  0x16   :  { %5883 = sst [smem:[#allocation77_spill]] %s4781_s14 }
  0x17   :  { %5884 = sst [smem:[#allocation78_spill]] %s4786_s19 }
  0x18   :  { %5885 = sst [smem:[#allocation79_spill]] %s4791_s24 }
  0x19   :  { %s4796_s30 = sld [smem:[%s5807_s0 + %s4664_s26]]  }
  0x1a   :  { %s4801_s6 = sld [smem:[%s5807_s0 + %s4665_s1]]  }
  0x1b   :  { %s4806_s12 = sld [smem:[%s5807_s0 + %s4666_s7]]   ;;  %s4670_s7 = smov 18  }
  0x1c   :  { %s4811_s20 = sld [smem:[%s5807_s0 + %s4667_s15]]   ;;  %s4671_s15 = smov 19  }
  0x1d   :  { %s4816_s27 = sld [smem:[%s5807_s0 + %s4668_s22]]   ;;  %s4672_s22 = smov 20  }
  0x1e   :  { %s4821_s4 = sld [smem:[%s5807_s0 + %s4669_s28]]   ;;  %s4673_s28 = smov 21  }
  0x1f   :  { %5886 = sst [smem:[#allocation80_spill]] %s4796_s30 }
  0x20   :  { %5887 = sst [smem:[#allocation81_spill]] %s4801_s6 }
  0x21   :  { %5888 = sst [smem:[#allocation82_spill]] %s4806_s12 }
  0x22   :  { %5889 = sst [smem:[#allocation83_spill]] %s4811_s20 }
  0x23   :  { %5890 = sst [smem:[#allocation84_spill]] %s4816_s27 }
  0x24   :  { %5891 = sst [smem:[#allocation85_spill]] %s4821_s4 }
  0x25   :  { %s4826_s17 = sld [smem:[%s5807_s0 + %s4670_s7]]   ;;  %s4674_s7 = smov 22  }
  0x26   :  { %s4831_s13 = sld [smem:[%s5807_s0 + %s4671_s15]]   ;;  %s4675_s15 = smov 23  }
  0x27   :  { %s4836_s5 = sld [smem:[%s5807_s0 + %s4672_s22]]   ;;  %s4676_s22 = smov 24  }
  0x28   :  { %s4841_s27 = sld [smem:[%s5807_s0 + %s4673_s28]]   ;;  %s4677_s28 = smov 25  }
  0x29   :  { %s4851_s12 = sld [smem:[%s5807_s0 + %s4675_s15]]   ;;  %s4679_s15 = smov 27  }
  0x2a   :  { %s4861_s30 = sld [smem:[%s5807_s0 + %s4677_s28]]   ;;  %s4681_s28 = smov 29  }
  0x2b   :  { %5892 = sst [smem:[#allocation86_spill]] %s4826_s17 }
  0x2c   :  { %5893 = sst [smem:[#allocation87_spill]] %s4831_s13 }
  0x2d   :  { %5894 = sst [smem:[#allocation88_spill]] %s4836_s5 }
  0x2e   :  { %5895 = sst [smem:[#allocation89_spill]] %s4841_s27 }
  0x2f   :  { %s4846_s17 = sld [smem:[%s5807_s0 + %s4674_s7]]   ;;  %s4678_s7 = smov 26  }
  0x30   :  { %5897 = sst [smem:[#allocation91_spill]] %s4851_s12 }
  0x31   :  { %s4856_s5 = sld [smem:[%s5807_s0 + %s4676_s22]]   ;;  %s4680_s22 = smov 28  }
  0x32   :  { %5899 = sst [smem:[#allocation93_spill]] %s4861_s30 }
  0x33   :  { %s4871_s19 = sld [smem:[%s5807_s0 + %s4679_s15]]  }
  0x34   :  { %s4881_s30 = sld [smem:[%s5807_s0 + %s4681_s28]]  }
  0x35   :  { %5896 = sst [smem:[#allocation90_spill]] %s4846_s17 }
  0x36   :  { %s4866_s17 = sld [smem:[%s5807_s0 + %s4678_s7]]   ;;  %s4682_s7 = smov 30  }
  0x37   :  { %5898 = sst [smem:[#allocation92_spill]] %s4856_s5 }
  0x38   :  { %s4876_s5 = sld [smem:[%s5807_s0 + %s4680_s22]]  }
  0x39   :  { %5901 = sst [smem:[#allocation95_spill]] %s4871_s19 }
  0x3c   :  { %5900 = sst [smem:[#allocation94_spill]] %s4866_s17 }
  0x3d   :  { %s4886_s17 = sld [smem:[%s5807_s0 + %s4682_s7]]  }
  0x3e   :  { %5902 = sst [smem:[#allocation96_spill]] %s4876_s5 }
  0x43   :  { %5903 = sst [smem:[#allocation97_spill]] %s4886_s17 }
  0x44   :  { %67 = vsyncpa [#allocation3], 0 }
  0x45   :  { %69 = vsyncpa [#allocation3 + $0x1], 0 }
  0x46   :  { %70 = vsyncpa [#allocation6], 0 }
  0x47   :  { %72 = vsyncpa [#allocation6 + $0x1], 0 }
  0x48   :  { %73 = vsyncpa [#allocation9], 0 }
  0x49   :  { %75 = vsyncpa [#allocation9 + $0x1], 0 }
  0x4a   :  { %76 = vsyncpa [#allocation12], 0 }
  0x4b   :  { %77 = vsyncpa [#allocation15], 0 }
  0x4c   :  { %78 = vsyncpa [#allocation18], 0 }
  0x4d   :  { %79 = vsyncpa [#allocation21], 0 }
  0x4e   :  { %80 = vsyncpa [#allocation24], 0 }
  0x4f   :  { %81 = vsyncpa [#allocation27], 0 }
  0x50   :  { %82 = vsyncpa [#allocation30], 0 }
  0x51   :  { %83 = vsyncpa [#allocation33], 0 }
  0x52   :  { %84 = vsyncpa [#allocation36], 0 }
  0x53   :  { %85 = vsyncpa [#allocation39], 0 }
  0x54   :  { %86 = vsyncpa [#allocation42], 0 }
  0x55   :  { %87 = vsyncpa [#allocation4], 0 }
  0x56   :  { %89 = vsyncpa [#allocation4 + $0x1], 0 }
  0x57   :  { %90 = vsyncpa [#allocation45], 0 }
  0x58   :  { %92 = vsyncpa [#allocation45 + $0x1], 0 }
  0x59   :  { %93 = vsyncpa [#allocation48], 0 }
  0x5a   :  { %95 = vsyncpa [#allocation48 + $0x1], 0  ;;  %s4888_s0 = smov 0   ;;  %s4890_s15 = smov 0  }
  0x5b   :  { %s4892_s16 = smov 0   ;;  %s4894_s18 = smov 0  }
  0x5c LB: > { %s5904_s19 = sld [smem:[#allocation95_spill]]  ;;  %s5905_s8 = sld [smem:[#allocation76_spill]]  ;;  %s4623_s16 = sphi %s4892_s16, %s5994_s16   ;;  %s4619_s15 = sphi %s4890_s15, %s5993_s15   ;;  %s4615_s0 = sphi %s4888_s0, %s5992_s0   ;;  %s4627_s18 = sphi %s4894_s18, %s5995_s18  }
  0x5d   : > { %s5906_s29 = sld [smem:[#allocation74_spill]]  ;;  %s5907_s9 = sld [smem:[#allocation69_spill]] }
  0x5e   : > { %s5908_s27 = sld [smem:[#allocation89_spill]]  ;;  %s5909_s24 = sld [smem:[#allocation79_spill]] }
  0x5f   : > { %s5910_s20 = sld [smem:[#allocation83_spill]]  ;;  %s5911_s14 = sld [smem:[#allocation77_spill]] }
  0x60   : > { %s5912_s13 = sld [smem:[#allocation87_spill]]  ;;  %s5913_s12 = sld [smem:[#allocation91_spill]] }
  0x61   : > { %s5914_s6 = sld [smem:[#allocation81_spill]]  ;;  %s5915_s4 = sld [smem:[#allocation85_spill]] }
  0x62   : > { %s5916_s3 = sld [smem:[#allocation75_spill]]  ;;  %s5917_s25 = sld [smem:[#allocation73_spill]] }
  0x63   : > { %s5918_s21 = sld [smem:[#allocation72_spill]]  ;;  %s4683_s22 = smov [#allocation10]  }
  0x64   : > { %s814_s23 = sshll.u32 %s4683_s22, 4  ;;  %s4909_s26 = sadd.s32 4294967295, %s4627_s18   ;;  %s4914_s23 = int_to_ptr.vmem [resolvable:$true] %s814_s23 }
  0x65   : > { %p2948_p0 = scmp.ge.s32.totalorder %s4627_s18, 1  ;;  %p5822_p1 = scmp.eq.s32.totalorder %s4909_s26, 0 }
  0x66   : > { %p802_p2 = scmp.lt.s32.totalorder %s4627_s18, 3  ;;  %s4684_s1 = smov [#allocation11]  }
  0x67   : > { %s827_s2 = sshll.u32 %s4684_s1, 4  ;;  %s4685_s10 = smov [#allocation14]   ;;  %s4929_s2 = int_to_ptr.vmem [resolvable:$true] %s827_s2 }
  0x68   : > { %p4916_p3 = pnand %p2948_p0, %p802_p2  ;;  %s4931_s11 = sshll.u32 %s4685_s10, 4  ;;  %s854_s11 = int_to_ptr.vmem [resolvable:$true] %s4931_s11 }
  0x69   : > { %s3625_s22 = scalar_lea.hbm %s5918_s21, 1024 }
  0x6a   : > { %s5919_s28 = scalar_select %p4916_p3, 1, 0 }
  0x6b   : > { %p3309_p5 = pneg %p4916_p3  ;;  %p3626_p7 = scmp.ne.s32.totalorder %s5918_s21, %s3625_s22 }
  0x6c   : > { %p3632_p11 = scmp.lt.u32.totalorder %s3625_s22, %s5918_s21 }
  0x6d   : > { %p4925_p6 = pnand %p3309_p5, %p5822_p1 }
  0x6f   : > { %s5920_s7 = scalar_select %p4925_p6, 1, 0 }
  0x70   : > { %p4937_p8 = pneg %p4925_p6 }
  0x72   : > { %s5921_s17 = scalar_select %p4937_p8, 1, 0 }
  0x73   : > { %p3628_p9 = pnand %p4937_p8, %p3626_p7 }
  0x75   : > { %p3629_p10 = pneg %p3628_p9 }
  0x77   : > { %p3634_p12 = pnand %p3632_p11, %p3629_p10 }
  0x79   : > { %3637 = shalt.err (!%p3634_p12)
}
  0x7a   : > { %s3638_s1 = scalar_lea.vmem %s4914_s23, 1024  ;;  %p3646_p5 = scmp.lt.s32.totalorder %s4914_s23, %s4914_s23 }
  0x7b   : > { %p3639_p13 = scmp.ne.s32.totalorder %s4914_s23, %s3638_s1  ;;  %p3647_p4 = scmp.lt.s32.totalorder %s3638_s1, %s3638_s1 }
  0x7d   : > { %p3641_p0 = pnand %p3639_p13, %p4937_p8  ;;  %p3648_p1 = por %p3647_p4, %p3646_p5 }
  0x7f   : > { %p3642_p2 = pneg %p3641_p0 }
  0x81   : > { %p3649_p3 = pnand %p3648_p1, %p3642_p2 }
  0x83   : > { %3652 = shalt.err (!%p3649_p3)
}
  0x84   : > { %s5825_s10 = smov 64   ;;  %s5827_s22 = smov 4  }
  0x85   : > { %3312 = dma.hbm_to_vmem [thread:$0]  (!%p4925_p6), %s5918_s21, 1024, %s4914_s23, [#allocation9], %s5825_s10, %s5825_s10, %s5827_s22  }
  0x86   : > { %s3653_s5 = scalar_lea.hbm %s5917_s25, 64 }
  0x87   : > { %p3654_p7 = scmp.ne.s32.totalorder %s5917_s25, %s3653_s5  ;;  %p3660_p3 = scmp.lt.u32.totalorder %s3653_s5, %s5917_s25 }
  0x89   : > { %p3656_p4 = pnand %p3654_p7, %p4937_p8 }
  0x8b   : > { %p3657_p1 = pneg %p3656_p4 }
  0x8d   : > { %p3662_p9 = pnand %p3660_p3, %p3657_p1 }
  0x8f   : > { %3665 = shalt.err (!%p3662_p9)
}
  0x90   : > { %s3666_s1 = scalar_lea.vmem %s4929_s2, 64  ;;  %p3674_p13 = scmp.lt.s32.totalorder %s4929_s2, %s4929_s2 }
  0x91   : > { %p3667_p10 = scmp.ne.s32.totalorder %s4929_s2, %s3666_s1  ;;  %p3675_p0 = scmp.lt.s32.totalorder %s3666_s1, %s3666_s1 }
  0x93   : > { %p3669_p11 = pnand %p3667_p10, %p4937_p8  ;;  %p3676_p2 = por %p3675_p0, %p3674_p13 }
  0x95   : > { %p3670_p12 = pneg %p3669_p11 }
  0x97   : > { %p3677_p5 = pnand %p3676_p2, %p3670_p12 }
  0x99   : > { %3680 = shalt.err (!%p3677_p5)
}
  0x9a   : > { %s5831_s23 = smov 16   ;;  %s5833_s5 = smov 1  }
  0x9b   : > { %3315 = dma.hbm_to_vmem [thread:$0]  (!%p4925_p6), %s5917_s25, 64, %s4929_s2, [#allocation12], %s5831_s23, %s5831_s23, %s5833_s5  }
  0x9c   : > { %s3681_s1 = scalar_lea.hbm %s5916_s3, 64 }
  0x9d   : > { %p3682_p7 = scmp.ne.s32.totalorder %s5916_s3, %s3681_s1  ;;  %p3688_p3 = scmp.lt.u32.totalorder %s3681_s1, %s5916_s3 }
  0x9f   : > { %p3684_p4 = pnand %p3682_p7, %p4937_p8 }
  0xa1   : > { %p3685_p1 = pneg %p3684_p4 }
  0xa3   : > { %p3690_p9 = pnand %p3688_p3, %p3685_p1 }
  0xa5   : > { %3693 = shalt.err (!%p3690_p9)
}
  0xa6   : > { %s3694_s10 = scalar_lea.vmem %s854_s11, 64  ;;  %p3702_p13 = scmp.lt.s32.totalorder %s854_s11, %s854_s11 }
  0xa7   : > { %p3695_p10 = scmp.ne.s32.totalorder %s854_s11, %s3694_s10  ;;  %p3703_p0 = scmp.lt.s32.totalorder %s3694_s10, %s3694_s10 }
  0xa9   : > { %p3697_p11 = pnand %p3695_p10, %p4937_p8  ;;  %p3704_p2 = por %p3703_p0, %p3702_p13 }
  0xab   : > { %p3698_p12 = pneg %p3697_p11 }
  0xad   : > { %p3705_p5 = pnand %p3704_p2, %p3698_p12 }
  0xaf   : > { %3708 = shalt.err (!%p3705_p5)
}
  0xb0   : > { %3321 = dma.hbm_to_vmem [thread:$0]  (!%p4925_p6), %s5916_s3, 64, %s854_s11, [#allocation15], %s5831_s23, %s5831_s23, %s5833_s5  }
  0xb1   : > { %s4690_s2 = smov [#allocation17]   ;;  %s4691_s22 = smov [#allocation20]  }
  0xb2   : > { %s880_s1 = sshll.u32 %s4690_s2, 4  ;;  %s902_s21 = sshll.u32 %s4691_s22, 4  ;;  %s881_s1 = int_to_ptr.vmem [resolvable:$true] %s880_s1  ;;  %s903_s21 = int_to_ptr.vmem [resolvable:$true] %s902_s21 }
  0xb3   : > { %s3709_s10 = scalar_lea.hbm %s5911_s14, 16 }
  0xb4   : > { %p3710_p7 = scmp.ne.s32.totalorder %s5911_s14, %s3709_s10  ;;  %p3716_p3 = scmp.lt.u32.totalorder %s3709_s10, %s5911_s14 }
  0xb6   : > { %p3712_p4 = pnand %p3710_p7, %p4937_p8 }
  0xb8   : > { %p3713_p1 = pneg %p3712_p4 }
  0xba   : > { %p3718_p9 = pnand %p3716_p3, %p3713_p1 }
  0xbc   : > { %3721 = shalt.err (!%p3718_p9)
}
  0xbd   : > { %s3722_s25 = scalar_lea.vmem %s881_s1, 16  ;;  %s3729_s11 = scalar_lea.vmem %s881_s1, 32 }
  0xbe   : > { %p3723_p10 = scmp.ne.s32.totalorder %s881_s1, %s3722_s25  ;;  %p3730_p13 = scmp.lt.s32.totalorder %s881_s1, %s881_s1 }
  0xbf   : > { %p3731_p0 = scmp.lt.s32.totalorder %s3729_s11, %s3722_s25 }
  0xc0   : > { %p3725_p11 = pnand %p3723_p10, %p4937_p8 }
  0xc1   : > { %p3732_p2 = por %p3731_p0, %p3730_p13 }
  0xc2   : > { %p3726_p12 = pneg %p3725_p11 }
  0xc4   : > { %p3733_p5 = pnand %p3732_p2, %p3726_p12 }
  0xc6   : > { %3736 = shalt.err (!%p3733_p5)
}
  0xc7   : > { %3327 = dma.hbm_to_vmem [thread:$0]  (!%p4925_p6), %s5911_s14, 16, %s881_s1, [#allocation18]  }
  0xc8   : > { %s3737_s22 = scalar_lea.hbm %s5909_s24, 16 }
  0xc9   : > { %p3738_p7 = scmp.ne.s32.totalorder %s5909_s24, %s3737_s22  ;;  %p3744_p3 = scmp.lt.u32.totalorder %s3737_s22, %s5909_s24 }
  0xcb   : > { %p3740_p4 = pnand %p3738_p7, %p4937_p8 }
  0xcd   : > { %p3741_p1 = pneg %p3740_p4 }
  0xcf   : > { %p3746_p9 = pnand %p3744_p3, %p3741_p1 }
  0xd1   : > { %3749 = shalt.err (!%p3746_p9)
}
  0xd2   : > { %s3750_s25 = scalar_lea.vmem %s903_s21, 16  ;;  %s3757_s2 = scalar_lea.vmem %s903_s21, 32 }
  0xd3   : > { %p3751_p10 = scmp.ne.s32.totalorder %s903_s21, %s3750_s25  ;;  %p3758_p13 = scmp.lt.s32.totalorder %s903_s21, %s903_s21 }
  0xd4   : > { %p3759_p0 = scmp.lt.s32.totalorder %s3757_s2, %s3750_s25 }
  0xd5   : > { %p3753_p11 = pnand %p3751_p10, %p4937_p8 }
  0xd6   : > { %p3760_p2 = por %p3759_p0, %p3758_p13 }
  0xd7   : > { %p3754_p12 = pneg %p3753_p11 }
  0xd9   : > { %p3761_p5 = pnand %p3760_p2, %p3754_p12 }
  0xdb   : > { %3764 = shalt.err (!%p3761_p5)
}
  0xdc   : > { %3333 = dma.hbm_to_vmem [thread:$0]  (!%p4925_p6), %s5909_s24, 16, %s903_s21, [#allocation21]  }
  0xdd   : > { %s4692_s1 = smov [#allocation23]   ;;  %s4693_s11 = smov [#allocation26]  }
  0xde   : > { %s925_s10 = sshll.u32 %s4692_s1, 4  ;;  %s951_s22 = sshll.u32 %s4693_s11, 4  ;;  %s926_s10 = int_to_ptr.vmem [resolvable:$true] %s925_s10  ;;  %s952_s22 = int_to_ptr.vmem [resolvable:$true] %s951_s22 }
  0xdf   : > { %s3765_s23 = scalar_lea.hbm %s5914_s6, 64 }
  0xe0   : > { %p3766_p7 = scmp.ne.s32.totalorder %s5914_s6, %s3765_s23  ;;  %p3772_p3 = scmp.lt.u32.totalorder %s3765_s23, %s5914_s6 }
  0xe2   : > { %p3768_p4 = pnand %p3766_p7, %p4937_p8 }
  0xe4   : > { %p3769_p1 = pneg %p3768_p4 }
  0xe6   : > { %p3774_p9 = pnand %p3772_p3, %p3769_p1 }
  0xe8   : > { %3777 = shalt.err (!%p3774_p9)
}
  0xe9   : > { %s3778_s25 = scalar_lea.vmem %s926_s10, 64  ;;  %p3786_p13 = scmp.lt.s32.totalorder %s926_s10, %s926_s10 }
  0xea   : > { %p3779_p10 = scmp.ne.s32.totalorder %s926_s10, %s3778_s25  ;;  %p3787_p0 = scmp.lt.s32.totalorder %s3778_s25, %s3778_s25 }
  0xec   : > { %p3781_p11 = pnand %p3779_p10, %p4937_p8  ;;  %p3788_p2 = por %p3787_p0, %p3786_p13 }
  0xee   : > { %p3782_p12 = pneg %p3781_p11 }
  0xf0   : > { %p3789_p5 = pnand %p3788_p2, %p3782_p12 }
  0xf2   : > { %3792 = shalt.err (!%p3789_p5)
}
  0xf3   : > { %s5922_s21 = smov 16   ;;  %s3793_s23 = scalar_lea.hbm %s5910_s20, 64 }
  0xf4   : > { %3339 = dma.hbm_to_vmem [thread:$0]  (!%p4925_p6), %s5914_s6, 64, %s926_s10, [#allocation24], %s5922_s21, %s5922_s21, %s5833_s5  }
  0xf5   : > { %p3794_p7 = scmp.ne.s32.totalorder %s5910_s20, %s3793_s23  ;;  %p3800_p3 = scmp.lt.u32.totalorder %s3793_s23, %s5910_s20 }
  0xf7   : > { %p3796_p4 = pnand %p3794_p7, %p4937_p8 }
  0xf9   : > { %p3797_p1 = pneg %p3796_p4 }
  0xfb   : > { %p3802_p9 = pnand %p3800_p3, %p3797_p1 }
  0xfd   : > { %3805 = shalt.err (!%p3802_p9)
}
  0xfe   : > { %s3806_s2 = scalar_lea.vmem %s952_s22, 64  ;;  %p3814_p13 = scmp.lt.s32.totalorder %s952_s22, %s952_s22 }
  0xff   : > { %p3807_p10 = scmp.ne.s32.totalorder %s952_s22, %s3806_s2  ;;  %p3815_p0 = scmp.lt.s32.totalorder %s3806_s2, %s3806_s2 }
 0x101   : > { %p3809_p11 = pnand %p3807_p10, %p4937_p8  ;;  %p3816_p2 = por %p3815_p0, %p3814_p13 }
 0x103   : > { %p3810_p12 = pneg %p3809_p11 }
 0x105   : > { %p3817_p5 = pnand %p3816_p2, %p3810_p12 }
 0x107   : > { %3820 = shalt.err (!%p3817_p5)
}
 0x108   : > { %3345 = dma.hbm_to_vmem [thread:$0]  (!%p4925_p6), %s5910_s20, 64, %s952_s22, [#allocation27], %s5922_s21, %s5922_s21, %s5833_s5  }
 0x109   : > { %s4694_s1 = smov [#allocation29]   ;;  %s4695_s11 = smov [#allocation32]  }
 0x10a   : > { %s978_s10 = sshll.u32 %s4694_s1, 4  ;;  %s1000_s25 = sshll.u32 %s4695_s11, 4  ;;  %s979_s10 = int_to_ptr.vmem [resolvable:$true] %s978_s10  ;;  %s1001_s25 = int_to_ptr.vmem [resolvable:$true] %s1000_s25 }
 0x10b   : > { %s3821_s23 = scalar_lea.hbm %s5915_s4, 16 }
 0x10c   : > { %p3822_p7 = scmp.ne.s32.totalorder %s5915_s4, %s3821_s23  ;;  %p3828_p3 = scmp.lt.u32.totalorder %s3821_s23, %s5915_s4 }
 0x10e   : > { %p3824_p4 = pnand %p3822_p7, %p4937_p8 }
 0x110   : > { %p3825_p1 = pneg %p3824_p4 }
 0x112   : > { %p3830_p9 = pnand %p3828_p3, %p3825_p1 }
 0x114   : > { %3833 = shalt.err (!%p3830_p9)
}
 0x115   : > { %s3834_s2 = scalar_lea.vmem %s979_s10, 16  ;;  %s3841_s22 = scalar_lea.vmem %s979_s10, 32 }
 0x116   : > { %p3835_p10 = scmp.ne.s32.totalorder %s979_s10, %s3834_s2  ;;  %p3842_p13 = scmp.lt.s32.totalorder %s979_s10, %s979_s10 }
 0x117   : > { %p3843_p0 = scmp.lt.s32.totalorder %s3841_s22, %s3834_s2 }
 0x118   : > { %p3837_p11 = pnand %p3835_p10, %p4937_p8 }
 0x119   : > { %p3844_p2 = por %p3843_p0, %p3842_p13 }
 0x11a   : > { %p3838_p12 = pneg %p3837_p11 }
 0x11c   : > { %p3845_p5 = pnand %p3844_p2, %p3838_p12 }
 0x11e   : > { %3848 = shalt.err (!%p3845_p5)
}
 0x11f   : > { %3351 = dma.hbm_to_vmem [thread:$0]  (!%p4925_p6), %s5915_s4, 16, %s979_s10, [#allocation30]  }
 0x120   : > { %s3849_s1 = scalar_lea.hbm %s5912_s13, 16 }
 0x121   : > { %p3850_p7 = scmp.ne.s32.totalorder %s5912_s13, %s3849_s1  ;;  %p3856_p3 = scmp.lt.u32.totalorder %s3849_s1, %s5912_s13 }
 0x123   : > { %p3852_p4 = pnand %p3850_p7, %p4937_p8 }
 0x125   : > { %p3853_p1 = pneg %p3852_p4 }
 0x127   : > { %p3858_p9 = pnand %p3856_p3, %p3853_p1 }
 0x129   : > { %3861 = shalt.err (!%p3858_p9)
}
 0x12a   : > { %s3862_s11 = scalar_lea.vmem %s1001_s25, 16  ;;  %s3869_s23 = scalar_lea.vmem %s1001_s25, 32 }
 0x12b   : > { %p3863_p10 = scmp.ne.s32.totalorder %s1001_s25, %s3862_s11  ;;  %p3870_p13 = scmp.lt.s32.totalorder %s1001_s25, %s1001_s25 }
 0x12c   : > { %p3871_p0 = scmp.lt.s32.totalorder %s3869_s23, %s3862_s11 }
 0x12d   : > { %p3865_p11 = pnand %p3863_p10, %p4937_p8 }
 0x12e   : > { %p3872_p2 = por %p3871_p0, %p3870_p13 }
 0x12f   : > { %p3866_p12 = pneg %p3865_p11 }
 0x131   : > { %p3873_p5 = pnand %p3872_p2, %p3866_p12 }
 0x133   : > { %3876 = shalt.err (!%p3873_p5)
}
 0x134   : > { %3357 = dma.hbm_to_vmem [thread:$0]  (!%p4925_p6), %s5912_s13, 16, %s1001_s25, [#allocation33]  }
 0x135   : > { %s4696_s10 = smov [#allocation35]   ;;  %s4697_s22 = smov [#allocation38]  }
 0x136   : > { %s1023_s2 = sshll.u32 %s4696_s10, 4  ;;  %s1050_s1 = sshll.u32 %s4697_s22, 4  ;;  %s1024_s2 = int_to_ptr.vmem [resolvable:$true] %s1023_s2  ;;  %s1051_s1 = int_to_ptr.vmem [resolvable:$true] %s1050_s1 }
 0x137   : > { %s3877_s5 = scalar_lea.hbm %s5908_s27, 32 }
 0x138   : > { %p3878_p7 = scmp.ne.s32.totalorder %s5908_s27, %s3877_s5  ;;  %p3884_p3 = scmp.lt.u32.totalorder %s3877_s5, %s5908_s27 }
 0x13a   : > { %p3880_p4 = pnand %p3878_p7, %p4937_p8 }
 0x13c   : > { %p3881_p1 = pneg %p3880_p4 }
 0x13e   : > { %p3886_p9 = pnand %p3884_p3, %p3881_p1 }
 0x140   : > { %3889 = shalt.err (!%p3886_p9)
}
 0x141   : > { %s3890_s11 = scalar_lea.vmem %s1024_s2, 32  ;;  %p3898_p13 = scmp.lt.s32.totalorder %s1024_s2, %s1024_s2 }
 0x142   : > { %p3891_p10 = scmp.ne.s32.totalorder %s1024_s2, %s3890_s11  ;;  %p3899_p0 = scmp.lt.s32.totalorder %s3890_s11, %s3890_s11 }
 0x144   : > { %p3893_p11 = pnand %p3891_p10, %p4937_p8  ;;  %p3900_p2 = por %p3899_p0, %p3898_p13 }
 0x146   : > { %p3894_p12 = pneg %p3893_p11 }
 0x148   : > { %p3901_p5 = pnand %p3900_p2, %p3894_p12 }
 0x14a   : > { %3904 = shalt.err (!%p3901_p5)
}
 0x14b   : > { %s5923_s25 = smov 1   ;;  %s3905_s5 = scalar_lea.hbm %s5913_s12, 16 }
 0x14c   : > { %3363 = dma.hbm_to_vmem [thread:$0]  (!%p4925_p6), %s5908_s27, 32, %s1024_s2, [#allocation36], %s5922_s21, %s5922_s21, %s5923_s25  }
 0x14d   : > { %p3906_p7 = scmp.ne.s32.totalorder %s5913_s12, %s3905_s5  ;;  %p3912_p3 = scmp.lt.u32.totalorder %s3905_s5, %s5913_s12 }
 0x14f   : > { %p3908_p4 = pnand %p3906_p7, %p4937_p8 }
 0x151   : > { %p3909_p1 = pneg %p3908_p4 }
 0x153   : > { %p3914_p9 = pnand %p3912_p3, %p3909_p1 }
 0x155   : > { %3917 = shalt.err (!%p3914_p9)
}
 0x156   : > { %s3918_s23 = scalar_lea.vmem %s1051_s1, 16  ;;  %s3925_s10 = scalar_lea.vmem %s1051_s1, 32 }
 0x157   : > { %p3919_p10 = scmp.ne.s32.totalorder %s1051_s1, %s3918_s23  ;;  %p3926_p13 = scmp.lt.s32.totalorder %s1051_s1, %s1051_s1 }
 0x158   : > { %p3927_p0 = scmp.lt.s32.totalorder %s3925_s10, %s3918_s23 }
 0x159   : > { %p3921_p11 = pnand %p3919_p10, %p4937_p8 }
 0x15a   : > { %p3928_p2 = por %p3927_p0, %p3926_p13 }
 0x15b   : > { %p3922_p12 = pneg %p3921_p11 }
 0x15d   : > { %p3929_p5 = pnand %p3928_p2, %p3922_p12 }
 0x15f   : > { %3932 = shalt.err (!%p3929_p5)
}
 0x160   : > { %3369 = dma.hbm_to_vmem [thread:$0]  (!%p4925_p6), %s5913_s12, 16, %s1051_s1, [#allocation39]  }
 0x161   : > { %s5835_s21 = sadd.s32 4294967294, %s4627_s18   ;;  %s5080_s2 = sadd.s32 1, %s4627_s18  }
 0x162   : > { %s108_s22 = sadd.s32 1, %s4623_s16  ;;  %s105_s11 = ssub.s32 %s4627_s18, %s5080_s2 }
 0x163   : > { %p115_p7 = scmp.ne.s32.totalorder %s4623_s16, %s4619_s15  ;;  %p106_p4 = scmp.eq.s32.totalorder %s105_s11, 0 }
 0x164   : > { %p116_p1 = scmp.eq.s32.totalorder %s4627_s18, 0  ;;  %p121_p3 = scmp.ne.s32.totalorder %s4619_s15, %s4615_s0 }
 0x165   : > { %p685_p9 = scmp.eq.s32.totalorder %s4909_s26, 1  ;;  %p5924_p11 = scmp.eq.s32.totalorder %s4909_s26, 0 }
 0x166   : > { %s5092_s25 = scalar_select %p106_p4, %s4623_s16, %s108_s22  }
 0x167   : > { %p117_p10 = por %p116_p1, %p115_p7  ;;  %p5096_p12 = por %p5924_p11, %p121_p3 }
 0x168   : > { %p5100_p13 = por %p685_p9, %p115_p7  ;;  %p691_p0 = scmp.eq.s32.totalorder %s5835_s21, 1 }
 0x169   : > { %s5925_s1 = scalar_select %p5096_p12, 1, 0 }
 0x16a   : > { %s5926_s5 = scalar_select %p5100_p13, 1, 0 }
 0x16b   : > { %p3427_p2 = scmp.lt.s32.totalorder %s4627_s18, 2  ;;  %s5839_s23 = sand.u32 1, %s4623_s16  }
 0x16c   : > { %p5108_p5 = por %p691_p0, %p121_p3  ;;  %s5114_s22 = sshll.u32 %s5839_s23, 3 }
 0x16d   : > { %s5117_s11 = sshll.u32 %s4627_s18, 7  ;;  %p5119_p7 = pnand %p3427_p2, %p117_p10 }
 0x16e   : > { %s5927_s10 = scalar_select %p5108_p5, 1, 0 }
 0x16f   : > { %s5928_s3 = scalar_select %p5119_p7, 1, 0 }
 0x170   : > { %s5849_s21 = sand.u32 1, %s4627_s18   ;;  %s5126_s4 = scalar_lea.hbm %s5907_s9, %s5117_s11 }
 0x171   : > { %s1105_s6 = scalar_lea.vmem [#allocation5], %s5114_s22  ;;  %s5133_s23 = scalar_lea.sflag [#allocation6], %s5849_s21 }
 0x172   : > { %s1112_s12 = sshll.u32 %s1105_s6, 4  ;;  %s3933_s13 = scalar_lea.hbm %s5126_s4, 128  ;;  %s5129_s12 = int_to_ptr.vmem [resolvable:$true] %s1112_s12 }
 0x173   : > { %p3934_p4 = scmp.ne.s32.totalorder %s5126_s4, %s3933_s13  ;;  %p5139_p1 = pneg %p5119_p7 }
 0x174   : > { %s3938_s20 = scalar_lea.hbm %s5907_s9, 256  ;;  %p3939_p10 = scmp.lt.u32.totalorder %s5126_s4, %s5907_s9 }
 0x175   : > { %s5929_s14 = scalar_select %p5139_p1, 1, 0 }
 0x176   : > { %p3936_p3 = pnand %p5139_p1, %p3934_p4  ;;  %p3940_p11 = scmp.lt.u32.totalorder %s3938_s20, %s3933_s13 }
 0x177   : > { %p3942_p2 = scmp.lt.u32.totalorder %s3933_s13, %s5126_s4 }
 0x178   : > { %p3937_p9 = pneg %p3936_p3  ;;  %p3941_p0 = por %p3940_p11, %p3939_p10 }
 0x17a   : > { %p3943_p5 = por %p3942_p2, %p3941_p0 }
 0x17c   : > { %p3944_p13 = pnand %p3943_p5, %p3937_p9 }
 0x17e   : > { %3947 = shalt.err (!%p3944_p13)
}
 0x17f   : > { %s3948_s6 = scalar_lea.vmem %s5129_s12, 128  ;;  %s4698_s21 = smov [#allocation5]  }
 0x180   : > { %p3949_p12 = scmp.ne.s32.totalorder %s5129_s12, %s3948_s6  ;;  %s3953_s24 = sshll.u32 %s4698_s21, 4  ;;  %s3954_s24 = int_to_ptr.vmem [resolvable:$false] %s3953_s24 }
 0x181   : > { %s3955_s27 = scalar_lea.vmem %s3954_s24, 256  ;;  %p3956_p4 = scmp.lt.s32.totalorder %s5129_s12, %s3954_s24 }
 0x182   : > { %p3951_p6 = pnand %p3949_p12, %p5139_p1  ;;  %p3957_p3 = scmp.lt.s32.totalorder %s3955_s27, %s3948_s6 }
 0x184   : > { %p3952_p8 = pneg %p3951_p6  ;;  %p3958_p10 = por %p3957_p3, %p3956_p4 }
 0x186   : > { %p3959_p11 = pnand %p3958_p10, %p3952_p8 }
 0x188   : > { %3962 = shalt.err (!%p3959_p11)
}
 0x189   : > { %3382 = dma.hbm_to_vmem [thread:$0]  (!%p5119_p7), %s5126_s4, 128, %s5129_s12, %s5133_s23  }
 0x18a   : > { %s4699_s13 = smov [#allocation13]   ;;  %s4700_s21 = smov [#allocation16]  }
 0x18b   : > { %s840_s20 = sshll.u32 %s4699_s13, 4  ;;  %s866_s9 = sshll.u32 %s4700_s21, 4  ;;  %s841_s20 = int_to_ptr.vmem [resolvable:$true] %s840_s20  ;;  %s5159_s9 = int_to_ptr.vmem [resolvable:$true] %s866_s9 }
 0x18c   : > { %s3963_s24 = scalar_lea.hbm %s5906_s29, 1024  ;;  %p5930_p8 = scmp.ne.s32.totalorder %s5921_s17, 0 }
 0x18d   : > { %p3964_p6 = scmp.ne.s32.totalorder %s5906_s29, %s3963_s24  ;;  %p3970_p5 = scmp.lt.u32.totalorder %s3963_s24, %s5906_s29 }
 0x18f   : > { %p3966_p12 = pnand %p3964_p6, %p5930_p8 }
 0x191   : > { %p3967_p13 = pneg %p3966_p12 }
 0x193   : > { %p3972_p9 = pnand %p3970_p5, %p3967_p13 }
 0x195   : > { %3975 = shalt.err (!%p3972_p9)
}
 0x196   : > { %s3976_s27 = scalar_lea.vmem %s841_s20, 1024  ;;  %p3984_p3 = scmp.lt.s32.totalorder %s841_s20, %s841_s20 }
 0x197   : > { %p3977_p0 = scmp.ne.s32.totalorder %s841_s20, %s3976_s27  ;;  %p3985_p10 = scmp.lt.s32.totalorder %s3976_s27, %s3976_s27 }
 0x199   : > { %p3979_p2 = pnand %p3977_p0, %p5930_p8  ;;  %p3986_p11 = por %p3985_p10, %p3984_p3 }
 0x19b   : > { %p3980_p4 = pneg %p3979_p2 }
 0x19d   : > { %p3987_p7 = pnand %p3986_p11, %p3980_p4 }
 0x19f   : > { %3990 = shalt.err (!%p3987_p7)
}
 0x1a0   : > { %p5931_p1 = scmp.ne.s32.totalorder %s5920_s7, 0  ;;  %s5932_s12 = smov 4  }
 0x1a1   : > { %s5933_s4 = smov 64   ;;  %s3991_s6 = scalar_lea.hbm %s5905_s8, 256 }
 0x1a2   : > { %3318 = dma.hbm_to_vmem [thread:$0]  (!%p5931_p1), %s5906_s29, 1024, %s841_s20, [#allocation12], %s5933_s4, %s5933_s4, %s5932_s12  }
 0x1a3   : > { %p3992_p6 = scmp.ne.s32.totalorder %s5905_s8, %s3991_s6  ;;  %p3998_p5 = scmp.lt.u32.totalorder %s3991_s6, %s5905_s8 }
 0x1a5   : > { %p3994_p12 = pnand %p3992_p6, %p5930_p8 }
 0x1a7   : > { %p3995_p13 = pneg %p3994_p12 }
 0x1a9   : > { %p4000_p9 = pnand %p3998_p5, %p3995_p13 }
 0x1ab   : > { %4003 = shalt.err (!%p4000_p9)
}
 0x1ac   : > { %s4004_s13 = scalar_lea.vmem %s5159_s9, 256  ;;  %p4012_p4 = scmp.lt.s32.totalorder %s5159_s9, %s5159_s9 }
 0x1ad   : > { %p4005_p7 = scmp.ne.s32.totalorder %s5159_s9, %s4004_s13  ;;  %p4013_p3 = scmp.lt.s32.totalorder %s4004_s13, %s4004_s13 }
 0x1af   : > { %p4007_p0 = pnand %p4005_p7, %p5930_p8  ;;  %p4014_p10 = por %p4013_p3, %p4012_p4 }
 0x1b1   : > { %p4008_p2 = pneg %p4007_p0 }
 0x1b3   : > { %p4015_p11 = pnand %p4014_p10, %p4008_p2 }
 0x1b5   : > { %4018 = shalt.err (!%p4015_p11)
}
 0x1b6   : > { %s5934_s20 = sld [smem:[#allocation78_spill]]  ;;  %s4701_s21 = smov [#allocation19]  }
 0x1b7   : > { %3324 = dma.hbm_to_vmem [thread:$0]  (!%p5931_p1), %s5905_s8, 256, %s5159_s9, [#allocation15], %s5933_s4, %s5933_s4, %s5932_s12  }
 0x1b8   : > { %s891_s24 = sshll.u32 %s4701_s21, 4  ;;  %s4702_s27 = smov [#allocation22]   ;;  %s892_s24 = int_to_ptr.vmem [resolvable:$true] %s891_s24 }
 0x1b9   : > { %s912_s6 = sshll.u32 %s4702_s27, 4  ;;  %s5192_s6 = int_to_ptr.vmem [resolvable:$true] %s912_s6 }
 0x1bc   : > { %s4019_s13 = scalar_lea.hbm %s5934_s20, 16 }
 0x1bd   : > { %p4020_p6 = scmp.ne.s32.totalorder %s5934_s20, %s4019_s13  ;;  %p4026_p5 = scmp.lt.u32.totalorder %s4019_s13, %s5934_s20 }
 0x1bf   : > { %p4022_p12 = pnand %p4020_p6, %p5930_p8 }
 0x1c1   : > { %p4023_p13 = pneg %p4022_p12 }
 0x1c3   : > { %p4028_p9 = pnand %p4026_p5, %p4023_p13 }
 0x1c5   : > { %4031 = shalt.err (!%p4028_p9)
}
 0x1c6   : > { %s4032_s29 = scalar_lea.vmem %s892_s24, 16  ;;  %s4039_s9 = scalar_lea.vmem %s892_s24, 32 }
 0x1c7   : > { %p4033_p7 = scmp.ne.s32.totalorder %s892_s24, %s4032_s29  ;;  %p4040_p4 = scmp.lt.s32.totalorder %s892_s24, %s892_s24 }
 0x1c8   : > { %p4041_p3 = scmp.lt.s32.totalorder %s4039_s9, %s4032_s29 }
 0x1c9   : > { %p4035_p0 = pnand %p4033_p7, %p5930_p8 }
 0x1ca   : > { %p4042_p10 = por %p4041_p3, %p4040_p4 }
 0x1cb   : > { %p4036_p2 = pneg %p4035_p0 }
 0x1cd   : > { %p4043_p11 = pnand %p4042_p10, %p4036_p2 }
 0x1cf   : > { %4046 = shalt.err (!%p4043_p11)
}
 0x1d0   : > { %s5935_s21 = sld [smem:[#allocation80_spill]] }
 0x1d1   : > { %3330 = dma.hbm_to_vmem [thread:$0]  (!%p5931_p1), %s5934_s20, 16, %s892_s24, [#allocation18]  }
 0x1d6   : > { %s4047_s27 = scalar_lea.hbm %s5935_s21, 1024 }
 0x1d7   : > { %p4048_p6 = scmp.ne.s32.totalorder %s5935_s21, %s4047_s27  ;;  %p4054_p5 = scmp.lt.u32.totalorder %s4047_s27, %s5935_s21 }
 0x1d9   : > { %p4050_p12 = pnand %p4048_p6, %p5930_p8 }
 0x1db   : > { %p4051_p13 = pneg %p4050_p12 }
 0x1dd   : > { %p4056_p9 = pnand %p4054_p5, %p4051_p13 }
 0x1df   : > { %4059 = shalt.err (!%p4056_p9)
}
 0x1e0   : > { %s4060_s29 = scalar_lea.vmem %s5192_s6, 1024  ;;  %p4068_p4 = scmp.lt.s32.totalorder %s5192_s6, %s5192_s6 }
 0x1e1   : > { %p4061_p7 = scmp.ne.s32.totalorder %s5192_s6, %s4060_s29  ;;  %p4069_p3 = scmp.lt.s32.totalorder %s4060_s29, %s4060_s29 }
 0x1e3   : > { %p4063_p0 = pnand %p4061_p7, %p5930_p8  ;;  %p4070_p10 = por %p4069_p3, %p4068_p4 }
 0x1e5   : > { %p4064_p2 = pneg %p4063_p0 }
 0x1e7   : > { %p4071_p11 = pnand %p4070_p10, %p4064_p2 }
 0x1e9   : > { %4074 = shalt.err (!%p4071_p11)
}
 0x1ea   : > { %s5936_s24 = sld [smem:[#allocation82_spill]]  ;;  %s4703_s13 = smov [#allocation25]  }
 0x1eb   : > { %3336 = dma.hbm_to_vmem [thread:$0]  (!%p5931_p1), %s5935_s21, 1024, %s5192_s6, [#allocation21], %s5933_s4, %s5933_s4, %s5932_s12  }
 0x1ec   : > { %s938_s9 = sshll.u32 %s4703_s13, 4  ;;  %s4704_s27 = smov [#allocation28]   ;;  %s939_s9 = int_to_ptr.vmem [resolvable:$true] %s938_s9 }
 0x1ed   : > { %s964_s8 = sshll.u32 %s4704_s27, 4  ;;  %s5222_s8 = int_to_ptr.vmem [resolvable:$true] %s964_s8 }
 0x1f0   : > { %s4075_s29 = scalar_lea.hbm %s5936_s24, 1024 }
 0x1f1   : > { %p4076_p6 = scmp.ne.s32.totalorder %s5936_s24, %s4075_s29  ;;  %p4082_p5 = scmp.lt.u32.totalorder %s4075_s29, %s5936_s24 }
 0x1f3   : > { %p4078_p12 = pnand %p4076_p6, %p5930_p8 }
 0x1f5   : > { %p4079_p13 = pneg %p4078_p12 }
 0x1f7   : > { %p4084_p9 = pnand %p4082_p5, %p4079_p13 }
 0x1f9   : > { %4087 = shalt.err (!%p4084_p9)
}
 0x1fa   : > { %s4088_s20 = scalar_lea.vmem %s939_s9, 1024  ;;  %p4096_p4 = scmp.lt.s32.totalorder %s939_s9, %s939_s9 }
 0x1fb   : > { %p4089_p7 = scmp.ne.s32.totalorder %s939_s9, %s4088_s20  ;;  %p4097_p3 = scmp.lt.s32.totalorder %s4088_s20, %s4088_s20 }
 0x1fd   : > { %p4091_p0 = pnand %p4089_p7, %p5930_p8  ;;  %p4098_p10 = por %p4097_p3, %p4096_p4 }
 0x1ff   : > { %p4092_p2 = pneg %p4091_p0 }
 0x201   : > { %p4099_p11 = pnand %p4098_p10, %p4092_p2 }
 0x203   : > { %4102 = shalt.err (!%p4099_p11)
}
 0x204   : > { %s5937_s6 = sld [smem:[#allocation84_spill]] }
 0x205   : > { %3342 = dma.hbm_to_vmem [thread:$0]  (!%p5931_p1), %s5936_s24, 1024, %s939_s9, [#allocation24], %s5933_s4, %s5933_s4, %s5932_s12  }
 0x20a   : > { %s4103_s13 = scalar_lea.hbm %s5937_s6, 256 }
 0x20b   : > { %p4104_p6 = scmp.ne.s32.totalorder %s5937_s6, %s4103_s13  ;;  %p4110_p5 = scmp.lt.u32.totalorder %s4103_s13, %s5937_s6 }
 0x20d   : > { %p4106_p12 = pnand %p4104_p6, %p5930_p8 }
 0x20f   : > { %p4107_p13 = pneg %p4106_p12 }
 0x211   : > { %p4112_p9 = pnand %p4110_p5, %p4107_p13 }
 0x213   : > { %4115 = shalt.err (!%p4112_p9)
}
 0x214   : > { %s4116_s20 = scalar_lea.vmem %s5222_s8, 256  ;;  %p4124_p4 = scmp.lt.s32.totalorder %s5222_s8, %s5222_s8 }
 0x215   : > { %p4117_p7 = scmp.ne.s32.totalorder %s5222_s8, %s4116_s20  ;;  %p4125_p3 = scmp.lt.s32.totalorder %s4116_s20, %s4116_s20 }
 0x217   : > { %p4119_p0 = pnand %p4117_p7, %p5930_p8  ;;  %p4126_p10 = por %p4125_p3, %p4124_p4 }
 0x219   : > { %p4120_p2 = pneg %p4119_p0 }
 0x21b   : > { %p4127_p11 = pnand %p4126_p10, %p4120_p2 }
 0x21d   : > { %4130 = shalt.err (!%p4127_p11)
}
 0x21e   : > { %s5938_s9 = sld [smem:[#allocation86_spill]]  ;;  %s4705_s27 = smov [#allocation31]  }
 0x21f   : > { %3348 = dma.hbm_to_vmem [thread:$0]  (!%p5931_p1), %s5937_s6, 256, %s5222_s8, [#allocation27], %s5933_s4, %s5933_s4, %s5932_s12  }
 0x220   : > { %s989_s29 = sshll.u32 %s4705_s27, 4  ;;  %s4706_s13 = smov [#allocation34]   ;;  %s990_s29 = int_to_ptr.vmem [resolvable:$true] %s989_s29 }
 0x221   : > { %s1010_s21 = sshll.u32 %s4706_s13, 4  ;;  %s5255_s21 = int_to_ptr.vmem [resolvable:$true] %s1010_s21 }
 0x224   : > { %s4131_s20 = scalar_lea.hbm %s5938_s9, 16 }
 0x225   : > { %p4132_p6 = scmp.ne.s32.totalorder %s5938_s9, %s4131_s20  ;;  %p4138_p5 = scmp.lt.u32.totalorder %s4131_s20, %s5938_s9 }
 0x227   : > { %p4134_p12 = pnand %p4132_p6, %p5930_p8 }
 0x229   : > { %p4135_p13 = pneg %p4134_p12 }
 0x22b   : > { %p4140_p9 = pnand %p4138_p5, %p4135_p13 }
 0x22d   : > { %4143 = shalt.err (!%p4140_p9)
}
 0x22e   : > { %s4144_s24 = scalar_lea.vmem %s990_s29, 16  ;;  %s4151_s8 = scalar_lea.vmem %s990_s29, 32 }
 0x22f   : > { %p4145_p7 = scmp.ne.s32.totalorder %s990_s29, %s4144_s24  ;;  %p4152_p4 = scmp.lt.s32.totalorder %s990_s29, %s990_s29 }
 0x230   : > { %p4153_p3 = scmp.lt.s32.totalorder %s4151_s8, %s4144_s24 }
 0x231   : > { %p4147_p0 = pnand %p4145_p7, %p5930_p8 }
 0x232   : > { %p4154_p10 = por %p4153_p3, %p4152_p4 }
 0x233   : > { %p4148_p2 = pneg %p4147_p0 }
 0x235   : > { %p4155_p11 = pnand %p4154_p10, %p4148_p2 }
 0x237   : > { %4158 = shalt.err (!%p4155_p11)
}
 0x238   : > { %s5939_s27 = sld [smem:[#allocation88_spill]] }
 0x239   : > { %3354 = dma.hbm_to_vmem [thread:$0]  (!%p5931_p1), %s5938_s9, 16, %s990_s29, [#allocation30]  }
 0x23e   : > { %s4159_s13 = scalar_lea.hbm %s5939_s27, 512 }
 0x23f   : > { %p4160_p6 = scmp.ne.s32.totalorder %s5939_s27, %s4159_s13  ;;  %p4166_p5 = scmp.lt.u32.totalorder %s4159_s13, %s5939_s27 }
 0x241   : > { %p4162_p12 = pnand %p4160_p6, %p5930_p8 }
 0x243   : > { %p4163_p13 = pneg %p4162_p12 }
 0x245   : > { %p4168_p9 = pnand %p4166_p5, %p4163_p13 }
 0x247   : > { %4171 = shalt.err (!%p4168_p9)
}
 0x248   : > { %s4172_s24 = scalar_lea.vmem %s5255_s21, 512  ;;  %p4180_p4 = scmp.lt.s32.totalorder %s5255_s21, %s5255_s21 }
 0x249   : > { %p4173_p7 = scmp.ne.s32.totalorder %s5255_s21, %s4172_s24  ;;  %p4181_p3 = scmp.lt.s32.totalorder %s4172_s24, %s4172_s24 }
 0x24b   : > { %p4175_p0 = pnand %p4173_p7, %p5930_p8  ;;  %p4182_p10 = por %p4181_p3, %p4180_p4 }
 0x24d   : > { %p4176_p2 = pneg %p4175_p0 }
 0x24f   : > { %p4183_p11 = pnand %p4182_p10, %p4176_p2 }
 0x251   : > { %4186 = shalt.err (!%p4183_p11)
}
 0x252   : > { %s5940_s29 = sld [smem:[#allocation90_spill]]  ;;  %s4707_s20 = smov [#allocation37]  }
 0x253   : > { %3360 = dma.hbm_to_vmem [thread:$0]  (!%p5931_p1), %s5939_s27, 512, %s5255_s21, [#allocation33], %s5933_s4, %s5933_s4, %s5932_s12  }
 0x254   : > { %s1036_s8 = sshll.u32 %s4707_s20, 4  ;;  %s4708_s13 = smov [#allocation40]   ;;  %s1037_s8 = int_to_ptr.vmem [resolvable:$true] %s1036_s8 }
 0x255   : > { %s1061_s6 = sshll.u32 %s4708_s13, 4  ;;  %s5285_s6 = int_to_ptr.vmem [resolvable:$true] %s1061_s6 }
 0x258   : > { %s4187_s24 = scalar_lea.hbm %s5940_s29, 512 }
 0x259   : > { %p4188_p6 = scmp.ne.s32.totalorder %s5940_s29, %s4187_s24  ;;  %p4194_p5 = scmp.lt.u32.totalorder %s4187_s24, %s5940_s29 }
 0x25b   : > { %p4190_p12 = pnand %p4188_p6, %p5930_p8 }
 0x25d   : > { %p4191_p13 = pneg %p4190_p12 }
 0x25f   : > { %p4196_p9 = pnand %p4194_p5, %p4191_p13 }
 0x261   : > { %4199 = shalt.err (!%p4196_p9)
}
 0x262   : > { %s4200_s9 = scalar_lea.vmem %s1037_s8, 512  ;;  %p4208_p4 = scmp.lt.s32.totalorder %s1037_s8, %s1037_s8 }
 0x263   : > { %p4201_p7 = scmp.ne.s32.totalorder %s1037_s8, %s4200_s9  ;;  %p4209_p3 = scmp.lt.s32.totalorder %s4200_s9, %s4200_s9 }
 0x265   : > { %p4203_p0 = pnand %p4201_p7, %p5930_p8  ;;  %p4210_p10 = por %p4209_p3, %p4208_p4 }
 0x267   : > { %p4204_p2 = pneg %p4203_p0 }
 0x269   : > { %p4211_p11 = pnand %p4210_p10, %p4204_p2 }
 0x26b   : > { %4214 = shalt.err (!%p4211_p11)
}
 0x26c   : > { %s5941_s21 = sld [smem:[#allocation92_spill]] }
 0x26d   : > { %3366 = dma.hbm_to_vmem [thread:$0]  (!%p5931_p1), %s5940_s29, 512, %s1037_s8, [#allocation36], %s5933_s4, %s5933_s4, %s5932_s12  }
 0x272   : > { %s4215_s20 = scalar_lea.hbm %s5941_s21, 16 }
 0x273   : > { %p4216_p6 = scmp.ne.s32.totalorder %s5941_s21, %s4215_s20  ;;  %p4222_p5 = scmp.lt.u32.totalorder %s4215_s20, %s5941_s21 }
 0x275   : > { %p4218_p12 = pnand %p4216_p6, %p5930_p8 }
 0x277   : > { %p4219_p13 = pneg %p4218_p12 }
 0x279   : > { %p4224_p9 = pnand %p4222_p5, %p4219_p13 }
 0x27b   : > { %4227 = shalt.err (!%p4224_p9)
}
 0x27c   : > { %s4228_s9 = scalar_lea.vmem %s5285_s6, 16  ;;  %s4235_s13 = scalar_lea.vmem %s5285_s6, 32 }
 0x27d   : > { %p4229_p7 = scmp.ne.s32.totalorder %s5285_s6, %s4228_s9  ;;  %p4236_p4 = scmp.lt.s32.totalorder %s5285_s6, %s5285_s6 }
 0x27e   : > { %p4237_p3 = scmp.lt.s32.totalorder %s4235_s13, %s4228_s9 }
 0x27f   : > { %p4231_p0 = pnand %p4229_p7, %p5930_p8 }
 0x280   : > { %p4238_p10 = por %p4237_p3, %p4236_p4 }
 0x281   : > { %p4232_p2 = pneg %p4231_p0 }
 0x283   : > { %p4239_p11 = pnand %p4238_p10, %p4232_p2 }
 0x285   : > { %4242 = shalt.err (!%p4239_p11)
}
 0x286   : > { %s5942_s12 = sld [smem:[#allocation68_spill]]  ;;  %s5943_s4 = sld [smem:[#allocation93_spill]] }
 0x287   : > { %3372 = dma.hbm_to_vmem [thread:$0]  (!%p5931_p1), %s5941_s21, 16, %s5285_s6, [#allocation39]  }
 0x288   : > { %s4709_s8 = smov [#allocation41]  }
 0x289   : > { %s1072_s24 = sshll.u32 %s4709_s8, 4  ;;  %s1073_s24 = int_to_ptr.vmem [resolvable:$true] %s1072_s24 }
 0x28c   : > { %s5318_s20 = scalar_lea.hbm %s5942_s12, %s5117_s11  ;;  %s4243_s9 = scalar_lea.hbm %s5943_s4, 16 }
 0x28d   : > { %p4244_p6 = scmp.ne.s32.totalorder %s5943_s4, %s4243_s9  ;;  %p4250_p5 = scmp.lt.u32.totalorder %s4243_s9, %s5943_s4 }
 0x28f   : > { %p4246_p12 = pnand %p4244_p6, %p5930_p8 }
 0x291   : > { %p4247_p13 = pneg %p4246_p12 }
 0x293   : > { %p4252_p9 = pnand %p4250_p5, %p4247_p13 }
 0x295   : > { %4255 = shalt.err (!%p4252_p9)
}
 0x296   : > { %s4256_s13 = scalar_lea.vmem %s1073_s24, 16  ;;  %s4263_s6 = scalar_lea.vmem %s1073_s24, 32 }
 0x297   : > { %p4257_p7 = scmp.ne.s32.totalorder %s1073_s24, %s4256_s13  ;;  %p4264_p4 = scmp.lt.s32.totalorder %s1073_s24, %s1073_s24 }
 0x298   : > { %p4265_p3 = scmp.lt.s32.totalorder %s4263_s6, %s4256_s13 }
 0x299   : > { %p4259_p0 = pnand %p4257_p7, %p5930_p8 }
 0x29a   : > { %p4266_p10 = por %p4265_p3, %p4264_p4 }
 0x29b   : > { %p4260_p2 = pneg %p4259_p0 }
 0x29d   : > { %p4267_p11 = pnand %p4266_p10, %p4260_p2 }
 0x29f   : > { %4270 = shalt.err (!%p4267_p11)
}
 0x2a0   : > { %s5944_s8 = sld [smem:[#allocation70_spill]]  ;;  %s1087_s17 = scalar_lea.vmem [#allocation2], %s5114_s22 }
 0x2a1   : > { %3375 = dma.hbm_to_vmem [thread:$0]  (!%p5931_p1), %s5943_s4, 16, %s1073_s24, [#allocation42]  }
 0x2a2   : > { %s1094_s9 = sshll.u32 %s1087_s17, 4  ;;  %s5945_s7 = sand.u32 1, %s4623_s16   ;;  %s5331_s9 = int_to_ptr.vmem [resolvable:$true] %s1094_s9 }
 0x2a3   : > { %s1084_s6 = scalar_lea.sflag [#allocation3], %s5945_s7  ;;  %s4271_s21 = scalar_lea.hbm %s5318_s20, 128 }
 0x2a4   : > { %p4272_p8 = scmp.ne.s32.totalorder %s5318_s20, %s4271_s21  ;;  %p5946_p6 = scmp.ne.s32.totalorder %s5929_s14, 0 }
 0x2a5   : > { %s4276_s27 = scalar_lea.hbm %s5942_s12, 256  ;;  %p4277_p5 = scmp.lt.u32.totalorder %s5318_s20, %s5942_s12 }
 0x2a6   : > { %s5335_s13 = scalar_lea.hbm %s5944_s8, %s5117_s11  ;;  %p4274_p12 = pnand %p4272_p8, %p5946_p6 }
 0x2a7   : > { %p4278_p9 = scmp.lt.u32.totalorder %s4276_s27, %s4271_s21  ;;  %p4280_p0 = scmp.lt.u32.totalorder %s4271_s21, %s5318_s20 }
 0x2a8   : > { %p4275_p13 = pneg %p4274_p12 }
 0x2a9   : > { %p4279_p7 = por %p4278_p9, %p4277_p5 }
 0x2ab   : > { %p4281_p2 = por %p4280_p0, %p4279_p7 }
 0x2ad   : > { %p4282_p1 = pnand %p4281_p2, %p4275_p13 }
 0x2af   : > { %4285 = shalt.err (!%p4282_p1)
}
 0x2b0   : > { %s4286_s24 = scalar_lea.vmem %s5331_s9, 128  ;;  %s4710_s17 = smov [#allocation2]  }
 0x2b1   : > { %p4287_p4 = scmp.ne.s32.totalorder %s5331_s9, %s4286_s24  ;;  %s4291_s7 = sshll.u32 %s4710_s17, 4  ;;  %s4292_s7 = int_to_ptr.vmem [resolvable:$false] %s4291_s7 }
 0x2b2   : > { %s4293_s4 = scalar_lea.vmem %s4292_s7, 256  ;;  %p4294_p11 = scmp.lt.s32.totalorder %s5331_s9, %s4292_s7 }
 0x2b3   : > { %p4289_p3 = pnand %p4287_p4, %p5946_p6  ;;  %p4295_p8 = scmp.lt.s32.totalorder %s4293_s4, %s4286_s24 }
 0x2b5   : > { %p4290_p10 = pneg %p4289_p3  ;;  %p4296_p12 = por %p4295_p8, %p4294_p11 }
 0x2b7   : > { %p4297_p5 = pnand %p4296_p12, %p4290_p10 }
 0x2b9   : > { %4300 = shalt.err (!%p4297_p5)
}
 0x2ba   : > { %p5947_p13 = scmp.ne.s32.totalorder %s5928_s3, 0  ;;  %s5948_s27 = sld [smem:[#allocation71_spill]] }
 0x2bb   : > { %s1123_s21 = scalar_lea.vmem [#allocation7], %s5114_s22  ;;  %s4301_s17 = scalar_lea.hbm %s5335_s13, 128 }
 0x2bc   : > { %3379 = dma.hbm_to_vmem [thread:$0]  (!%p5947_p13), %s5318_s20, 128, %s5331_s9, %s1084_s6  }
 0x2bd   : > { %s1130_s4 = sshll.u32 %s1123_s21, 4  ;;  %p4302_p9 = scmp.ne.s32.totalorder %s5335_s13, %s4301_s17  ;;  %s1131_s4 = int_to_ptr.vmem [resolvable:$true] %s1130_s4 }
 0x2be   : > { %s4306_s7 = scalar_lea.hbm %s5944_s8, 256  ;;  %p4307_p2 = scmp.lt.u32.totalorder %s5335_s13, %s5944_s8 }
 0x2bf   : > { %p4304_p7 = pnand %p4302_p9, %p5946_p6  ;;  %p4308_p1 = scmp.lt.u32.totalorder %s4306_s7, %s4301_s17 }
 0x2c0   : > { %s5359_s24 = scalar_lea.hbm %s5948_s27, %s5117_s11  ;;  %p4310_p3 = scmp.lt.u32.totalorder %s4301_s17, %s5335_s13 }
 0x2c1   : > { %p4305_p0 = pneg %p4304_p7  ;;  %p4309_p4 = por %p4308_p1, %p4307_p2 }
 0x2c3   : > { %p4311_p10 = por %p4310_p3, %p4309_p4 }
 0x2c5   : > { %p4312_p11 = pnand %p4311_p10, %p4305_p0 }
 0x2c7   : > { %4315 = shalt.err (!%p4312_p11)
}
 0x2c8   : > { %s4316_s12 = scalar_lea.vmem %s1131_s4, 128  ;;  %s4711_s11 = smov [#allocation7]  }
 0x2c9   : > { %p4317_p8 = scmp.ne.s32.totalorder %s1131_s4, %s4316_s12  ;;  %s4321_s20 = sshll.u32 %s4711_s11, 4  ;;  %s4322_s20 = int_to_ptr.vmem [resolvable:$false] %s4321_s20 }
 0x2ca   : > { %s4323_s9 = scalar_lea.vmem %s4322_s20, 256  ;;  %p4324_p9 = scmp.lt.s32.totalorder %s1131_s4, %s4322_s20 }
 0x2cb   : > { %p4319_p12 = pnand %p4317_p8, %p5946_p6  ;;  %p4325_p7 = scmp.lt.s32.totalorder %s4323_s9, %s4316_s12 }
 0x2cd   : > { %p4320_p5 = pneg %p4319_p12  ;;  %p4326_p13 = por %p4325_p7, %p4324_p9 }
 0x2cf   : > { %p4327_p1 = pnand %p4326_p13, %p4320_p5 }
 0x2d1   : > { %4330 = shalt.err (!%p4327_p1)
}
 0x2d2   : > { %p5949_p2 = scmp.ne.s32.totalorder %s5928_s3, 0  ;;  %s1141_s6 = scalar_lea.vmem [#allocation8], %s5114_s22 }
 0x2d3   : > { %s1148_s21 = sshll.u32 %s1141_s6, 4  ;;  %s5950_s12 = sand.u32 1, %s4627_s18   ;;  %s1149_s21 = int_to_ptr.vmem [resolvable:$true] %s1148_s21 }
 0x2d4   : > { %3385 = dma.hbm_to_vmem [thread:$0]  (!%p5949_p2), %s5335_s13, 128, %s1131_s4, %s5133_s23  }
 0x2d5   : > { %s1138_s17 = scalar_lea.sflag [#allocation9], %s5950_s12  ;;  %s4331_s7 = scalar_lea.hbm %s5359_s24, 128 }
 0x2d6   : > { %p4332_p13 = scmp.ne.s32.totalorder %s5359_s24, %s4331_s7  ;;  %s4336_s11 = scalar_lea.hbm %s5948_s27, 256 }
 0x2d7   : > { %p4337_p3 = scmp.lt.u32.totalorder %s5359_s24, %s5948_s27  ;;  %p4338_p10 = scmp.lt.u32.totalorder %s4336_s11, %s4331_s7 }
 0x2d8   : > { %p4334_p0 = pnand %p4332_p13, %p5946_p6  ;;  %p4340_p8 = scmp.lt.u32.totalorder %s4331_s7, %s5359_s24 }
 0x2d9   : > { %p4339_p11 = por %p4338_p10, %p4337_p3 }
 0x2da   : > { %p4335_p4 = pneg %p4334_p0 }
 0x2db   : > { %p4341_p12 = por %p4340_p8, %p4339_p11 }
 0x2dd   : > { %p4342_p5 = pnand %p4341_p12, %p4335_p4 }
 0x2df   : > { %4345 = shalt.err (!%p4342_p5)
}
 0x2e0   : > { %s4346_s20 = scalar_lea.vmem %s1149_s21, 128  ;;  %s4712_s23 = smov [#allocation8]  }
 0x2e1   : > { %p4347_p9 = scmp.ne.s32.totalorder %s1149_s21, %s4346_s20  ;;  %s4351_s22 = sshll.u32 %s4712_s23, 4  ;;  %s4352_s22 = int_to_ptr.vmem [resolvable:$false] %s4351_s22 }
 0x2e2   : > { %s4353_s13 = scalar_lea.vmem %s4352_s22, 256  ;;  %p4354_p13 = scmp.lt.s32.totalorder %s1149_s21, %s4352_s22 }
 0x2e3   : > { %p4349_p7 = pnand %p4347_p9, %p5946_p6  ;;  %p4355_p0 = scmp.lt.s32.totalorder %s4353_s13, %s4346_s20 }
 0x2e5   : > { %p4350_p1 = pneg %p4349_p7  ;;  %p4356_p2 = por %p4355_p0, %p4354_p13 }
 0x2e7   : > { %p4357_p3 = pnand %p4356_p2, %p4350_p1 }
 0x2e9   : > { %4360 = shalt.err (!%p4357_p3)
}
 0x2ea   : > { %p5951_p10 = scmp.ne.s32.totalorder %s5928_s3, 0  ;;  %p5952_p4 = scmp.ne.s32.totalorder %s5919_s28, 0 }
 0x2eb   : > { %s5394_s14 = sand.u32 (!%p5952_p4), 1, %s4619_s15   ;;  %p5953_p6 = scmp.ne.s32.totalorder (!%p5952_p4), %s5925_s1, 0 }
 0x2ec   : > { %3388 = dma.hbm_to_vmem [thread:$0]  (!%p5951_p10), %s5359_s24, 128, %s1149_s21, %s1138_s17  }
 0x2ed   : > { %1157 = sbr.rel (%p5952_p4) target bundleno = 4622 (0x120e), region = 124  ;;  %s5397_s4 = sshll.u32 (!%p5952_p4), %s5394_s14, 3 }
 0x2ee   : > { %s1160_s9 = scalar_lea.sflag (!%p5952_p4), [#allocation3], %s5394_s14  ;;  %s1163_s6 = scalar_lea.vmem (!%p5952_p4), [#allocation2], %s5397_s4 }
 0x2f4   : > { %4542 = dma.done.wait (%p5953_p6), %s1160_s9, 128  }
 0x2f5   : > { %4544 = vsyncadd (%p5953_p6), %s1160_s9, 4294967168  ;;  %s5406_s3 = sand.u32 1, %s4909_s26   ;;  %s1172_s24 = scalar_lea.vmem [#allocation5], %s5397_s4 }
 0x2f6   : > { %s1169_s28 = scalar_lea.sflag [#allocation6], %s5406_s3 }
 0x2f7   : > { %4546 = dma.done.wait (%p5953_p6), %s1169_s28, 256  }
 0x2f8   : > { %4548 = vsyncadd (%p5953_p6), %s1169_s28, 4294967040  ;;  %s1181_s21 = scalar_lea.vmem [#allocation7], %s5397_s4  ;;  %s1187_s12 = scalar_lea.sflag [#allocation9], %s5406_s3 }
 0x2f9   : > { %s1190_s17 = scalar_lea.vmem [#allocation8], %s5397_s4 }
 0x2fa   : > { %4550 = dma.done.wait (%p5953_p6), %s1187_s12, 128  }
 0x2fb   : > { %4552 = vsyncadd (%p5953_p6), %s1187_s12, 4294967168  ;;  %p5954_p2 = scmp.eq.s32.totalorder %s4909_s26, 0 }
 0x2fd   : > { %4554 = dma.done.wait (%p5954_p2), [#allocation9], 1024   ;;  %p5955_p11 = pmov %p5954_p2 }
 0x2fe   : > { %p5956_p8 = pmov %p5954_p2 }
 0x2ff   : > { %4556 = vsyncadd (%p5955_p11), [#allocation9], 4294966272 }
 0x300   : > { %4558 = dma.done.wait (%p5956_p8), [#allocation12], 1088   ;;  %p5957_p12 = pmov %p5954_p2 }
 0x301   : > { %p5958_p5 = pmov %p5954_p2 }
 0x302   : > { %4560 = vsyncadd (%p5957_p12), [#allocation12], 4294966208 }
 0x303   : > { %4562 = dma.done.wait (%p5958_p5), [#allocation15], 320   ;;  %p5959_p9 = pmov %p5954_p2 }
 0x304   : > { %p5960_p7 = pmov %p5954_p2 }
 0x305   : > { %4564 = vsyncadd (%p5959_p9), [#allocation15], 4294966976 }
 0x306   : > { %4566 = dma.done.wait (%p5960_p7), [#allocation18], 32   ;;  %p5961_p1 = pmov %p5954_p2 }
 0x308   : > { %4568 = vsyncadd (%p5961_p1), [#allocation18], 4294967264  ;;  %p5962_p13 = pmov %p5961_p1 }
 0x309   : > { %p5963_p0 = pmov %p5961_p1 }
 0x30a   : > { %4570 = dma.done.wait (%p5962_p13), [#allocation21], 1040  }
 0x30b   : > { %4572 = vsyncadd (%p5963_p0), [#allocation21], 4294966256  ;;  %p5964_p3 = pmov %p5963_p0 }
 0x30c   : > { %p5965_p10 = pmov %p5963_p0 }
 0x30d   : > { %4574 = dma.done.wait (%p5964_p3), [#allocation24], 1088  }
 0x30e   : > { %4576 = vsyncadd (%p5965_p10), [#allocation24], 4294966208  ;;  %p5966_p4 = pmov %p5963_p0 }
 0x30f   : > { %p5967_p6 = pmov %p5963_p0 }
 0x310   : > { %4578 = dma.done.wait (%p5966_p4), [#allocation27], 320  }
 0x311   : > { %4580 = vsyncadd (%p5967_p6), [#allocation27], 4294966976  ;;  %p5968_p2 = pmov %p5963_p0 }
 0x312   : > { %p5969_p11 = pmov %p5963_p0 }
 0x313   : > { %4582 = dma.done.wait (%p5968_p2), [#allocation30], 32  }
 0x314   : > { %4584 = vsyncadd (%p5969_p11), [#allocation30], 4294967264  ;;  %p5970_p8 = pmov %p5963_p0 }
 0x315   : > { %p5971_p12 = pmov %p5963_p0 }
 0x316   : > { %4586 = dma.done.wait (%p5970_p8), [#allocation33], 528  }
 0x317   : > { %4588 = vsyncadd (%p5971_p12), [#allocation33], 4294966768  ;;  %p5972_p5 = pmov %p5963_p0 }
 0x318   : > { %p5973_p9 = pmov %p5963_p0 }
 0x319   : > { %4590 = dma.done.wait (%p5972_p5), [#allocation36], 544  }
 0x31a   : > { %4592 = vsyncadd (%p5973_p9), [#allocation36], 4294966752  ;;  %p5974_p7 = pmov %p5963_p0 }
 0x31b   : > { %p5975_p1 = pmov %p5963_p0 }
 0x31c   : > { %4594 = dma.done.wait (%p5974_p7), [#allocation39], 32  }
 0x31d   : > { %4596 = vsyncadd (%p5975_p1), [#allocation39], 4294967264  ;;  %p5976_p13 = pmov %p5963_p0 }
 0x31f   : > { %4598 = dma.done.wait (%p5976_p13), [#allocation42], 16  }
 0x320   : > { %4600 = vsyncadd (%p5963_p0), [#allocation42], 4294967280  ;;  %s5470_s1 = sshll.u32 %s5394_s14, 5  ;;  %v5474_v0 = vld [vmem:[%s1163_s6] sm:$0xff]  ;;  %v5478_v1 = vld [vmem:[%s1172_s24] sm:$0xff]  ;;  %v5495_v5 = vmov 0.0  }
 0x321   : > { %v5482_v2 = vld [vmem:[%s1181_s21] sm:$0xff]  ;;  %v5486_v3 = vpack.c.bf16 %v5474_v0, %v5474_v0  ;;  %v1394_v4 = vpack.c.bf16 %v5478_v1, %v5478_v1  ;;  %s1368_s11 = scalar_lea.vmem [#allocation44], %s5470_s1  ;;  %s5869_s20 = scalar_lea.vmem [#allocation46], %s5470_s1 }
 0x322   : > { %s1382_s23 = scalar_lea.vmem [#allocation47], %s5470_s1  ;;  %s5868_s22 = scalar_lea.vmem [#allocation49], %s5470_s1 }
 0x323   : > { %s5497_s13 = smov 0  }
 0x324 LB: >> { %v4713_v6 = vmov 0.0   ;;  %s3079_s9 = sshll.u32 %s4635_s13, 4  ;;  %vm4714_vm0 = vmmov 0   ;;  %vm1430_vm1 = vcmask 261120   ;;  %s3023_s24 = sshll.u32 %s4635_s13, 3  ;;  %vm1543_vm2 = vcmask 64512   ;;  %s4635_s13 = sphi %s5497_s13, %s1401_s13   ;;  %v4631_v5 = vphi %v5495_v5, %v5977_v5  }
 0x325   : >> { %3127 = vmatprep.subr.bf16.mxu1 %v4713_v6  ;;  %3119 = vmatprep.subr.bf16.mxu0 %v4713_v6  ;;  %s1476_s6 = scalar_lea.vmem [#allocation13], %s3079_s9  ;;  %s1405_s28 = scalar_lea.vmem [#allocation10], %s3079_s9  ;;  %vm1617_vm3 = vcmask 1043456  }
 0x326   : >> { %3131 = vmatprep.mubr.msk.bf16.mxu1 %vm4714_vm0, %v4713_v6  ;;  %3123 = vmatprep.mubr.msk.bf16.mxu0 %vm4714_vm0, %v4713_v6  ;;  %v3597_v7 = vld [vmem:[%s1476_s6] sm:$0xff]   ;;  %v3599_v9 = vld [vmem:[%s1476_s6 + $0x8] sm:$0xff]   ;;  %s1481_s21 = scalar_lea.vmem [#allocation14], %s4635_s13  ;;  %s1410_s12 = scalar_lea.vmem [#allocation11], %s4635_s13 }
 0x327   : >> { %v3598_v8 = vld [vmem:[%s1405_s28] sm:$0xff]   ;;  %3128 = vmatpush3.bf16.msra.mxu1 %v3597_v7  ;;  %v3600_v10 = vld [vmem:[%s1405_s28 + $0x8] sm:$0xff]   ;;  %s1542_s9 = scalar_lea.vmem %s1368_s11, %s3023_s24 [#allocation44]  ;;  %s3026_s6 = sshll.u32 %s4635_s13, 2 }
 0x328   : >> { %3129 = vmatprep.subr.bf16.mxu1 %v4713_v6  ;;  %3120 = vmatpush3.bf16.msra.mxu0 %v3598_v8  ;;  %v3019_v11 = vld [vmem:[%s1481_s21] ss:$0 sm:$0xff]  ;;  %s4715_s28 = smov 120   ;;  %s1663_s21 = scalar_lea.vmem [#allocation16], %s3026_s6 }
 0x329   : >> { %3121 = vmatprep.subr.bf16.mxu0 %v4713_v6  ;;  %v3014_v12 = vld [vmem:[%s1410_s12] ss:$0 sm:$0xff]  ;;  %s1549_s12 = scalar_lea.vmem %s5869_s20, %s3023_s24 [#allocation46]  ;;  %s1401_s13 = sadd.s32 1, %s4635_s13  }
 0x32a   : >> { %v1664_v26 = vld [vmem:[%s1663_s21] sm:$0xf]  ;;  %p1398_p3 = scmp.ge.s32.totalorder %s1401_s13, 4  }
 0x32b   : >> { %3130 = vmatpush3.bf16.msra.mxu1 %v3599_v9  ;;  %v1669_v28 = vsel %vm1617_vm3, %v1664_v26, 0  ;;  %v3028_v57 = vld [vmem:[#allocation17] ss:$0 sm:$0xff] (%p1398_p3)  ;;  %s5557_s13 = smov (%p1398_p3), 0  }
 0x32c   : >> { %3122 = vmatpush3.bf16.msra.mxu0 %v3600_v10  ;;  %3141 = vmatprep.subr.bf16.mxu1 %v4713_v6  ;;  %v5549_v7 = vld [vmem:[%s1190_s17] sm:$0xff] (%p1398_p3) }
 0x32d   : >> { %3135 = vmatprep.subr.bf16.mxu0 %v4713_v6  ;;  %v3029_v10 = vld [vmem:[#allocation19] ss:$0 sm:$0xff] (%p1398_p3) }
 0x32e   : >> { %3132 = vmatmul.mubr.msk.bf16.vlgmr.msra.gmra.mrb[0].mxu1 %vm1430_vm1, %v5486_v3 }
 0x32f   : >> { %3124 = vmatmul.mubr.msk.bf16.vlgmr.msra.gmra.mrb[0].mxu0 %vm1430_vm1, %v5486_v3  ;;  %3143 = vmatprep.mubr.msk.bf16.mxu1 %vm4714_vm0, %v4713_v6 }
 0x330   : >> { %3137 = vmatprep.mubr.msk.bf16.mxu0 %vm4714_vm0, %v4713_v6 }
 0x401   : >> { %v1535_v13 = vpop.f32.mrb[0].mxu1 }
 0x402   : >> { %v1536_v14 = vadd.f32 %v3019_v11, %v1535_v13  ;;  %v3133_v15 = vpop.f32.mrb[1].mxu1  ;;  %v1468_v16 = vpop.f32.mrb[0].mxu0  ;;  %v3030_v11 = vld [vmem:[#allocation20] ss:$0 sm:$0xff] (%p1398_p3) }
 0x403   : >> { %v1538_v17 = vpop.f32.mrb[2].mxu1  ;;  %v1469_v18 = vadd.f32 %v3014_v12, %v1468_v16  ;;  %v3125_v19 = vpop.f32.mrb[1].mxu0  ;;  %v5555_v15 = vmov (%p1398_p3), 0.0  }
 0x404   : >> { %1544 = vst.msk [vmem:[%s1542_s9] sm:$0xff] %vm1543_vm2, %v1536_v14  ;;  %v3134_v20 = vpop.f32.mrb[3].mxu1  ;;  %v1552_v21 = vpack.c.bf16 %v1536_v14, %v1536_v14  ;;  %v1471_v22 = vpop.f32.mrb[2].mxu0 }
 0x405   : >> { %v3126_v23 = vpop.f32.mrb[3].mxu0  ;;  %v1474_v24 = vmul.f32 0.35355338, %v1469_v18 }
 0x406   : >> { %1612 = vrot.lane.b32.xlu1 %v1552_v21, %s4715_s28  ;;  %v1557_v25 = vsel %vm1543_vm2, %v1552_v21, 0 }
 0x407   : >> { %3136 = vmatpush3.bf16.xpose.msra.mxu0 %v1557_v25  ;;  %v1551_v27 = vpack.c.bf16 %v1474_v24, %v1474_v24 }
 0x408   : >> { %3147 = vmatprep.subr.bf16.mxu0 %v4713_v6 }
 0x40a   : >> { %1546 = vrot.lane.b32.xlu1 %v1536_v14, %s4715_s28 }
 0x40e   : >> { %3138 = vmatmul.mubr.msk.bf16.vlgmr.msra.gmra.mrb[4].mxu0 %vm1543_vm2, %v1551_v27 }
 0x40f   : >> { %3148 = vmatpush3.bf16.msra.mxu0 %v1669_v28  ;;  %3149 = vmatprep.mubr.msk.bf16.mxu0 %vm4714_vm0, %v4713_v6 }
 0x478   : >> { %v1613_v29 = vpop.permute.xlu1 %1612 }
 0x479   : >> { %v1619_v30 = vsel %vm1617_vm3, %v1613_v29, 0 }
 0x47a   : >> { %3142 = vmatpush3.bf16.msra.mxu1 %v1619_v30 }
 0x47c   : >> { %v1547_v31 = vpop.permute.xlu1 %1546 }
 0x47d   : >> { %1550 = vst.msk [vmem:[%s1549_s12] sm:$0xff] %vm1543_vm2, %v1547_v31 }
 0x4e1   : >> { %v1593_v32 = vpop.f32.mrb[4].mxu0 }
 0x4e2   : >> { %v1594_v33 = vadd.f32 %v1593_v32, %v5482_v2  ;;  %v3139_v34 = vpop.f32.mrb[5].mxu0 }
 0x4e3   : >> { %v1596_v35 = vpop.f32.mrb[6].mxu0 }
 0x4e4   : >> { %v3140_v36 = vpop.f32.mrb[7].mxu0  ;;  %v1599_v37 = vsel %vm1543_vm2, %v1594_v33, -inf }
 0x4e5   : >> { %1600 = vmax.xlane.f32.xlu0 %v1599_v37 }
 0x572   : >> { %v1601_v38 = vpop.xlane.xlu0 %1600 }
 0x573   : >> { %v1602_v39 = vsub.f32 %v1594_v33, %v1601_v38 }
 0x575   : >> { %v1603_v40 = vmul.f32 1.442695, %v1602_v39 }
 0x577   : >> { %3601 = vpow2.f32 %v1603_v40 }
 0x581   : >> { %v3602_v41 = vpop.eup %3601 }
 0x582   : >> { %v1605_v42 = vsel %vm1543_vm2, %v3602_v41, 0.0 }
 0x583   : >> { %1606 = vadd.xlane.f32.xlu0 %v1605_v42 }
 0x610   : >> { %v1607_v43 = vpop.xlane.xlu0 %1606 }
 0x611   : >> { %3603 = vrcp.f32 %v1607_v43 }
 0x61b   : >> { %v3604_v44 = vpop.eup %3603 }
 0x61c   : >> { %v1609_v45 = vmul.f32 %v3604_v44, %v3602_v41 }
 0x61e   : >> { %v1610_v46 = vpack.c.bf16 %v1609_v45, %v1609_v45 }
 0x620   : >> { %3144 = vmatmul.mubr.msk.bf16.vlgmr.msra.gmra.mrb[4].mxu1 %vm1543_vm2, %v1610_v46 }
 0x6f3   : >> { %v1655_v47 = vpop.f32.mrb[4].mxu1 }
 0x6f4   : >> { %v1661_v48 = vpack.c.bf16 %v1655_v47, %v1655_v47  ;;  %v3145_v49 = vpop.f32.mrb[5].mxu1 }
 0x6f5   : >> { %v1658_v50 = vpop.f32.mrb[6].mxu1 }
 0x6f6   : >> { %v3146_v51 = vpop.f32.mrb[7].mxu1  ;;  %3150 = vmatmul.mubr.msk.bf16.vlgmr.msra.gmra.mrb[8].mxu0 %vm1543_vm2, %v1661_v48 }
 0x7c6   : > { %1400 = sbr.rel (!%p1398_p3) target bundleno = 804 (0x324), region = 426 }
 0x7c9   : >> { %v1705_v52 = vpop.f32.mrb[8].mxu0 }
 0x7ca   : >> { %v1711_v53 = vadd.f32 %v4631_v5, %v1705_v52   ;;  %v3151_v54 = vpop.f32.mrb[9].mxu0 }
 0x7cb   : >> { %v1708_v55 = vpop.f32.mrb[10].mxu0 }
 0x7cc   : >> { %v3152_v56 = vpop.f32.mrb[11].mxu0  ;;  %v5977_v5 = vmov %v1711_v53  ;;  %v1719_v58 = vadd.f32 (%p1398_p3), %v3028_v57, %v1711_v53 }
 0x7ce   : > { %v1720_v59 = vadd.f32 %v1719_v58, %v5474_v0 }
 0x7d0   : > { %v1722_v60 = vsel %vm1430_vm1, %v1720_v59, 0.0 }
 0x7d1   : > { %1723 = vadd.xlane.f32.xlu0 %v1722_v60 }
 0x85e   : > { %v1724_v61 = vpop.xlane.xlu0 %1723 }
 0x85f   : > { %v1726_v62 = vmul.f32 0.03125, %v1724_v61 }
 0x861   : > { %v1727_v63 = vsub.f32 %v1720_v59, %v1726_v62 }
 0x863   : > { %v1728_v5 = vmul.f32 %v1727_v63, %v1727_v63 }
 0x865   : > { %v1729_v6 = vsel %vm1430_vm1, %v1728_v5, 0.0 }
 0x866   : > { %1730 = vadd.xlane.f32.xlu0 %v1729_v6 }
 0x8f3   : > { %v1731_v8 = vpop.xlane.xlu0 %1730 }
 0x8f4   : > { %v1732_v9 = vmul.f32 0.03125, %v1731_v8 }
 0x8f6   : > { %v1733_v2 = vadd.f32 1e-05, %v1732_v9 }
 0x8f8   : > { %3605 = vrsqrt.f32 %v1733_v2 }
 0x902   : > { %v3606_v3 = vpop.eup %3605 }
 0x903   : > { %v1735_v0 = vmul.f32 %v3606_v3, %v1727_v63 }
 0x905   : > { %v1743_v12 = vmul.f32 %v3029_v10, %v1735_v0 }
 0x907   : > { %v5551_v13 = vadd.f32 %v3030_v11, %v1743_v12 }
 0x909   : > { %v1752_v14 = vpack.c.bf16 %v5551_v13, %v5551_v13 }
 0x90a LB: >> { %v4716_v16 = vmov 0.0   ;;  %s3081_s17 = sshll.u32 %s4643_s13, 4  ;;  %vm4717_vm4 = vmmov 0   ;;  %s3042_s6 = sshll.u32 %s4643_s13, 3  ;;  %s4643_s13 = sphi %s5557_s13, %s1759_s13   ;;  %v4639_v15 = vphi %v5555_v15, %v5978_v15  }
 0x90b   : >> { %3161 = vmatprep.subr.bf16.mxu1 %v4716_v16  ;;  %3153 = vmatprep.subr.bf16.mxu0 %v4716_v16  ;;  %s1833_s24 = scalar_lea.vmem [#allocation25], %s3081_s17  ;;  %s1763_s9 = scalar_lea.vmem [#allocation22], %s3081_s17 }
 0x90c   : >> { %3165 = vmatprep.mubr.msk.bf16.mxu1 %vm4717_vm4, %v4716_v16  ;;  %3157 = vmatprep.mubr.msk.bf16.mxu0 %vm4717_vm4, %v4716_v16  ;;  %v3607_v17 = vld [vmem:[%s1833_s24] sm:$0xff]   ;;  %v3609_v19 = vld [vmem:[%s1833_s24 + $0x8] sm:$0xff]   ;;  %s1838_s28 = scalar_lea.vmem [#allocation26], %s4643_s13  ;;  %s1768_s21 = scalar_lea.vmem [#allocation23], %s4643_s13 }
 0x90d   : >> { %v3608_v18 = vld [vmem:[%s1763_s9] sm:$0xff]   ;;  %3162 = vmatpush3.bf16.msra.mxu1 %v3607_v17  ;;  %v3610_v20 = vld [vmem:[%s1763_s9 + $0x8] sm:$0xff]   ;;  %s1902_s12 = scalar_lea.vmem %s1382_s23, %s3042_s6 [#allocation47]  ;;  %s4718_s17 = smov 120  }
 0x90e   : >> { %3163 = vmatprep.subr.bf16.mxu1 %v4716_v16  ;;  %3154 = vmatpush3.bf16.msra.mxu0 %v3608_v18  ;;  %v3038_v21 = vld [vmem:[%s1838_s28] ss:$0 sm:$0xff]  ;;  %s1909_s24 = scalar_lea.vmem %s5868_s22, %s3042_s6 [#allocation49]  ;;  %s3045_s9 = sshll.u32 %s4643_s13, 2 }
 0x90f   : >> { %3155 = vmatprep.subr.bf16.mxu0 %v4716_v16  ;;  %v3033_v22 = vld [vmem:[%s1768_s21] ss:$0 sm:$0xff]  ;;  %s2023_s6 = scalar_lea.vmem [#allocation28], %s3045_s9  ;;  %s1759_s13 = sadd.s32 1, %s4643_s13  }
 0x910   : >> { %v2024_v51 = vld [vmem:[%s2023_s6] sm:$0xf]  ;;  %p1756_p10 = scmp.ge.s32.totalorder %s1759_s13, 4  }
 0x911   : >> { %3164 = vmatpush3.bf16.msra.mxu1 %v3609_v19  ;;  %v2029_v52 = vsel %vm1617_vm3, %v2024_v51, 0  ;;  %v3047_v9 = vld [vmem:[#allocation29] ss:$0 sm:$0xff] (%p1756_p10)  ;;  %s5611_s13 = smov (%p1756_p10), 0  }
 0x912   : >> { %3156 = vmatpush3.bf16.msra.mxu0 %v3610_v20  ;;  %3175 = vmatprep.subr.bf16.mxu1 %v4716_v16 }
 0x913   : >> { %3169 = vmatprep.subr.bf16.mxu0 %v4716_v16 }
 0x914   : >> { %3166 = vmatmul.mubr.msk.bf16.vlgmr.msra.gmra.mrb[0].mxu1 %vm1430_vm1, %v1394_v4  ;;  %v3049_v4 = vld [vmem:[#allocation32] ss:$0 sm:$0xff] (%p1756_p10) }
 0x915   : >> { %3158 = vmatmul.mubr.msk.bf16.vlgmr.msra.gmra.mrb[0].mxu0 %vm1430_vm1, %v1752_v14  ;;  %3177 = vmatprep.mubr.msk.bf16.mxu1 %vm4717_vm4, %v4716_v16 }
 0x916   : >> { %3171 = vmatprep.mubr.msk.bf16.mxu0 %vm4717_vm4, %v4716_v16 }
 0x9e7   : >> { %v1895_v23 = vpop.f32.mrb[0].mxu1 }
 0x9e8   : >> { %v1896_v24 = vadd.f32 %v3038_v21, %v1895_v23  ;;  %v3167_v25 = vpop.f32.mrb[1].mxu1  ;;  %v1825_v26 = vpop.f32.mrb[0].mxu0  ;;  %v3048_v21 = vld [vmem:[#allocation31] ss:$0 sm:$0xff] (%p1756_p10) }
 0x9e9   : >> { %v1898_v27 = vpop.f32.mrb[2].mxu1  ;;  %v1826_v28 = vadd.f32 %v3033_v22, %v1825_v26  ;;  %v3159_v29 = vpop.f32.mrb[1].mxu0  ;;  %v4645_v22 = vmov (%p1756_p10), 0.0  }
 0x9ea   : >> { %v3168_v30 = vpop.f32.mrb[3].mxu1  ;;  %v1912_v31 = vpack.c.bf16 %v1896_v24, %v1896_v24  ;;  %v1828_v32 = vpop.f32.mrb[2].mxu0  ;;  %1904 = vst.msk [vmem:[%s1902_s12] sm:$0xff] %vm1543_vm2, %v1896_v24 }
 0x9eb   : >> { %v3160_v33 = vpop.f32.mrb[3].mxu0  ;;  %v1831_v34 = vmul.f32 0.35355338, %v1826_v28 }
 0x9ec   : >> { %1972 = vrot.lane.b32.xlu1 %v1912_v31, %s4718_s17  ;;  %v1917_v35 = vsel %vm1543_vm2, %v1912_v31, 0 }
 0x9ed   : >> { %3170 = vmatpush3.bf16.xpose.msra.mxu0 %v1917_v35  ;;  %v1911_v36 = vpack.c.bf16 %v1831_v34, %v1831_v34 }
 0x9ee   : >> { %3181 = vmatprep.subr.bf16.mxu0 %v4716_v16 }
 0x9f0   : >> { %1906 = vrot.lane.b32.xlu1 %v1896_v24, %s4718_s17 }
 0x9f4   : >> { %3172 = vmatmul.mubr.msk.bf16.vlgmr.msra.gmra.mrb[4].mxu0 %vm1543_vm2, %v1911_v36 }
 0x9f5   : >> { %3183 = vmatprep.mubr.msk.bf16.mxu0 %vm4717_vm4, %v4716_v16  ;;  %3182 = vmatpush3.bf16.msra.mxu0 %v2029_v52 }
 0xa5e   : >> { %v1973_v37 = vpop.permute.xlu1 %1972 }
 0xa5f   : >> { %v1979_v38 = vsel %vm1617_vm3, %v1973_v37, 0 }
 0xa60   : >> { %3176 = vmatpush3.bf16.msra.mxu1 %v1979_v38 }
 0xa62   : >> { %v1907_v39 = vpop.permute.xlu1 %1906 }
 0xa63   : >> { %1910 = vst.msk [vmem:[%s1909_s24] sm:$0xff] %vm1543_vm2, %v1907_v39 }
 0xac7   : >> { %v1953_v40 = vpop.f32.mrb[4].mxu0 }
 0xac8   : >> { %v1954_v41 = vadd.f32 %v1953_v40, %v5549_v7  ;;  %v3173_v42 = vpop.f32.mrb[5].mxu0 }
 0xac9   : >> { %v1956_v43 = vpop.f32.mrb[6].mxu0 }
 0xaca   : >> { %v3174_v44 = vpop.f32.mrb[7].mxu0  ;;  %v1959_v45 = vsel %vm1543_vm2, %v1954_v41, -inf }
 0xacb   : >> { %1960 = vmax.xlane.f32.xlu0 %v1959_v45 }
 0xb58   : >> { %v1961_v46 = vpop.xlane.xlu0 %1960 }
 0xb59   : >> { %v1962_v47 = vsub.f32 %v1954_v41, %v1961_v46 }
 0xb5b   : >> { %v1963_v48 = vmul.f32 1.442695, %v1962_v47 }
 0xb5d   : >> { %3611 = vpow2.f32 %v1963_v48 }
 0xb67   : >> { %v3612_v49 = vpop.eup %3611 }
 0xb68   : >> { %v1965_v50 = vsel %vm1543_vm2, %v3612_v49, 0.0 }
 0xb69   : >> { %1966 = vadd.xlane.f32.xlu0 %v1965_v50 }
 0xbf6   : >> { %v1967_v53 = vpop.xlane.xlu0 %1966 }
 0xbf7   : >> { %3613 = vrcp.f32 %v1967_v53 }
 0xc01   : >> { %v3614_v54 = vpop.eup %3613 }
 0xc02   : >> { %v1969_v55 = vmul.f32 %v3614_v54, %v3612_v49 }
 0xc04   : >> { %v1970_v56 = vpack.c.bf16 %v1969_v55, %v1969_v55 }
 0xc06   : >> { %3178 = vmatmul.mubr.msk.bf16.vlgmr.msra.gmra.mrb[4].mxu1 %vm1543_vm2, %v1970_v56 }
 0xcd9   : >> { %v2015_v57 = vpop.f32.mrb[4].mxu1 }
 0xcda   : >> { %v2021_v58 = vpack.c.bf16 %v2015_v57, %v2015_v57  ;;  %v3179_v59 = vpop.f32.mrb[5].mxu1 }
 0xcdb   : >> { %v2018_v60 = vpop.f32.mrb[6].mxu1 }
 0xcdc   : >> { %v3180_v61 = vpop.f32.mrb[7].mxu1  ;;  %3184 = vmatmul.mubr.msk.bf16.vlgmr.msra.gmra.mrb[8].mxu0 %vm1543_vm2, %v2021_v58 }
 0xdac   : > { %1758 = sbr.rel (!%p1756_p10) target bundleno = 2314 (0x90a), region = 437 }
 0xdaf   : >> { %v2065_v62 = vpop.f32.mrb[8].mxu0 }
 0xdb0   : >> { %v2071_v63 = vadd.f32 %v4639_v15, %v2065_v62   ;;  %v3185_v5 = vpop.f32.mrb[9].mxu0 }
 0xdb1   : >> { %v2068_v6 = vpop.f32.mrb[10].mxu0 }
 0xdb2   : >> { %v3186_v8 = vpop.f32.mrb[11].mxu0  ;;  %v5978_v15 = vmov %v2071_v63  ;;  %v2079_v2 = vadd.f32 (%p1756_p10), %v3047_v9, %v2071_v63 }
 0xdb4   : > { %v2080_v3 = vadd.f32 %v2079_v2, %v5551_v13 }
 0xdb6   : > { %v2081_v10 = vsel %vm1430_vm1, %v2080_v3, 0.0 }
 0xdb7   : > { %2082 = vadd.xlane.f32.xlu0 %v2081_v10 }
 0xe44   : > { %v2083_v0 = vpop.xlane.xlu0 %2082 }
 0xe45   : > { %v2084_v11 = vmul.f32 0.03125, %v2083_v0 }
 0xe47   : > { %v2085_v12 = vsub.f32 %v2080_v3, %v2084_v11 }
 0xe49   : > { %v2086_v15 = vmul.f32 %v2085_v12, %v2085_v12 }
 0xe4b   : > { %v2087_v16 = vsel %vm1430_vm1, %v2086_v15, 0.0 }
 0xe4c   : > { %2088 = vadd.xlane.f32.xlu0 %v2087_v16 }
 0xed9   : > { %v2089_v17 = vpop.xlane.xlu0 %2088 }
 0xeda   : > { %v2090_v18 = vmul.f32 0.03125, %v2089_v17 }
 0xedc   : > { %v2091_v19 = vadd.f32 1e-05, %v2090_v18 }
 0xede   : > { %3615 = vrsqrt.f32 %v2091_v19 }
 0xee8   : > { %v3616_v20 = vpop.eup %3615 }
 0xee9   : > { %v2093_v1 = vmul.f32 %v3616_v20, %v2085_v12 }
 0xeeb   : > { %v2101_v7 = vmul.f32 %v3048_v21, %v2093_v1 }
 0xeed   : > { %v2109_v13 = vadd.f32 %v3049_v4, %v2101_v7 }
 0xeef   : > { %v2110_v14 = vpack.c.bf16 %v2109_v13, %v2109_v13 }
 0xef0 LB: >> { %v4719_v23 = vmov 0.0   ;;  %vm4720_vm5 = vmmov 0   ;;  %s3083_s28 = sshll.u32 %s4651_s13, 4  ;;  %s2125_s17 = scalar_lea.vmem [#allocation35], %s4651_s13  ;;  %s4651_s13 = sphi %s5611_s13, %s2116_s13   ;;  %v4647_v22 = vphi %v4645_v22, %v4646_v22  }
 0xef1   : >> { %3187 = vmatprep.subr.bf16.mxu0 %v4719_v23  ;;  %3191 = vmatprep.mubr.msk.bf16.mxu0 %vm4720_vm5, %v4719_v23  ;;  %s2120_s21 = scalar_lea.vmem [#allocation34], %s3083_s28  ;;  %s2199_s12 = scalar_lea.vmem [#allocation37], %s3083_s28  ;;  %v3052_v28 = vld [vmem:[%s2125_s17] ss:$0 sm:$0xff] }
 0xef2   : >> { %3195 = vmatprep.subr.bf16.mxu1 %v4719_v23  ;;  %3199 = vmatprep.mubr.msk.bf16.mxu1 %vm4720_vm5, %v4719_v23  ;;  %v3617_v24 = vld [vmem:[%s2120_s21] sm:$0xff]   ;;  %v3618_v25 = vld [vmem:[%s2120_s21 + $0x8] sm:$0xff]   ;;  %s2116_s13 = sadd.s32 1, %s4651_s13  }
 0xef3   : >> { %3188 = vmatpush3.bf16.msra.mxu0 %v3617_v24  ;;  %v3619_v26 = vld [vmem:[%s2199_s12] sm:$0xff]   ;;  %v3620_v27 = vld [vmem:[%s2199_s12 + $0x8] sm:$0xff]   ;;  %p2113_p4 = scmp.ge.s32.totalorder %s2116_s13, 2  }
 0xef4   : >> { %3189 = vmatprep.subr.bf16.mxu0 %v4719_v23  ;;  %3196 = vmatpush3.bf16.msra.mxu1 %v3619_v26  ;;  %v3060_v49 = vld [vmem:[#allocation38] ss:$0 sm:$0xff] (%p2113_p4)  ;;  %s5630_s24 = sshll.u32 (%p2113_p4), %s4909_s26, 9  ;;  %s2346_s6 = sshll.u32 (%p2113_p4), %s1368_s11, 4  ;;  %s5638_s6 = int_to_ptr.vmem [resolvable:$true] %s2346_s6 }
 0xef5   : >> { %3197 = vmatprep.subr.bf16.mxu1 %v4719_v23  ;;  %s5634_s9 = scalar_lea.hbm (%p2113_p4), %s5904_s19, %s5630_s24  ;;  %s5871_s13 = scalar_lea.sflag (%p2113_p4), [#allocation45], %s5406_s3 }
 0xef6   : > { %s4361_s28 = scalar_lea.vmem (%p2113_p4), %s5638_s6, 512  ;;  %p5979_p2 = scmp.ne.s32.totalorder (%p2113_p4), %s5926_s5, 0 }
 0xef7   : >> { %3190 = vmatpush3.bf16.msra.mxu0 %v3618_v25  ;;  %p4362_p6 = scmp.ne.s32.totalorder (%p2113_p4), %s5638_s6, %s4361_s28  ;;  %s4721_s21 = smov (%p2113_p4), [#allocation44]  }
 0xef8   : >> { %3198 = vmatpush3.bf16.msra.mxu1 %v3620_v27  ;;  %s4365_s12 = sshll.u32 (%p2113_p4), %s4721_s21, 4  ;;  %s4366_s12 = int_to_ptr.vmem [resolvable:$false] %s4365_s12 }
 0xef9   : > { %p4363_p11 = pnand (%p2113_p4), %p4362_p6, %p5979_p2  ;;  %s4367_s17 = scalar_lea.vmem (%p2113_p4), %s4366_s12, 1024 }
 0xefa   : >> { %3192 = vmatmul.mubr.msk.bf16.vlgmr.msra.gmra.mrb[0].mxu0 %vm1430_vm1, %v2110_v14  ;;  %p4368_p12 = scmp.lt.s32.totalorder (%p2113_p4), %s5638_s6, %s4366_s12  ;;  %p4369_p5 = scmp.lt.s32.totalorder (%p2113_p4), %s4367_s17, %s4361_s28 }
 0xefb   : > { %p4364_p8 = pneg (%p2113_p4), %p4363_p11 }
 0xefc   : > { %p4370_p9 = por (%p2113_p4), %p4369_p5, %p4368_p12 }
 0xefe   : > { %p4371_p7 = pnand (%p2113_p4), %p4370_p9, %p4364_p8 }
 0xfcd   : >> { %v2182_v29 = vpop.f32.mrb[0].mxu0 }
 0xfce   : >> { %v2183_v30 = vadd.f32 %v3052_v28, %v2182_v29  ;;  %v3193_v31 = vpop.f32.mrb[1].mxu0 }
 0xfcf   : >> { %v2185_v32 = vpop.f32.mrb[2].mxu0 }
 0xfd0   : >> { %v2188_v33 = vmul.f32 %v2183_v30, %v2183_v30  ;;  %v3194_v34 = vpop.f32.mrb[3].mxu0 }
 0xfd2   : >> { %v2189_v35 = vmul.f32 %v2188_v33, %v2183_v30 }
 0xfd4   : >> { %v2190_v36 = vmul.f32 0.044715, %v2189_v35 }
 0xfd6   : >> { %v2191_v37 = vadd.f32 %v2190_v36, %v2183_v30 }
 0xfd8   : >> { %v2192_v38 = vmul.f32 0.7978846, %v2191_v37 }
 0xfda   : >> { %3621 = vtanh.f32 %v2192_v38 }
 0xfe4   : >> { %v3622_v39 = vpop.eup %3621 }
 0xfe5   : >> { %v2194_v40 = vadd.f32 1.0, %v3622_v39 }
 0xfe7   : >> { %v2195_v41 = vmul.f32 0.5, %v2194_v40 }
 0xfe9   : >> { %v2196_v42 = vmul.f32 %v2195_v41, %v2183_v30 }
 0xfeb   : >> { %v2197_v43 = vpack.c.bf16 %v2196_v42, %v2196_v42 }
 0xfed   : >> { %3200 = vmatmul.mubr.msk.bf16.vlgmr.msra.gmra.mrb[0].mxu1 %vm1430_vm1, %v2197_v43 }
0x10bd   : > { %2115 = sbr.rel (!%p2113_p4) target bundleno = 3824 (0xef0), region = 448 }
0x10c0   : >> { %v2253_v44 = vpop.f32.mrb[0].mxu1 }
0x10c1   : >> { %v2259_v45 = vadd.f32 %v4647_v22, %v2253_v44   ;;  %v3201_v46 = vpop.f32.mrb[1].mxu1 }
0x10c2   : >> { %v2256_v47 = vpop.f32.mrb[2].mxu1 }
0x10c3   : >> { %v3202_v48 = vpop.f32.mrb[3].mxu1  ;;  %v4646_v22 = vmov %v2259_v45   ;;  %v2267_v50 = vadd.f32 (%p2113_p4), %v3060_v49, %v2259_v45 }
0x10c5   : > { %v2268_v51 = vadd.f32 %v2267_v50, %v2109_v13 }
0x10c7   : > { %v2269_v52 = vsel %vm1430_vm1, %v2268_v51, 0.0 }
0x10c8   : > { %2270 = vadd.xlane.f32.xlu0 %v2269_v52 }
0x1155   : > { %v2271_v53 = vpop.xlane.xlu0 %2270 }
0x1156   : > { %v2272_v54 = vmul.f32 0.03125, %v2271_v53 }
0x1158   : > { %v5624_v55 = vsub.f32 %v2268_v51, %v2272_v54 }
0x115a   : > { %v2274_v56 = vmul.f32 %v5624_v55, %v5624_v55 }
0x115c   : > { %v2275_v57 = vsel %vm1430_vm1, %v2274_v56, 0.0 }
0x115d   : > { %2276 = vadd.xlane.f32.xlu0 %v2275_v57 }
0x115e   : > { %4374 = shalt.err (!%p4371_p7)
}
0x115f   : > { %s4375_s11 = scalar_lea.hbm %s5634_s9, 512  ;;  %s4379_s21 = scalar_lea.hbm %s5904_s19, 1024 }
0x1160   : > { %p4376_p1 = scmp.ne.s32.totalorder %s5634_s9, %s4375_s11  ;;  %p4380_p3 = scmp.lt.u32.totalorder %s5634_s9, %s5904_s19 }
0x1161   : > { %p4381_p10 = scmp.lt.u32.totalorder %s4379_s21, %s4375_s11  ;;  %p4383_p6 = scmp.lt.u32.totalorder %s4375_s11, %s5634_s9 }
0x1162   : > { %p4377_p13 = pnand %p4376_p1, %p5979_p2 }
0x1163   : > { %p4382_p4 = por %p4381_p10, %p4380_p3 }
0x1164   : > { %p4378_p0 = pneg %p4377_p13 }
0x1165   : > { %p4384_p11 = por %p4383_p6, %p4382_p4 }
0x1167   : > { %p4385_p8 = pnand %p4384_p11, %p4378_p0 }
0x1169   : > { %4388 = shalt.err (!%p4385_p8)
}
0x116a   : > { %s4722_s28 = smov 128   ;;  %s4723_s12 = smov 8  }
0x116b   : > { %3300 = dma.vmem_to_hbm [thread:$0]  (%p5979_p2), %s5638_s6, 512, %s5634_s9, %s5871_s13, %s4722_s28, %s4722_s28, %s4723_s12  }
0x116c   : > { %s5665_s17 = scalar_lea.hbm %s4881_s30, %s5630_s24  ;;  %s2378_s11 = sshll.u32 %s1382_s23, 4  ;;  %s5669_s11 = int_to_ptr.vmem [resolvable:$true] %s2378_s11 }
0x116d   : > { %s5873_s21 = scalar_lea.sflag [#allocation48], %s5406_s3  ;;  %s4389_s7 = scalar_lea.vmem %s5669_s11, 512 }
0x116e   : > { %p4390_p12 = scmp.ne.s32.totalorder %s5669_s11, %s4389_s7  ;;  %s4724_s22 = smov [#allocation47]  }
0x116f   : > { %s4393_s20 = sshll.u32 %s4724_s22, 4  ;;  %s4394_s20 = int_to_ptr.vmem [resolvable:$false] %s4393_s20 }
0x1170   : > { %p4391_p5 = pnand %p4390_p12, %p5979_p2  ;;  %s4395_s8 = scalar_lea.vmem %s4394_s20, 1024 }
0x1171   : > { %p4396_p7 = scmp.lt.s32.totalorder %s5669_s11, %s4394_s20  ;;  %p4397_p1 = scmp.lt.s32.totalorder %s4395_s8, %s4389_s7 }
0x1172   : > { %p4392_p9 = pneg %p4391_p5 }
0x1173   : > { %p4398_p13 = por %p4397_p1, %p4396_p7 }
0x1175   : > { %p4399_p0 = pnand %p4398_p13, %p4392_p9 }
0x1177   : > { %4402 = shalt.err (!%p4399_p0)
}
0x1178   : > { %s4403_s23 = scalar_lea.hbm %s5665_s17, 512  ;;  %s4407_s22 = scalar_lea.hbm %s4881_s30, 1024 }
0x1179   : > { %p4404_p3 = scmp.ne.s32.totalorder %s5665_s17, %s4403_s23  ;;  %p4408_p6 = scmp.lt.u32.totalorder %s5665_s17, %s4881_s30 }
0x117a   : > { %p4409_p11 = scmp.lt.u32.totalorder %s4407_s22, %s4403_s23  ;;  %p4411_p12 = scmp.lt.u32.totalorder %s4403_s23, %s5665_s17 }
0x117b   : > { %p4405_p10 = pnand %p4404_p3, %p5979_p2 }
0x117c   : > { %p4410_p8 = por %p4409_p11, %p4408_p6 }
0x117d   : > { %p4406_p4 = pneg %p4405_p10 }
0x117e   : > { %p4412_p5 = por %p4411_p12, %p4410_p8 }
0x1180   : > { %p4413_p9 = pnand %p4412_p5, %p4406_p4 }
0x1182   : > { %4416 = shalt.err (!%p4413_p9)
}
0x1183   : > { %s5980_s8 = sld [smem:[#allocation96_spill]]  ;;  %s5981_s7 = sld [smem:[#allocation97_spill]] }
0x1184   : > { %3302 = dma.vmem_to_hbm [thread:$0]  (%p5979_p2), %s5669_s11, 512, %s5665_s17, %s5873_s21, %s4722_s28, %s4722_s28, %s4723_s12  }
0x1185   : > { %s5982_s9 = scalar_lea.vmem [#allocation46], %s5470_s1  ;;  %s5983_s22 = scalar_lea.vmem [#allocation49], %s5470_s1 }
0x1186   : > { %s2362_s6 = sshll.u32 %s5982_s9, 4  ;;  %s5708_s13 = sshll.u32 %s5983_s22, 4  ;;  %s5704_s6 = int_to_ptr.vmem [resolvable:$true] %s2362_s6  ;;  %s5733_s13 = int_to_ptr.vmem [resolvable:$true] %s5708_s13 }
0x1187   : > { %s4417_s19 = scalar_lea.vmem %s5704_s6, 512  ;;  %s4725_s17 = smov [#allocation46]  }
0x1188   : > { %p4418_p7 = scmp.ne.s32.totalorder %s5704_s6, %s4417_s19  ;;  %s4421_s11 = sshll.u32 %s4725_s17, 4  ;;  %s4422_s11 = int_to_ptr.vmem [resolvable:$false] %s4421_s11 }
0x1189   : > { %s5696_s20 = scalar_lea.hbm %s5980_s8, %s5630_s24  ;;  %s5702_s23 = scalar_lea.hbm %s5981_s7, %s5630_s24 }
0x118a   : > { %p4419_p1 = pnand %p4418_p7, %p5979_p2  ;;  %s4423_s21 = scalar_lea.vmem %s4422_s11, 1024 }
0x118b   : > { %p4424_p0 = scmp.lt.s32.totalorder %s5704_s6, %s4422_s11  ;;  %p4425_p3 = scmp.lt.s32.totalorder %s4423_s21, %s4417_s19 }
0x118c   : > { %p4420_p13 = pneg %p4419_p1 }
0x118d   : > { %p4426_p10 = por %p4425_p3, %p4424_p0 }
0x118f   : > { %p4427_p4 = pnand %p4426_p10, %p4420_p13 }
0x1191   : > { %4430 = shalt.err (!%p4427_p4)
}
0x1192   : > { %s4431_s1 = scalar_lea.hbm %s5696_s20, 512  ;;  %s4435_s24 = scalar_lea.hbm %s5980_s8, 1024 }
0x1193   : > { %p4432_p6 = scmp.ne.s32.totalorder %s5696_s20, %s4431_s1  ;;  %p4436_p12 = scmp.lt.u32.totalorder %s5696_s20, %s5980_s8 }
0x1194   : > { %p4437_p5 = scmp.lt.u32.totalorder %s4435_s24, %s4431_s1  ;;  %p4439_p7 = scmp.lt.u32.totalorder %s4431_s1, %s5696_s20 }
0x1195   : > { %p4433_p11 = pnand %p4432_p6, %p5979_p2 }
0x1196   : > { %p4438_p9 = por %p4437_p5, %p4436_p12 }
0x1197   : > { %p4434_p8 = pneg %p4433_p11 }
0x1198   : > { %p4440_p1 = por %p4439_p7, %p4438_p9 }
0x119a   : > { %p4441_p13 = pnand %p4440_p1, %p4434_p8 }
0x119c   : > { %4444 = shalt.err (!%p4441_p13)
}
0x119d   : > { %s5984_s19 = scalar_lea.sflag [#allocation45], %s5406_s3  ;;  %s4445_s21 = scalar_lea.vmem %s5733_s13, 512 }
0x119e   : > { %3301 = dma.vmem_to_hbm [thread:$0]  (%p5979_p2), %s5704_s6, 512, %s5696_s20, %s5984_s19, %s4722_s28, %s4722_s28, %s4723_s12  }
0x119f   : > { %p4446_p0 = scmp.ne.s32.totalorder %s5733_s13, %s4445_s21  ;;  %s4726_s9 = smov [#allocation49]  }
0x11a0   : > { %s4449_s22 = sshll.u32 %s4726_s9, 4  ;;  %s4450_s22 = int_to_ptr.vmem [resolvable:$false] %s4449_s22 }
0x11a1   : > { %p4447_p3 = pnand %p4446_p0, %p5979_p2  ;;  %s4451_s17 = scalar_lea.vmem %s4450_s22, 1024 }
0x11a2   : > { %p4452_p4 = scmp.lt.s32.totalorder %s5733_s13, %s4450_s22  ;;  %p4453_p6 = scmp.lt.s32.totalorder %s4451_s17, %s4445_s21 }
0x11a3   : > { %p4448_p10 = pneg %p4447_p3 }
0x11a4   : > { %p4454_p11 = por %p4453_p6, %p4452_p4 }
0x11a6   : > { %p4455_p8 = pnand %p4454_p11, %p4448_p10 }
0x11a8   : > { %4458 = shalt.err (!%p4455_p8)
}
0x11a9   : > { %s4459_s20 = scalar_lea.hbm %s5702_s23, 512  ;;  %s4463_s6 = scalar_lea.hbm %s5981_s7, 1024 }
0x11aa   : > { %p4460_p12 = scmp.ne.s32.totalorder %s5702_s23, %s4459_s20  ;;  %p4464_p7 = scmp.lt.u32.totalorder %s5702_s23, %s5981_s7 }
0x11ab   : > { %p4465_p1 = scmp.lt.u32.totalorder %s4463_s6, %s4459_s20  ;;  %p4467_p0 = scmp.lt.u32.totalorder %s4459_s20, %s5702_s23 }
0x11ac   : > { %p4461_p5 = pnand %p4460_p12, %p5979_p2 }
0x11ad   : > { %p4466_p13 = por %p4465_p1, %p4464_p7 }
0x11ae   : > { %p4462_p9 = pneg %p4461_p5 }
0x11af   : > { %p4468_p3 = por %p4467_p0, %p4466_p13 }
0x11b1   : > { %p4469_p10 = pnand %p4468_p3, %p4462_p9 }
0x11b3   : > { %4472 = shalt.err (!%p4469_p10)
}
0x11b4   : > { %s5985_s11 = scalar_lea.sflag [#allocation48], %s5406_s3  ;;  %s5986_s1 = sld [smem:[#allocation94_spill]]  ;;  %v3061_v62 = vld [vmem:[#allocation40] ss:$0 sm:$0xff]  ;;  %v3062_v5 = vld [vmem:[#allocation41] ss:$0 sm:$0xff] }
0x11b5   : > { %3303 = dma.vmem_to_hbm [thread:$0]  (%p5979_p2), %s5733_s13, 512, %s5702_s23, %s5985_s11, %s4722_s28, %s4722_s28, %s4723_s12  }
0x11b6   : > { %s3068_s24 = sshll.u32 %s4909_s26, 7  ;;  %s5987_s3 = scalar_lea.vmem [#allocation43], %s5397_s4 }
0x11b7   : > { %s2333_s19 = sshll.u32 %s5987_s3, 4  ;;  %s5988_s13 = smov %s5987_s3  ;;  %s5764_s19 = int_to_ptr.vmem [resolvable:$true] %s2333_s19 }
0x11b8   : > { %s2300_s28 = scalar_lea.sflag [#allocation4], %s5394_s14  ;;  %s4473_s12 = scalar_lea.vmem %s5764_s19, 128 }
0x11b9   : > { %p4474_p4 = scmp.ne.s32.totalorder %s5764_s19, %s4473_s12  ;;  %s4727_s26 = smov [#allocation43]  }
0x11ba   : > { %s5762_s21 = scalar_lea.hbm %s5986_s1, %s3068_s24  ;;  %s4477_s23 = sshll.u32 %s4727_s26, 4  ;;  %s4478_s23 = int_to_ptr.vmem [resolvable:$false] %s4477_s23 }
0x11bb   : > { %p4475_p6 = pnand %p4474_p4, %p5979_p2  ;;  %s4479_s9 = scalar_lea.vmem %s4478_s23, 256 }
0x11bc   : > { %p4480_p8 = scmp.lt.s32.totalorder %s5764_s19, %s4478_s23  ;;  %p4481_p12 = scmp.lt.s32.totalorder %s4479_s9, %s4473_s12 }
0x11bd   : > { %p4476_p11 = pneg %p4475_p6 }
0x11be   : > { %p4482_p5 = por %p4481_p12, %p4480_p8 }
0x11c0   : > { %p4483_p9 = pnand %p4482_p5, %p4476_p11 }
0x11ea   : > { %v2277_v58 = vpop.xlane.xlu0 %2276 }
0x11eb   : > { %v2278_v59 = vmul.f32 0.03125, %v2277_v58 }
0x11ed   : > { %v2279_v60 = vadd.f32 1e-05, %v2278_v59 }
0x11ef   : > { %3623 = vrsqrt.f32 %v2279_v60 }
0x11f9   : > { %v3624_v61 = vpop.eup %3623 }
0x11fa   : > { %v2281_v63 = vmul.f32 %v3624_v61, %v5624_v55 }
0x11fc   : > { %v2289_v6 = vmul.f32 %v3061_v62, %v2281_v63 }
0x11fe   : > { %v2297_v8 = vadd.f32 %v3062_v5, %v2289_v6 }
0x1200   : > { %2298 = vst.msk [vmem:[%s5988_s13] sm:$0xff] %vm1430_vm1, %v2297_v8 }
0x1201   : > { %4486 = shalt.err (!%p4483_p9)
}
0x1202   : > { %s4487_s14 = scalar_lea.hbm %s5762_s21, 128  ;;  %s4491_s4 = scalar_lea.hbm %s5986_s1, 256 }
0x1203   : > { %p4488_p7 = scmp.ne.s32.totalorder %s5762_s21, %s4487_s14  ;;  %p4492_p0 = scmp.lt.u32.totalorder %s5762_s21, %s5986_s1 }
0x1204   : > { %p4493_p3 = scmp.lt.u32.totalorder %s4491_s4, %s4487_s14  ;;  %p4495_p4 = scmp.lt.u32.totalorder %s4487_s14, %s5762_s21 }
0x1205   : > { %p4489_p1 = pnand %p4488_p7, %p5979_p2 }
0x1206   : > { %p4494_p10 = por %p4493_p3, %p4492_p0 }
0x1207   : > { %p4490_p13 = pneg %p4489_p1 }
0x1208   : > { %p4496_p6 = por %p4495_p4, %p4494_p10 }
0x120a   : > { %p4497_p11 = pnand %p4496_p6, %p4490_p13 }
0x120c   : > { %4500 = shalt.err (!%p4497_p11)
}
0x120d   : > { %3299 = dma.vmem_to_hbm [thread:$0]  (%p5979_p2), %s5764_s19, 128, %s5762_s21, %s2300_s28  }
0x120e PF: > { %s2409_s22 = sand.u32 1, %s4615_s0   ;;  %p5989_p8 = scmp.ne.s32.totalorder %s5927_s10, 0 }
0x120f   : > { %p5990_p12 = scmp.ge.s32.totalorder %s4627_s18, 2  ;;  %s2410_s17 = scalar_lea.sflag [#allocation4], %s2409_s22 }
0x1211   : > { %p3390_p5 = pnand %p5990_p12, %p5989_p8 }
0x1213   : > { %4602 = dma.done.wait (!%p3390_p5), %s2410_s17, 128  }
0x1214   : > { %4604 = vsyncadd (!%p3390_p5), %s2410_s17, 4294967168  ;;  %s5991_s20 = sadd.s32 4294967294, %s4627_s18  }
0x1215   : > { %s2418_s6 = sand.u32 1, %s5991_s20  }
0x1216   : > { %s2419_s11 = scalar_lea.sflag [#allocation45], %s2418_s6 }
0x1217   : > { %4606 = dma.done.wait (!%p3390_p5), %s2419_s11, 1024  }
0x1218   : > { %4608 = vsyncadd (!%p3390_p5), %s2419_s11, 4294966272  ;;  %s2437_s5 = scalar_lea.sflag [#allocation48], %s2418_s6 }
0x1219   : > { %4610 = dma.done.wait (!%p3390_p5), %s2437_s5, 1024  }
0x121a   : > { %4612 = vsyncadd (!%p3390_p5), %s2437_s5, 4294966272  ;;  %p98_p2 = scmp.ge.s32.totalorder %s5080_s2, 4   ;;  %s5992_s0 = smov %s4619_s15 }
0x121b   : > { %s5993_s15 = smov %s4623_s16  ;;  %s5994_s16 = smov %s5092_s25 }
0x121c   : > { %s5995_s18 = smov %s5080_s2  ;;  %100 = sbr.rel (!%p98_p2) target bundleno = 92 (0x5c), region = 459 }
0x1223   :  { %2451 = vsyncpa [#allocation3], 1 }
0x1224   :  { %2453 = vsyncpa [#allocation3 + $0x1], 1 }
0x1225   :  { %2454 = vsyncpa [#allocation6], 1 }
0x1226   :  { %2456 = vsyncpa [#allocation6 + $0x1], 1 }
0x1227   :  { %2457 = vsyncpa [#allocation9], 1 }
0x1228   :  { %2459 = vsyncpa [#allocation9 + $0x1], 1 }
0x1229   :  { %2460 = vsyncpa [#allocation12], 1 }
0x122a   :  { %2461 = vsyncpa [#allocation15], 1 }
0x122b   :  { %2462 = vsyncpa [#allocation18], 1 }
0x122c   :  { %2463 = vsyncpa [#allocation21], 1 }
0x122d   :  { %2464 = vsyncpa [#allocation24], 1 }
0x122e   :  { %2465 = vsyncpa [#allocation27], 1 }
0x122f   :  { %2466 = vsyncpa [#allocation30], 1 }
0x1230   :  { %2467 = vsyncpa [#allocation33], 1 }
0x1231   :  { %2468 = vsyncpa [#allocation36], 1 }
0x1232   :  { %2469 = vsyncpa [#allocation39], 1 }
0x1233   :  { %2470 = vsyncpa [#allocation42], 1 }
0x1234   :  { %2471 = vsyncpa [#allocation4], 1 }
0x1235   :  { %2473 = vsyncpa [#allocation4 + $0x1], 1 }
0x1236   :  { %2474 = vsyncpa [#allocation45], 1 }
0x1237   :  { %2476 = vsyncpa [#allocation45 + $0x1], 1 }
0x1238   :  { %2477 = vsyncpa [#allocation48], 1 }
0x1239   :  { %2479 = vsyncpa [#allocation48 + $0x1], 1 }

// kernel: tpu_custom_call.1
= control target key start
LH: loop header
LB: loop body
LE: loop exit
PB: predicated region body
PF: predicated region fallthrough
CT: control target
= control target key end

     0   :  { %s4653_s6 = smov 1   ;;  %s4654_s10 = smov 2   ;;  %s5807_s0 = inlined_call_operand.smem [shape: u32[31], index: -1, kind: input, shape index: {}] }
   0x1   :  { %s4736_s5 = sld [smem:[%s5807_s0]]   ;;  %s4655_s14 = smov 3  }
   0x2   :  { %s4741_s9 = sld [smem:[%s5807_s0 + %s4653_s6]]   ;;  %s4656_s18 = smov 4  }
   0x3   :  { %s4746_s13 = sld [smem:[%s5807_s0 + %s4654_s10]]   ;;  %s4657_s22 = smov 5  }
   0x4   :  { %s4751_s17 = sld [smem:[%s5807_s0 + %s4655_s14]]   ;;  %s4658_s26 = smov 6  }
   0x5   :  { %s4756_s21 = sld [smem:[%s5807_s0 + %s4656_s18]]   ;;  %s4659_s30 = smov 7  }
   0x6   :  { %s4761_s25 = sld [smem:[%s5807_s0 + %s4657_s22]]   ;;  %s4660_s4 = smov 8  }
   0x7   :  { %5874 = sst [smem:[#allocation68_spill]] %s4736_s5  ;;  %s4661_s10 = smov 9  }
   0x8   :  { %5875 = sst [smem:[#allocation69_spill]] %s4741_s9  ;;  %s4662_s15 = smov 10  }
   0x9   :  { %5876 = sst [smem:[#allocation70_spill]] %s4746_s13  ;;  %s4663_s20 = smov 11  }
   0xa   :  { %5877 = sst [smem:[#allocation71_spill]] %s4751_s17  ;;  %s4665_s1 = smov 13  }
   0xb   :  { %5878 = sst [smem:[#allocation72_spill]] %s4756_s21  ;;  %s4666_s7 = smov 14  }
   0xc   :  { %5879 = sst [smem:[#allocation73_spill]] %s4761_s25  ;;  %s4668_s22 = smov 16  }
   0xd   :  { %s4766_s29 = sld [smem:[%s5807_s0 + %s4658_s26]]   ;;  %s4664_s26 = smov 12  }
   0xe   :  { %s4771_s3 = sld [smem:[%s5807_s0 + %s4659_s30]]   ;;  %s4669_s28 = smov 17  }
   0xf   :  { %s4776_s8 = sld [smem:[%s5807_s0 + %s4660_s4]]  }
  0x10   :  { %s4781_s14 = sld [smem:[%s5807_s0 + %s4661_s10]]  }
  0x11   :  { %s4786_s19 = sld [smem:[%s5807_s0 + %s4662_s15]]   ;;  %s4667_s15 = smov 15  }
  0x12   :  { %s4791_s24 = sld [smem:[%s5807_s0 + %s4663_s20]]  }
  0x13   :  { %5880 = sst [smem:[#allocation74_spill]] %s4766_s29 }
  0x14   :  { %5881 = sst [smem:[#allocation75_spill]] %s4771_s3 }
  0x15   :  { %5882 = sst [smem:[#allocation76_spill]] %s4776_s8 }
  0x16   :  { %5883 = sst [smem:[#allocation77_spill]] %s4781_s14 }
  0x17   :  { %5884 = sst [smem:[#allocation78_spill]] %s4786_s19 }
  0x18   :  { %5885 = sst [smem:[#allocation79_spill]] %s4791_s24 }
  0x19   :  { %s4796_s30 = sld [smem:[%s5807_s0 + %s4664_s26]]  }
  0x1a   :  { %s4801_s6 = sld [smem:[%s5807_s0 + %s4665_s1]]  }
  0x1b   :  { %s4806_s12 = sld [smem:[%s5807_s0 + %s4666_s7]]   ;;  %s4670_s7 = smov 18  }
  0x1c   :  { %s4811_s20 = sld [smem:[%s5807_s0 + %s4667_s15]]   ;;  %s4671_s15 = smov 19  }
  0x1d   :  { %s4816_s27 = sld [smem:[%s5807_s0 + %s4668_s22]]   ;;  %s4672_s22 = smov 20  }
  0x1e   :  { %s4821_s4 = sld [smem:[%s5807_s0 + %s4669_s28]]   ;;  %s4673_s28 = smov 21  }
  0x1f   :  { %5886 = sst [smem:[#allocation80_spill]] %s4796_s30 }
  0x20   :  { %5887 = sst [smem:[#allocation81_spill]] %s4801_s6 }
  0x21   :  { %5888 = sst [smem:[#allocation82_spill]] %s4806_s12 }
  0x22   :  { %5889 = sst [smem:[#allocation83_spill]] %s4811_s20 }
  0x23   :  { %5890 = sst [smem:[#allocation84_spill]] %s4816_s27 }
  0x24   :  { %5891 = sst [smem:[#allocation85_spill]] %s4821_s4 }
  0x25   :  { %s4826_s17 = sld [smem:[%s5807_s0 + %s4670_s7]]   ;;  %s4674_s7 = smov 22  }
  0x26   :  { %s4831_s13 = sld [smem:[%s5807_s0 + %s4671_s15]]   ;;  %s4675_s15 = smov 23  }
  0x27   :  { %s4836_s5 = sld [smem:[%s5807_s0 + %s4672_s22]]   ;;  %s4676_s22 = smov 24  }
  0x28   :  { %s4841_s27 = sld [smem:[%s5807_s0 + %s4673_s28]]   ;;  %s4677_s28 = smov 25  }
  0x29   :  { %s4851_s12 = sld [smem:[%s5807_s0 + %s4675_s15]]   ;;  %s4679_s15 = smov 27  }
  0x2a   :  { %s4861_s30 = sld [smem:[%s5807_s0 + %s4677_s28]]   ;;  %s4681_s28 = smov 29  }
  0x2b   :  { %5892 = sst [smem:[#allocation86_spill]] %s4826_s17 }
  0x2c   :  { %5893 = sst [smem:[#allocation87_spill]] %s4831_s13 }
  0x2d   :  { %5894 = sst [smem:[#allocation88_spill]] %s4836_s5 }
  0x2e   :  { %5895 = sst [smem:[#allocation89_spill]] %s4841_s27 }
  0x2f   :  { %s4846_s17 = sld [smem:[%s5807_s0 + %s4674_s7]]   ;;  %s4678_s7 = smov 26  }
  0x30   :  { %5897 = sst [smem:[#allocation91_spill]] %s4851_s12 }
  0x31   :  { %s4856_s5 = sld [smem:[%s5807_s0 + %s4676_s22]]   ;;  %s4680_s22 = smov 28  }
  0x32   :  { %5899 = sst [smem:[#allocation93_spill]] %s4861_s30 }
  0x33   :  { %s4871_s19 = sld [smem:[%s5807_s0 + %s4679_s15]]  }
  0x34   :  { %s4881_s30 = sld [smem:[%s5807_s0 + %s4681_s28]]  }
  0x35   :  { %5896 = sst [smem:[#allocation90_spill]] %s4846_s17 }
  0x36   :  { %s4866_s17 = sld [smem:[%s5807_s0 + %s4678_s7]]   ;;  %s4682_s7 = smov 30  }
  0x37   :  { %5898 = sst [smem:[#allocation92_spill]] %s4856_s5 }
  0x38   :  { %s4876_s5 = sld [smem:[%s5807_s0 + %s4680_s22]]  }
  0x39   :  { %5901 = sst [smem:[#allocation95_spill]] %s4871_s19 }
  0x3c   :  { %5900 = sst [smem:[#allocation94_spill]] %s4866_s17 }
  0x3d   :  { %s4886_s17 = sld [smem:[%s5807_s0 + %s4682_s7]]  }
  0x3e   :  { %5902 = sst [smem:[#allocation96_spill]] %s4876_s5 }
  0x43   :  { %5903 = sst [smem:[#allocation97_spill]] %s4886_s17 }
  0x44   :  { %67 = vsyncpa [#allocation3], 0 }
  0x45   :  { %69 = vsyncpa [#allocation3 + $0x1], 0 }
  0x46   :  { %70 = vsyncpa [#allocation6], 0 }
  0x47   :  { %72 = vsyncpa [#allocation6 + $0x1], 0 }
  0x48   :  { %73 = vsyncpa [#allocation9], 0 }
  0x49   :  { %75 = vsyncpa [#allocation9 + $0x1], 0 }
  0x4a   :  { %76 = vsyncpa [#allocation12], 0 }
  0x4b   :  { %77 = vsyncpa [#allocation15], 0 }
  0x4c   :  { %78 = vsyncpa [#allocation18], 0 }
  0x4d   :  { %79 = vsyncpa [#allocation21], 0 }
  0x4e   :  { %80 = vsyncpa [#allocation24], 0 }
  0x4f   :  { %81 = vsyncpa [#allocation27], 0 }
  0x50   :  { %82 = vsyncpa [#allocation30], 0 }
  0x51   :  { %83 = vsyncpa [#allocation33], 0 }
  0x52   :  { %84 = vsyncpa [#allocation36], 0 }
  0x53   :  { %85 = vsyncpa [#allocation39], 0 }
  0x54   :  { %86 = vsyncpa [#allocation42], 0 }
  0x55   :  { %87 = vsyncpa [#allocation4], 0 }
  0x56   :  { %89 = vsyncpa [#allocation4 + $0x1], 0 }
  0x57   :  { %90 = vsyncpa [#allocation45], 0 }
  0x58   :  { %92 = vsyncpa [#allocation45 + $0x1], 0 }
  0x59   :  { %93 = vsyncpa [#allocation48], 0 }
  0x5a   :  { %95 = vsyncpa [#allocation48 + $0x1], 0  ;;  %s4888_s0 = smov 0   ;;  %s4890_s15 = smov 0  }
  0x5b   :  { %s4892_s16 = smov 0   ;;  %s4894_s18 = smov 0  }
  0x5c LB: > { %s5904_s19 = sld [smem:[#allocation95_spill]]  ;;  %s5905_s8 = sld [smem:[#allocation76_spill]]  ;;  %s4623_s16 = sphi %s4892_s16, %s5994_s16   ;;  %s4619_s15 = sphi %s4890_s15, %s5993_s15   ;;  %s4615_s0 = sphi %s4888_s0, %s5992_s0   ;;  %s4627_s18 = sphi %s4894_s18, %s5995_s18  }
  0x5d   : > { %s5906_s29 = sld [smem:[#allocation74_spill]]  ;;  %s5907_s9 = sld [smem:[#allocation69_spill]] }
  0x5e   : > { %s5908_s27 = sld [smem:[#allocation89_spill]]  ;;  %s5909_s24 = sld [smem:[#allocation79_spill]] }
  0x5f   : > { %s5910_s20 = sld [smem:[#allocation83_spill]]  ;;  %s5911_s14 = sld [smem:[#allocation77_spill]] }
  0x60   : > { %s5912_s13 = sld [smem:[#allocation87_spill]]  ;;  %s5913_s12 = sld [smem:[#allocation91_spill]] }
  0x61   : > { %s5914_s6 = sld [smem:[#allocation81_spill]]  ;;  %s5915_s4 = sld [smem:[#allocation85_spill]] }
  0x62   : > { %s5916_s3 = sld [smem:[#allocation75_spill]]  ;;  %s5917_s25 = sld [smem:[#allocation73_spill]] }
  0x63   : > { %s5918_s21 = sld [smem:[#allocation72_spill]]  ;;  %s4683_s22 = smov [#allocation10]  }
  0x64   : > { %s814_s23 = sshll.u32 %s4683_s22, 4  ;;  %s4909_s26 = sadd.s32 4294967295, %s4627_s18   ;;  %s4914_s23 = int_to_ptr.vmem [resolvable:$true] %s814_s23 }
  0x65   : > { %p2948_p0 = scmp.ge.s32.totalorder %s4627_s18, 1  ;;  %p5822_p1 = scmp.eq.s32.totalorder %s4909_s26, 0 }
  0x66   : > { %p802_p2 = scmp.lt.s32.totalorder %s4627_s18, 3  ;;  %s4684_s1 = smov [#allocation11]  }
  0x67   : > { %s827_s2 = sshll.u32 %s4684_s1, 4  ;;  %s4685_s10 = smov [#allocation14]   ;;  %s4929_s2 = int_to_ptr.vmem [resolvable:$true] %s827_s2 }
  0x68   : > { %p4916_p3 = pnand %p2948_p0, %p802_p2  ;;  %s4931_s11 = sshll.u32 %s4685_s10, 4  ;;  %s854_s11 = int_to_ptr.vmem [resolvable:$true] %s4931_s11 }
  0x69   : > { %s3625_s22 = scalar_lea.hbm %s5918_s21, 1024 }
  0x6a   : > { %s5919_s28 = scalar_select %p4916_p3, 1, 0 }
  0x6b   : > { %p3309_p5 = pneg %p4916_p3  ;;  %p3626_p7 = scmp.ne.s32.totalorder %s5918_s21, %s3625_s22 }
  0x6c   : > { %p3632_p11 = scmp.lt.u32.totalorder %s3625_s22, %s5918_s21 }
  0x6d   : > { %p4925_p6 = pnand %p3309_p5, %p5822_p1 }
  0x6f   : > { %s5920_s7 = scalar_select %p4925_p6, 1, 0 }
  0x70   : > { %p4937_p8 = pneg %p4925_p6 }
  0x72   : > { %s5921_s17 = scalar_select %p4937_p8, 1, 0 }
  0x73   : > { %p3628_p9 = pnand %p4937_p8, %p3626_p7 }
  0x75   : > { %p3629_p10 = pneg %p3628_p9 }
  0x77   : > { %p3634_p12 = pnand %p3632_p11, %p3629_p10 }
  0x79   : > { %3637 = shalt.err (!%p3634_p12)
}
  0x7a   : > { %s3638_s1 = scalar_lea.vmem %s4914_s23, 1024  ;;  %p3646_p5 = scmp.lt.s32.totalorder %s4914_s23, %s4914_s23 }
  0x7b   : > { %p3639_p13 = scmp.ne.s32.totalorder %s4914_s23, %s3638_s1  ;;  %p3647_p4 = scmp.lt.s32.totalorder %s3638_s1, %s3638_s1 }
  0x7d   : > { %p3641_p0 = pnand %p3639_p13, %p4937_p8  ;;  %p3648_p1 = por %p3647_p4, %p3646_p5 }
  0x7f   : > { %p3642_p2 = pneg %p3641_p0 }
  0x81   : > { %p3649_p3 = pnand %p3648_p1, %p3642_p2 }
  0x83   : > { %3652 = shalt.err (!%p3649_p3)
}
  0x84   : > { %s5825_s10 = smov 64   ;;  %s5827_s22 = smov 4  }
  0x85   : > { %3312 = dma.hbm_to_vmem [thread:$0]  (!%p4925_p6), %s5918_s21, 1024, %s4914_s23, [#allocation9], %s5825_s10, %s5825_s10, %s5827_s22  }
  0x86   : > { %s3653_s5 = scalar_lea.hbm %s5917_s25, 64 }
  0x87   : > { %p3654_p7 = scmp.ne.s32.totalorder %s5917_s25, %s3653_s5  ;;  %p3660_p3 = scmp.lt.u32.totalorder %s3653_s5, %s5917_s25 }
  0x89   : > { %p3656_p4 = pnand %p3654_p7, %p4937_p8 }
  0x8b   : > { %p3657_p1 = pneg %p3656_p4 }
  0x8d   : > { %p3662_p9 = pnand %p3660_p3, %p3657_p1 }
  0x8f   : > { %3665 = shalt.err (!%p3662_p9)
}
  0x90   : > { %s3666_s1 = scalar_lea.vmem %s4929_s2, 64  ;;  %p3674_p13 = scmp.lt.s32.totalorder %s4929_s2, %s4929_s2 }
  0x91   : > { %p3667_p10 = scmp.ne.s32.totalorder %s4929_s2, %s3666_s1  ;;  %p3675_p0 = scmp.lt.s32.totalorder %s3666_s1, %s3666_s1 }
  0x93   : > { %p3669_p11 = pnand %p3667_p10, %p4937_p8  ;;  %p3676_p2 = por %p3675_p0, %p3674_p13 }
  0x95   : > { %p3670_p12 = pneg %p3669_p11 }
  0x97   : > { %p3677_p5 = pnand %p3676_p2, %p3670_p12 }
  0x99   : > { %3680 = shalt.err (!%p3677_p5)
}
  0x9a   : > { %s5831_s23 = smov 16   ;;  %s5833_s5 = smov 1  }
  0x9b   : > { %3315 = dma.hbm_to_vmem [thread:$0]  (!%p4925_p6), %s5917_s25, 64, %s4929_s2, [#allocation12], %s5831_s23, %s5831_s23, %s5833_s5  }
  0x9c   : > { %s3681_s1 = scalar_lea.hbm %s5916_s3, 64 }
  0x9d   : > { %p3682_p7 = scmp.ne.s32.totalorder %s5916_s3, %s3681_s1  ;;  %p3688_p3 = scmp.lt.u32.totalorder %s3681_s1, %s5916_s3 }
  0x9f   : > { %p3684_p4 = pnand %p3682_p7, %p4937_p8 }
  0xa1   : > { %p3685_p1 = pneg %p3684_p4 }
  0xa3   : > { %p3690_p9 = pnand %p3688_p3, %p3685_p1 }
  0xa5   : > { %3693 = shalt.err (!%p3690_p9)
}
  0xa6   : > { %s3694_s10 = scalar_lea.vmem %s854_s11, 64  ;;  %p3702_p13 = scmp.lt.s32.totalorder %s854_s11, %s854_s11 }
  0xa7   : > { %p3695_p10 = scmp.ne.s32.totalorder %s854_s11, %s3694_s10  ;;  %p3703_p0 = scmp.lt.s32.totalorder %s3694_s10, %s3694_s10 }
  0xa9   : > { %p3697_p11 = pnand %p3695_p10, %p4937_p8  ;;  %p3704_p2 = por %p3703_p0, %p3702_p13 }
  0xab   : > { %p3698_p12 = pneg %p3697_p11 }
  0xad   : > { %p3705_p5 = pnand %p3704_p2, %p3698_p12 }
  0xaf   : > { %3708 = shalt.err (!%p3705_p5)
}
  0xb0   : > { %3321 = dma.hbm_to_vmem [thread:$0]  (!%p4925_p6), %s5916_s3, 64, %s854_s11, [#allocation15], %s5831_s23, %s5831_s23, %s5833_s5  }
  0xb1   : > { %s4690_s2 = smov [#allocation17]   ;;  %s4691_s22 = smov [#allocation20]  }
  0xb2   : > { %s880_s1 = sshll.u32 %s4690_s2, 4  ;;  %s902_s21 = sshll.u32 %s4691_s22, 4  ;;  %s881_s1 = int_to_ptr.vmem [resolvable:$true] %s880_s1  ;;  %s903_s21 = int_to_ptr.vmem [resolvable:$true] %s902_s21 }
  0xb3   : > { %s3709_s10 = scalar_lea.hbm %s5911_s14, 16 }
  0xb4   : > { %p3710_p7 = scmp.ne.s32.totalorder %s5911_s14, %s3709_s10  ;;  %p3716_p3 = scmp.lt.u32.totalorder %s3709_s10, %s5911_s14 }
  0xb6   : > { %p3712_p4 = pnand %p3710_p7, %p4937_p8 }
  0xb8   : > { %p3713_p1 = pneg %p3712_p4 }
  0xba   : > { %p3718_p9 = pnand %p3716_p3, %p3713_p1 }
  0xbc   : > { %3721 = shalt.err (!%p3718_p9)
}
  0xbd   : > { %s3722_s25 = scalar_lea.vmem %s881_s1, 16  ;;  %s3729_s11 = scalar_lea.vmem %s881_s1, 32 }
  0xbe   : > { %p3723_p10 = scmp.ne.s32.totalorder %s881_s1, %s3722_s25  ;;  %p3730_p13 = scmp.lt.s32.totalorder %s881_s1, %s881_s1 }
  0xbf   : > { %p3731_p0 = scmp.lt.s32.totalorder %s3729_s11, %s3722_s25 }
  0xc0   : > { %p3725_p11 = pnand %p3723_p10, %p4937_p8 }
  0xc1   : > { %p3732_p2 = por %p3731_p0, %p3730_p13 }
  0xc2   : > { %p3726_p12 = pneg %p3725_p11 }
  0xc4   : > { %p3733_p5 = pnand %p3732_p2, %p3726_p12 }
  0xc6   : > { %3736 = shalt.err (!%p3733_p5)
}
  0xc7   : > { %3327 = dma.hbm_to_vmem [thread:$0]  (!%p4925_p6), %s5911_s14, 16, %s881_s1, [#allocation18]  }
  0xc8   : > { %s3737_s22 = scalar_lea.hbm %s5909_s24, 16 }
  0xc9   : > { %p3738_p7 = scmp.ne.s32.totalorder %s5909_s24, %s3737_s22  ;;  %p3744_p3 = scmp.lt.u32.totalorder %s3737_s22, %s5909_s24 }
  0xcb   : > { %p3740_p4 = pnand %p3738_p7, %p4937_p8 }
  0xcd   : > { %p3741_p1 = pneg %p3740_p4 }
  0xcf   : > { %p3746_p9 = pnand %p3744_p3, %p3741_p1 }
  0xd1   : > { %3749 = shalt.err (!%p3746_p9)
}
  0xd2   : > { %s3750_s25 = scalar_lea.vmem %s903_s21, 16  ;;  %s3757_s2 = scalar_lea.vmem %s903_s21, 32 }
  0xd3   : > { %p3751_p10 = scmp.ne.s32.totalorder %s903_s21, %s3750_s25  ;;  %p3758_p13 = scmp.lt.s32.totalorder %s903_s21, %s903_s21 }
  0xd4   : > { %p3759_p0 = scmp.lt.s32.totalorder %s3757_s2, %s3750_s25 }
  0xd5   : > { %p3753_p11 = pnand %p3751_p10, %p4937_p8 }
  0xd6   : > { %p3760_p2 = por %p3759_p0, %p3758_p13 }
  0xd7   : > { %p3754_p12 = pneg %p3753_p11 }
  0xd9   : > { %p3761_p5 = pnand %p3760_p2, %p3754_p12 }
  0xdb   : > { %3764 = shalt.err (!%p3761_p5)
}
  0xdc   : > { %3333 = dma.hbm_to_vmem [thread:$0]  (!%p4925_p6), %s5909_s24, 16, %s903_s21, [#allocation21]  }
  0xdd   : > { %s4692_s1 = smov [#allocation23]   ;;  %s4693_s11 = smov [#allocation26]  }
  0xde   : > { %s925_s10 = sshll.u32 %s4692_s1, 4  ;;  %s951_s22 = sshll.u32 %s4693_s11, 4  ;;  %s926_s10 = int_to_ptr.vmem [resolvable:$true] %s925_s10  ;;  %s952_s22 = int_to_ptr.vmem [resolvable:$true] %s951_s22 }
  0xdf   : > { %s3765_s23 = scalar_lea.hbm %s5914_s6, 64 }
  0xe0   : > { %p3766_p7 = scmp.ne.s32.totalorder %s5914_s6, %s3765_s23  ;;  %p3772_p3 = scmp.lt.u32.totalorder %s3765_s23, %s5914_s6 }
  0xe2   : > { %p3768_p4 = pnand %p3766_p7, %p4937_p8 }
  0xe4   : > { %p3769_p1 = pneg %p3768_p4 }
  0xe6   : > { %p3774_p9 = pnand %p3772_p3, %p3769_p1 }
  0xe8   : > { %3777 = shalt.err (!%p3774_p9)
}
  0xe9   : > { %s3778_s25 = scalar_lea.vmem %s926_s10, 64  ;;  %p3786_p13 = scmp.lt.s32.totalorder %s926_s10, %s926_s10 }
  0xea   : > { %p3779_p10 = scmp.ne.s32.totalorder %s926_s10, %s3778_s25  ;;  %p3787_p0 = scmp.lt.s32.totalorder %s3778_s25, %s3778_s25 }
  0xec   : > { %p3781_p11 = pnand %p3779_p10, %p4937_p8  ;;  %p3788_p2 = por %p3787_p0, %p3786_p13 }
  0xee   : > { %p3782_p12 = pneg %p3781_p11 }
  0xf0   : > { %p3789_p5 = pnand %p3788_p2, %p3782_p12 }
  0xf2   : > { %3792 = shalt.err (!%p3789_p5)
}
  0xf3   : > { %s5922_s21 = smov 16   ;;  %s3793_s23 = scalar_lea.hbm %s5910_s20, 64 }
  0xf4   : > { %3339 = dma.hbm_to_vmem [thread:$0]  (!%p4925_p6), %s5914_s6, 64, %s926_s10, [#allocation24], %s5922_s21, %s5922_s21, %s5833_s5  }
  0xf5   : > { %p3794_p7 = scmp.ne.s32.totalorder %s5910_s20, %s3793_s23  ;;  %p3800_p3 = scmp.lt.u32.totalorder %s3793_s23, %s5910_s20 }
  0xf7   : > { %p3796_p4 = pnand %p3794_p7, %p4937_p8 }
  0xf9   : > { %p3797_p1 = pneg %p3796_p4 }
  0xfb   : > { %p3802_p9 = pnand %p3800_p3, %p3797_p1 }
  0xfd   : > { %3805 = shalt.err (!%p3802_p9)
}
  0xfe   : > { %s3806_s2 = scalar_lea.vmem %s952_s22, 64  ;;  %p3814_p13 = scmp.lt.s32.totalorder %s952_s22, %s952_s22 }
  0xff   : > { %p3807_p10 = scmp.ne.s32.totalorder %s952_s22, %s3806_s2  ;;  %p3815_p0 = scmp.lt.s32.totalorder %s3806_s2, %s3806_s2 }
 0x101   : > { %p3809_p11 = pnand %p3807_p10, %p4937_p8  ;;  %p3816_p2 = por %p3815_p0, %p3814_p13 }
 0x103   : > { %p3810_p12 = pneg %p3809_p11 }
 0x105   : > { %p3817_p5 = pnand %p3816_p2, %p3810_p12 }
 0x107   : > { %3820 = shalt.err (!%p3817_p5)
}
 0x108   : > { %3345 = dma.hbm_to_vmem [thread:$0]  (!%p4925_p6), %s5910_s20, 64, %s952_s22, [#allocation27], %s5922_s21, %s5922_s21, %s5833_s5  }
 0x109   : > { %s4694_s1 = smov [#allocation29]   ;;  %s4695_s11 = smov [#allocation32]  }
 0x10a   : > { %s978_s10 = sshll.u32 %s4694_s1, 4  ;;  %s1000_s25 = sshll.u32 %s4695_s11, 4  ;;  %s979_s10 = int_to_ptr.vmem [resolvable:$true] %s978_s10  ;;  %s1001_s25 = int_to_ptr.vmem [resolvable:$true] %s1000_s25 }
 0x10b   : > { %s3821_s23 = scalar_lea.hbm %s5915_s4, 16 }
 0x10c   : > { %p3822_p7 = scmp.ne.s32.totalorder %s5915_s4, %s3821_s23  ;;  %p3828_p3 = scmp.lt.u32.totalorder %s3821_s23, %s5915_s4 }
 0x10e   : > { %p3824_p4 = pnand %p3822_p7, %p4937_p8 }
 0x110   : > { %p3825_p1 = pneg %p3824_p4 }
 0x112   : > { %p3830_p9 = pnand %p3828_p3, %p3825_p1 }
 0x114   : > { %3833 = shalt.err (!%p3830_p9)
}
 0x115   : > { %s3834_s2 = scalar_lea.vmem %s979_s10, 16  ;;  %s3841_s22 = scalar_lea.vmem %s979_s10, 32 }
 0x116   : > { %p3835_p10 = scmp.ne.s32.totalorder %s979_s10, %s3834_s2  ;;  %p3842_p13 = scmp.lt.s32.totalorder %s979_s10, %s979_s10 }
 0x117   : > { %p3843_p0 = scmp.lt.s32.totalorder %s3841_s22, %s3834_s2 }
 0x118   : > { %p3837_p11 = pnand %p3835_p10, %p4937_p8 }
 0x119   : > { %p3844_p2 = por %p3843_p0, %p3842_p13 }
 0x11a   : > { %p3838_p12 = pneg %p3837_p11 }
 0x11c   : > { %p3845_p5 = pnand %p3844_p2, %p3838_p12 }
 0x11e   : > { %3848 = shalt.err (!%p3845_p5)
}
 0x11f   : > { %3351 = dma.hbm_to_vmem [thread:$0]  (!%p4925_p6), %s5915_s4, 16, %s979_s10, [#allocation30]  }
 0x120   : > { %s3849_s1 = scalar_lea.hbm %s5912_s13, 16 }
 0x121   : > { %p3850_p7 = scmp.ne.s32.totalorder %s5912_s13, %s3849_s1  ;;  %p3856_p3 = scmp.lt.u32.totalorder %s3849_s1, %s5912_s13 }
 0x123   : > { %p3852_p4 = pnand %p3850_p7, %p4937_p8 }
 0x125   : > { %p3853_p1 = pneg %p3852_p4 }
 0x127   : > { %p3858_p9 = pnand %p3856_p3, %p3853_p1 }
 0x129   : > { %3861 = shalt.err (!%p3858_p9)
}
 0x12a   : > { %s3862_s11 = scalar_lea.vmem %s1001_s25, 16  ;;  %s3869_s23 = scalar_lea.vmem %s1001_s25, 32 }
 0x12b   : > { %p3863_p10 = scmp.ne.s32.totalorder %s1001_s25, %s3862_s11  ;;  %p3870_p13 = scmp.lt.s32.totalorder %s1001_s25, %s1001_s25 }
 0x12c   : > { %p3871_p0 = scmp.lt.s32.totalorder %s3869_s23, %s3862_s11 }
 0x12d   : > { %p3865_p11 = pnand %p3863_p10, %p4937_p8 }
 0x12e   : > { %p3872_p2 = por %p3871_p0, %p3870_p13 }
 0x12f   : > { %p3866_p12 = pneg %p3865_p11 }
 0x131   : > { %p3873_p5 = pnand %p3872_p2, %p3866_p12 }
 0x133   : > { %3876 = shalt.err (!%p3873_p5)
}
 0x134   : > { %3357 = dma.hbm_to_vmem [thread:$0]  (!%p4925_p6), %s5912_s13, 16, %s1001_s25, [#allocation33]  }
 0x135   : > { %s4696_s10 = smov [#allocation35]   ;;  %s4697_s22 = smov [#allocation38]  }
 0x136   : > { %s1023_s2 = sshll.u32 %s4696_s10, 4  ;;  %s1050_s1 = sshll.u32 %s4697_s22, 4  ;;  %s1024_s2 = int_to_ptr.vmem [resolvable:$true] %s1023_s2  ;;  %s1051_s1 = int_to_ptr.vmem [resolvable:$true] %s1050_s1 }
 0x137   : > { %s3877_s5 = scalar_lea.hbm %s5908_s27, 32 }
 0x138   : > { %p3878_p7 = scmp.ne.s32.totalorder %s5908_s27, %s3877_s5  ;;  %p3884_p3 = scmp.lt.u32.totalorder %s3877_s5, %s5908_s27 }
 0x13a   : > { %p3880_p4 = pnand %p3878_p7, %p4937_p8 }
 0x13c   : > { %p3881_p1 = pneg %p3880_p4 }
 0x13e   : > { %p3886_p9 = pnand %p3884_p3, %p3881_p1 }
 0x140   : > { %3889 = shalt.err (!%p3886_p9)
}
 0x141   : > { %s3890_s11 = scalar_lea.vmem %s1024_s2, 32  ;;  %p3898_p13 = scmp.lt.s32.totalorder %s1024_s2, %s1024_s2 }
 0x142   : > { %p3891_p10 = scmp.ne.s32.totalorder %s1024_s2, %s3890_s11  ;;  %p3899_p0 = scmp.lt.s32.totalorder %s3890_s11, %s3890_s11 }
 0x144   : > { %p3893_p11 = pnand %p3891_p10, %p4937_p8  ;;  %p3900_p2 = por %p3899_p0, %p3898_p13 }
 0x146   : > { %p3894_p12 = pneg %p3893_p11 }
 0x148   : > { %p3901_p5 = pnand %p3900_p2, %p3894_p12 }
 0x14a   : > { %3904 = shalt.err (!%p3901_p5)
}
 0x14b   : > { %s5923_s25 = smov 1   ;;  %s3905_s5 = scalar_lea.hbm %s5913_s12, 16 }
 0x14c   : > { %3363 = dma.hbm_to_vmem [thread:$0]  (!%p4925_p6), %s5908_s27, 32, %s1024_s2, [#allocation36], %s5922_s21, %s5922_s21, %s5923_s25  }
 0x14d   : > { %p3906_p7 = scmp.ne.s32.totalorder %s5913_s12, %s3905_s5  ;;  %p3912_p3 = scmp.lt.u32.totalorder %s3905_s5, %s5913_s12 }
 0x14f   : > { %p3908_p4 = pnand %p3906_p7, %p4937_p8 }
 0x151   : > { %p3909_p1 = pneg %p3908_p4 }
 0x153   : > { %p3914_p9 = pnand %p3912_p3, %p3909_p1 }
 0x155   : > { %3917 = shalt.err (!%p3914_p9)
}
 0x156   : > { %s3918_s23 = scalar_lea.vmem %s1051_s1, 16  ;;  %s3925_s10 = scalar_lea.vmem %s1051_s1, 32 }
 0x157   : > { %p3919_p10 = scmp.ne.s32.totalorder %s1051_s1, %s3918_s23  ;;  %p3926_p13 = scmp.lt.s32.totalorder %s1051_s1, %s1051_s1 }
 0x158   : > { %p3927_p0 = scmp.lt.s32.totalorder %s3925_s10, %s3918_s23 }
 0x159   : > { %p3921_p11 = pnand %p3919_p10, %p4937_p8 }
 0x15a   : > { %p3928_p2 = por %p3927_p0, %p3926_p13 }
 0x15b   : > { %p3922_p12 = pneg %p3921_p11 }
 0x15d   : > { %p3929_p5 = pnand %p3928_p2, %p3922_p12 }
 0x15f   : > { %3932 = shalt.err (!%p3929_p5)
}
 0x160   : > { %3369 = dma.hbm_to_vmem [thread:$0]  (!%p4925_p6), %s5913_s12, 16, %s1051_s1, [#allocation39]  }
 0x161   : > { %s5835_s21 = sadd.s32 4294967294, %s4627_s18   ;;  %s5080_s2 = sadd.s32 1, %s4627_s18  }
 0x162   : > { %s108_s22 = sadd.s32 1, %s4623_s16  ;;  %s105_s11 = ssub.s32 %s4627_s18, %s5080_s2 }
 0x163   : > { %p115_p7 = scmp.ne.s32.totalorder %s4623_s16, %s4619_s15  ;;  %p106_p4 = scmp.eq.s32.totalorder %s105_s11, 0 }
 0x164   : > { %p116_p1 = scmp.eq.s32.totalorder %s4627_s18, 0  ;;  %p121_p3 = scmp.ne.s32.totalorder %s4619_s15, %s4615_s0 }
 0x165   : > { %p685_p9 = scmp.eq.s32.totalorder %s4909_s26, 1  ;;  %p5924_p11 = scmp.eq.s32.totalorder %s4909_s26, 0 }
 0x166   : > { %s5092_s25 = scalar_select %p106_p4, %s4623_s16, %s108_s22  }
 0x167   : > { %p117_p10 = por %p116_p1, %p115_p7  ;;  %p5096_p12 = por %p5924_p11, %p121_p3 }
 0x168   : > { %p5100_p13 = por %p685_p9, %p115_p7  ;;  %p691_p0 = scmp.eq.s32.totalorder %s5835_s21, 1 }
 0x169   : > { %s5925_s1 = scalar_select %p5096_p12, 1, 0 }
 0x16a   : > { %s5926_s5 = scalar_select %p5100_p13, 1, 0 }
 0x16b   : > { %p3427_p2 = scmp.lt.s32.totalorder %s4627_s18, 2  ;;  %s5839_s23 = sand.u32 1, %s4623_s16  }
 0x16c   : > { %p5108_p5 = por %p691_p0, %p121_p3  ;;  %s5114_s22 = sshll.u32 %s5839_s23, 3 }
 0x16d   : > { %s5117_s11 = sshll.u32 %s4627_s18, 7  ;;  %p5119_p7 = pnand %p3427_p2, %p117_p10 }
 0x16e   : > { %s5927_s10 = scalar_select %p5108_p5, 1, 0 }
 0x16f   : > { %s5928_s3 = scalar_select %p5119_p7, 1, 0 }
 0x170   : > { %s5849_s21 = sand.u32 1, %s4627_s18   ;;  %s5126_s4 = scalar_lea.hbm %s5907_s9, %s5117_s11 }
 0x171   : > { %s1105_s6 = scalar_lea.vmem [#allocation5], %s5114_s22  ;;  %s5133_s23 = scalar_lea.sflag [#allocation6], %s5849_s21 }
 0x172   : > { %s1112_s12 = sshll.u32 %s1105_s6, 4  ;;  %s3933_s13 = scalar_lea.hbm %s5126_s4, 128  ;;  %s5129_s12 = int_to_ptr.vmem [resolvable:$true] %s1112_s12 }
 0x173   : > { %p3934_p4 = scmp.ne.s32.totalorder %s5126_s4, %s3933_s13  ;;  %p5139_p1 = pneg %p5119_p7 }
 0x174   : > { %s3938_s20 = scalar_lea.hbm %s5907_s9, 256  ;;  %p3939_p10 = scmp.lt.u32.totalorder %s5126_s4, %s5907_s9 }
 0x175   : > { %s5929_s14 = scalar_select %p5139_p1, 1, 0 }
 0x176   : > { %p3936_p3 = pnand %p5139_p1, %p3934_p4  ;;  %p3940_p11 = scmp.lt.u32.totalorder %s3938_s20, %s3933_s13 }
 0x177   : > { %p3942_p2 = scmp.lt.u32.totalorder %s3933_s13, %s5126_s4 }
 0x178   : > { %p3937_p9 = pneg %p3936_p3  ;;  %p3941_p0 = por %p3940_p11, %p3939_p10 }
 0x17a   : > { %p3943_p5 = por %p3942_p2, %p3941_p0 }
 0x17c   : > { %p3944_p13 = pnand %p3943_p5, %p3937_p9 }
 0x17e   : > { %3947 = shalt.err (!%p3944_p13)
}
 0x17f   : > { %s3948_s6 = scalar_lea.vmem %s5129_s12, 128  ;;  %s4698_s21 = smov [#allocation5]  }
 0x180   : > { %p3949_p12 = scmp.ne.s32.totalorder %s5129_s12, %s3948_s6  ;;  %s3953_s24 = sshll.u32 %s4698_s21, 4  ;;  %s3954_s24 = int_to_ptr.vmem [resolvable:$false] %s3953_s24 }
 0x181   : > { %s3955_s27 = scalar_lea.vmem %s3954_s24, 256  ;;  %p3956_p4 = scmp.lt.s32.totalorder %s5129_s12, %s3954_s24 }
 0x182   : > { %p3951_p6 = pnand %p3949_p12, %p5139_p1  ;;  %p3957_p3 = scmp.lt.s32.totalorder %s3955_s27, %s3948_s6 }
 0x184   : > { %p3952_p8 = pneg %p3951_p6  ;;  %p3958_p10 = por %p3957_p3, %p3956_p4 }
 0x186   : > { %p3959_p11 = pnand %p3958_p10, %p3952_p8 }
 0x188   : > { %3962 = shalt.err (!%p3959_p11)
}
 0x189   : > { %3382 = dma.hbm_to_vmem [thread:$0]  (!%p5119_p7), %s5126_s4, 128, %s5129_s12, %s5133_s23  }
 0x18a   : > { %s4699_s13 = smov [#allocation13]   ;;  %s4700_s21 = smov [#allocation16]  }
 0x18b   : > { %s840_s20 = sshll.u32 %s4699_s13, 4  ;;  %s866_s9 = sshll.u32 %s4700_s21, 4  ;;  %s841_s20 = int_to_ptr.vmem [resolvable:$true] %s840_s20  ;;  %s5159_s9 = int_to_ptr.vmem [resolvable:$true] %s866_s9 }
 0x18c   : > { %s3963_s24 = scalar_lea.hbm %s5906_s29, 1024  ;;  %p5930_p8 = scmp.ne.s32.totalorder %s5921_s17, 0 }
 0x18d   : > { %p3964_p6 = scmp.ne.s32.totalorder %s5906_s29, %s3963_s24  ;;  %p3970_p5 = scmp.lt.u32.totalorder %s3963_s24, %s5906_s29 }
 0x18f   : > { %p3966_p12 = pnand %p3964_p6, %p5930_p8 }
 0x191   : > { %p3967_p13 = pneg %p3966_p12 }
 0x193   : > { %p3972_p9 = pnand %p3970_p5, %p3967_p13 }
 0x195   : > { %3975 = shalt.err (!%p3972_p9)
}
 0x196   : > { %s3976_s27 = scalar_lea.vmem %s841_s20, 1024  ;;  %p3984_p3 = scmp.lt.s32.totalorder %s841_s20, %s841_s20 }
 0x197   : > { %p3977_p0 = scmp.ne.s32.totalorder %s841_s20, %s3976_s27  ;;  %p3985_p10 = scmp.lt.s32.totalorder %s3976_s27, %s3976_s27 }
 0x199   : > { %p3979_p2 = pnand %p3977_p0, %p5930_p8  ;;  %p3986_p11 = por %p3985_p10, %p3984_p3 }
 0x19b   : > { %p3980_p4 = pneg %p3979_p2 }
 0x19d   : > { %p3987_p7 = pnand %p3986_p11, %p3980_p4 }
 0x19f   : > { %3990 = shalt.err (!%p3987_p7)
}
 0x1a0   : > { %p5931_p1 = scmp.ne.s32.totalorder %s5920_s7, 0  ;;  %s5932_s12 = smov 4  }
 0x1a1   : > { %s5933_s4 = smov 64   ;;  %s3991_s6 = scalar_lea.hbm %s5905_s8, 256 }
 0x1a2   : > { %3318 = dma.hbm_to_vmem [thread:$0]  (!%p5931_p1), %s5906_s29, 1024, %s841_s20, [#allocation12], %s5933_s4, %s5933_s4, %s5932_s12  }
 0x1a3   : > { %p3992_p6 = scmp.ne.s32.totalorder %s5905_s8, %s3991_s6  ;;  %p3998_p5 = scmp.lt.u32.totalorder %s3991_s6, %s5905_s8 }
 0x1a5   : > { %p3994_p12 = pnand %p3992_p6, %p5930_p8 }
 0x1a7   : > { %p3995_p13 = pneg %p3994_p12 }
 0x1a9   : > { %p4000_p9 = pnand %p3998_p5, %p3995_p13 }
 0x1ab   : > { %4003 = shalt.err (!%p4000_p9)
}
 0x1ac   : > { %s4004_s13 = scalar_lea.vmem %s5159_s9, 256  ;;  %p4012_p4 = scmp.lt.s32.totalorder %s5159_s9, %s5159_s9 }
 0x1ad   : > { %p4005_p7 = scmp.ne.s32.totalorder %s5159_s9, %s4004_s13  ;;  %p4013_p3 = scmp.lt.s32.totalorder %s4004_s13, %s4004_s13 }
 0x1af   : > { %p4007_p0 = pnand %p4005_p7, %p5930_p8  ;;  %p4014_p10 = por %p4013_p3, %p4012_p4 }
 0x1b1   : > { %p4008_p2 = pneg %p4007_p0 }
 0x1b3   : > { %p4015_p11 = pnand %p4014_p10, %p4008_p2 }
 0x1b5   : > { %4018 = shalt.err (!%p4015_p11)
}
 0x1b6   : > { %s5934_s20 = sld [smem:[#allocation78_spill]]  ;;  %s4701_s21 = smov [#allocation19]  }
 0x1b7   : > { %3324 = dma.hbm_to_vmem [thread:$0]  (!%p5931_p1), %s5905_s8, 256, %s5159_s9, [#allocation15], %s5933_s4, %s5933_s4, %s5932_s12  }
 0x1b8   : > { %s891_s24 = sshll.u32 %s4701_s21, 4  ;;  %s4702_s27 = smov [#allocation22]   ;;  %s892_s24 = int_to_ptr.vmem [resolvable:$true] %s891_s24 }
 0x1b9   : > { %s912_s6 = sshll.u32 %s4702_s27, 4  ;;  %s5192_s6 = int_to_ptr.vmem [resolvable:$true] %s912_s6 }
 0x1bc   : > { %s4019_s13 = scalar_lea.hbm %s5934_s20, 16 }
 0x1bd   : > { %p4020_p6 = scmp.ne.s32.totalorder %s5934_s20, %s4019_s13  ;;  %p4026_p5 = scmp.lt.u32.totalorder %s4019_s13, %s5934_s20 }
 0x1bf   : > { %p4022_p12 = pnand %p4020_p6, %p5930_p8 }
 0x1c1   : > { %p4023_p13 = pneg %p4022_p12 }
 0x1c3   : > { %p4028_p9 = pnand %p4026_p5, %p4023_p13 }
 0x1c5   : > { %4031 = shalt.err (!%p4028_p9)
}
 0x1c6   : > { %s4032_s29 = scalar_lea.vmem %s892_s24, 16  ;;  %s4039_s9 = scalar_lea.vmem %s892_s24, 32 }
 0x1c7   : > { %p4033_p7 = scmp.ne.s32.totalorder %s892_s24, %s4032_s29  ;;  %p4040_p4 = scmp.lt.s32.totalorder %s892_s24, %s892_s24 }
 0x1c8   : > { %p4041_p3 = scmp.lt.s32.totalorder %s4039_s9, %s4032_s29 }
 0x1c9   : > { %p4035_p0 = pnand %p4033_p7, %p5930_p8 }
 0x1ca   : > { %p4042_p10 = por %p4041_p3, %p4040_p4 }
 0x1cb   : > { %p4036_p2 = pneg %p4035_p0 }
 0x1cd   : > { %p4043_p11 = pnand %p4042_p10, %p4036_p2 }
 0x1cf   : > { %4046 = shalt.err (!%p4043_p11)
}
 0x1d0   : > { %s5935_s21 = sld [smem:[#allocation80_spill]] }
 0x1d1   : > { %3330 = dma.hbm_to_vmem [thread:$0]  (!%p5931_p1), %s5934_s20, 16, %s892_s24, [#allocation18]  }
 0x1d6   : > { %s4047_s27 = scalar_lea.hbm %s5935_s21, 1024 }
 0x1d7   : > { %p4048_p6 = scmp.ne.s32.totalorder %s5935_s21, %s4047_s27  ;;  %p4054_p5 = scmp.lt.u32.totalorder %s4047_s27, %s5935_s21 }
 0x1d9   : > { %p4050_p12 = pnand %p4048_p6, %p5930_p8 }
 0x1db   : > { %p4051_p13 = pneg %p4050_p12 }
 0x1dd   : > { %p4056_p9 = pnand %p4054_p5, %p4051_p13 }
 0x1df   : > { %4059 = shalt.err (!%p4056_p9)
}
 0x1e0   : > { %s4060_s29 = scalar_lea.vmem %s5192_s6, 1024  ;;  %p4068_p4 = scmp.lt.s32.totalorder %s5192_s6, %s5192_s6 }
 0x1e1   : > { %p4061_p7 = scmp.ne.s32.totalorder %s5192_s6, %s4060_s29  ;;  %p4069_p3 = scmp.lt.s32.totalorder %s4060_s29, %s4060_s29 }
 0x1e3   : > { %p4063_p0 = pnand %p4061_p7, %p5930_p8  ;;  %p4070_p10 = por %p4069_p3, %p4068_p4 }
 0x1e5   : > { %p4064_p2 = pneg %p4063_p0 }
 0x1e7   : > { %p4071_p11 = pnand %p4070_p10, %p4064_p2 }
 0x1e9   : > { %4074 = shalt.err (!%p4071_p11)
}
 0x1ea   : > { %s5936_s24 = sld [smem:[#allocation82_spill]]  ;;  %s4703_s13 = smov [#allocation25]  }
 0x1eb   : > { %3336 = dma.hbm_to_vmem [thread:$0]  (!%p5931_p1), %s5935_s21, 1024, %s5192_s6, [#allocation21], %s5933_s4, %s5933_s4, %s5932_s12  }
 0x1ec   : > { %s938_s9 = sshll.u32 %s4703_s13, 4  ;;  %s4704_s27 = smov [#allocation28]   ;;  %s939_s9 = int_to_ptr.vmem [resolvable:$true] %s938_s9 }
 0x1ed   : > { %s964_s8 = sshll.u32 %s4704_s27, 4  ;;  %s5222_s8 = int_to_ptr.vmem [resolvable:$true] %s964_s8 }
 0x1f0   : > { %s4075_s29 = scalar_lea.hbm %s5936_s24, 1024 }
 0x1f1   : > { %p4076_p6 = scmp.ne.s32.totalorder %s5936_s24, %s4075_s29  ;;  %p4082_p5 = scmp.lt.u32.totalorder %s4075_s29, %s5936_s24 }
 0x1f3   : > { %p4078_p12 = pnand %p4076_p6, %p5930_p8 }
 0x1f5   : > { %p4079_p13 = pneg %p4078_p12 }
 0x1f7   : > { %p4084_p9 = pnand %p4082_p5, %p4079_p13 }
 0x1f9   : > { %4087 = shalt.err (!%p4084_p9)
}
 0x1fa   : > { %s4088_s20 = scalar_lea.vmem %s939_s9, 1024  ;;  %p4096_p4 = scmp.lt.s32.totalorder %s939_s9, %s939_s9 }
 0x1fb   : > { %p4089_p7 = scmp.ne.s32.totalorder %s939_s9, %s4088_s20  ;;  %p4097_p3 = scmp.lt.s32.totalorder %s4088_s20, %s4088_s20 }
 0x1fd   : > { %p4091_p0 = pnand %p4089_p7, %p5930_p8  ;;  %p4098_p10 = por %p4097_p3, %p4096_p4 }
 0x1ff   : > { %p4092_p2 = pneg %p4091_p0 }
 0x201   : > { %p4099_p11 = pnand %p4098_p10, %p4092_p2 }
 0x203   : > { %4102 = shalt.err (!%p4099_p11)
}
 0x204   : > { %s5937_s6 = sld [smem:[#allocation84_spill]] }
 0x205   : > { %3342 = dma.hbm_to_vmem [thread:$0]  (!%p5931_p1), %s5936_s24, 1024, %s939_s9, [#allocation24], %s5933_s4, %s5933_s4, %s5932_s12  }
 0x20a   : > { %s4103_s13 = scalar_lea.hbm %s5937_s6, 256 }
 0x20b   : > { %p4104_p6 = scmp.ne.s32.totalorder %s5937_s6, %s4103_s13  ;;  %p4110_p5 = scmp.lt.u32.totalorder %s4103_s13, %s5937_s6 }
 0x20d   : > { %p4106_p12 = pnand %p4104_p6, %p5930_p8 }
 0x20f   : > { %p4107_p13 = pneg %p4106_p12 }
 0x211   : > { %p4112_p9 = pnand %p4110_p5, %p4107_p13 }
 0x213   : > { %4115 = shalt.err (!%p4112_p9)
}
 0x214   : > { %s4116_s20 = scalar_lea.vmem %s5222_s8, 256  ;;  %p4124_p4 = scmp.lt.s32.totalorder %s5222_s8, %s5222_s8 }
 0x215   : > { %p4117_p7 = scmp.ne.s32.totalorder %s5222_s8, %s4116_s20  ;;  %p4125_p3 = scmp.lt.s32.totalorder %s4116_s20, %s4116_s20 }
 0x217   : > { %p4119_p0 = pnand %p4117_p7, %p5930_p8  ;;  %p4126_p10 = por %p4125_p3, %p4124_p4 }
 0x219   : > { %p4120_p2 = pneg %p4119_p0 }
 0x21b   : > { %p4127_p11 = pnand %p4126_p10, %p4120_p2 }
 0x21d   : > { %4130 = shalt.err (!%p4127_p11)
}
 0x21e   : > { %s5938_s9 = sld [smem:[#allocation86_spill]]  ;;  %s4705_s27 = smov [#allocation31]  }
 0x21f   : > { %3348 = dma.hbm_to_vmem [thread:$0]  (!%p5931_p1), %s5937_s6, 256, %s5222_s8, [#allocation27], %s5933_s4, %s5933_s4, %s5932_s12  }
 0x220   : > { %s989_s29 = sshll.u32 %s4705_s27, 4  ;;  %s4706_s13 = smov [#allocation34]   ;;  %s990_s29 = int_to_ptr.vmem [resolvable:$true] %s989_s29 }
 0x221   : > { %s1010_s21 = sshll.u32 %s4706_s13, 4  ;;  %s5255_s21 = int_to_ptr.vmem [resolvable:$true] %s1010_s21 }
 0x224   : > { %s4131_s20 = scalar_lea.hbm %s5938_s9, 16 }
 0x225   : > { %p4132_p6 = scmp.ne.s32.totalorder %s5938_s9, %s4131_s20  ;;  %p4138_p5 = scmp.lt.u32.totalorder %s4131_s20, %s5938_s9 }
 0x227   : > { %p4134_p12 = pnand %p4132_p6, %p5930_p8 }
 0x229   : > { %p4135_p13 = pneg %p4134_p12 }
 0x22b   : > { %p4140_p9 = pnand %p4138_p5, %p4135_p13 }
 0x22d   : > { %4143 = shalt.err (!%p4140_p9)
}
 0x22e   : > { %s4144_s24 = scalar_lea.vmem %s990_s29, 16  ;;  %s4151_s8 = scalar_lea.vmem %s990_s29, 32 }
 0x22f   : > { %p4145_p7 = scmp.ne.s32.totalorder %s990_s29, %s4144_s24  ;;  %p4152_p4 = scmp.lt.s32.totalorder %s990_s29, %s990_s29 }
 0x230   : > { %p4153_p3 = scmp.lt.s32.totalorder %s4151_s8, %s4144_s24 }
 0x231   : > { %p4147_p0 = pnand %p4145_p7, %p5930_p8 }
 0x232   : > { %p4154_p10 = por %p4153_p3, %p4152_p4 }
 0x233   : > { %p4148_p2 = pneg %p4147_p0 }
 0x235   : > { %p4155_p11 = pnand %p4154_p10, %p4148_p2 }
 0x237   : > { %4158 = shalt.err (!%p4155_p11)
}
 0x238   : > { %s5939_s27 = sld [smem:[#allocation88_spill]] }
 0x239   : > { %3354 = dma.hbm_to_vmem [thread:$0]  (!%p5931_p1), %s5938_s9, 16, %s990_s29, [#allocation30]  }
 0x23e   : > { %s4159_s13 = scalar_lea.hbm %s5939_s27, 512 }
 0x23f   : > { %p4160_p6 = scmp.ne.s32.totalorder %s5939_s27, %s4159_s13  ;;  %p4166_p5 = scmp.lt.u32.totalorder %s4159_s13, %s5939_s27 }
 0x241   : > { %p4162_p12 = pnand %p4160_p6, %p5930_p8 }
 0x243   : > { %p4163_p13 = pneg %p4162_p12 }
 0x245   : > { %p4168_p9 = pnand %p4166_p5, %p4163_p13 }
 0x247   : > { %4171 = shalt.err (!%p4168_p9)
}
 0x248   : > { %s4172_s24 = scalar_lea.vmem %s5255_s21, 512  ;;  %p4180_p4 = scmp.lt.s32.totalorder %s5255_s21, %s5255_s21 }
 0x249   : > { %p4173_p7 = scmp.ne.s32.totalorder %s5255_s21, %s4172_s24  ;;  %p4181_p3 = scmp.lt.s32.totalorder %s4172_s24, %s4172_s24 }
 0x24b   : > { %p4175_p0 = pnand %p4173_p7, %p5930_p8  ;;  %p4182_p10 = por %p4181_p3, %p4180_p4 }
 0x24d   : > { %p4176_p2 = pneg %p4175_p0 }
 0x24f   : > { %p4183_p11 = pnand %p4182_p10, %p4176_p2 }
 0x251   : > { %4186 = shalt.err (!%p4183_p11)
}
 0x252   : > { %s5940_s29 = sld [smem:[#allocation90_spill]]  ;;  %s4707_s20 = smov [#allocation37]  }
 0x253   : > { %3360 = dma.hbm_to_vmem [thread:$0]  (!%p5931_p1), %s5939_s27, 512, %s5255_s21, [#allocation33], %s5933_s4, %s5933_s4, %s5932_s12  }
 0x254   : > { %s1036_s8 = sshll.u32 %s4707_s20, 4  ;;  %s4708_s13 = smov [#allocation40]   ;;  %s1037_s8 = int_to_ptr.vmem [resolvable:$true] %s1036_s8 }
 0x255   : > { %s1061_s6 = sshll.u32 %s4708_s13, 4  ;;  %s5285_s6 = int_to_ptr.vmem [resolvable:$true] %s1061_s6 }
 0x258   : > { %s4187_s24 = scalar_lea.hbm %s5940_s29, 512 }
 0x259   : > { %p4188_p6 = scmp.ne.s32.totalorder %s5940_s29, %s4187_s24  ;;  %p4194_p5 = scmp.lt.u32.totalorder %s4187_s24, %s5940_s29 }
 0x25b   : > { %p4190_p12 = pnand %p4188_p6, %p5930_p8 }
 0x25d   : > { %p4191_p13 = pneg %p4190_p12 }
 0x25f   : > { %p4196_p9 = pnand %p4194_p5, %p4191_p13 }
 0x261   : > { %4199 = shalt.err (!%p4196_p9)
}
 0x262   : > { %s4200_s9 = scalar_lea.vmem %s1037_s8, 512  ;;  %p4208_p4 = scmp.lt.s32.totalorder %s1037_s8, %s1037_s8 }
 0x263   : > { %p4201_p7 = scmp.ne.s32.totalorder %s1037_s8, %s4200_s9  ;;  %p4209_p3 = scmp.lt.s32.totalorder %s4200_s9, %s4200_s9 }
 0x265   : > { %p4203_p0 = pnand %p4201_p7, %p5930_p8  ;;  %p4210_p10 = por %p4209_p3, %p4208_p4 }
 0x267   : > { %p4204_p2 = pneg %p4203_p0 }
 0x269   : > { %p4211_p11 = pnand %p4210_p10, %p4204_p2 }
 0x26b   : > { %4214 = shalt.err (!%p4211_p11)
}
 0x26c   : > { %s5941_s21 = sld [smem:[#allocation92_spill]] }
 0x26d   : > { %3366 = dma.hbm_to_vmem [thread:$0]  (!%p5931_p1), %s5940_s29, 512, %s1037_s8, [#allocation36], %s5933_s4, %s5933_s4, %s5932_s12  }
 0x272   : > { %s4215_s20 = scalar_lea.hbm %s5941_s21, 16 }
 0x273   : > { %p4216_p6 = scmp.ne.s32.totalorder %s5941_s21, %s4215_s20  ;;  %p4222_p5 = scmp.lt.u32.totalorder %s4215_s20, %s5941_s21 }
 0x275   : > { %p4218_p12 = pnand %p4216_p6, %p5930_p8 }
 0x277   : > { %p4219_p13 = pneg %p4218_p12 }
 0x279   : > { %p4224_p9 = pnand %p4222_p5, %p4219_p13 }
 0x27b   : > { %4227 = shalt.err (!%p4224_p9)
}
 0x27c   : > { %s4228_s9 = scalar_lea.vmem %s5285_s6, 16  ;;  %s4235_s13 = scalar_lea.vmem %s5285_s6, 32 }
 0x27d   : > { %p4229_p7 = scmp.ne.s32.totalorder %s5285_s6, %s4228_s9  ;;  %p4236_p4 = scmp.lt.s32.totalorder %s5285_s6, %s5285_s6 }
 0x27e   : > { %p4237_p3 = scmp.lt.s32.totalorder %s4235_s13, %s4228_s9 }
 0x27f   : > { %p4231_p0 = pnand %p4229_p7, %p5930_p8 }
 0x280   : > { %p4238_p10 = por %p4237_p3, %p4236_p4 }
 0x281   : > { %p4232_p2 = pneg %p4231_p0 }
 0x283   : > { %p4239_p11 = pnand %p4238_p10, %p4232_p2 }
 0x285   : > { %4242 = shalt.err (!%p4239_p11)
}
 0x286   : > { %s5942_s12 = sld [smem:[#allocation68_spill]]  ;;  %s5943_s4 = sld [smem:[#allocation93_spill]] }
 0x287   : > { %3372 = dma.hbm_to_vmem [thread:$0]  (!%p5931_p1), %s5941_s21, 16, %s5285_s6, [#allocation39]  }
 0x288   : > { %s4709_s8 = smov [#allocation41]  }
 0x289   : > { %s1072_s24 = sshll.u32 %s4709_s8, 4  ;;  %s1073_s24 = int_to_ptr.vmem [resolvable:$true] %s1072_s24 }
 0x28c   : > { %s5318_s20 = scalar_lea.hbm %s5942_s12, %s5117_s11  ;;  %s4243_s9 = scalar_lea.hbm %s5943_s4, 16 }
 0x28d   : > { %p4244_p6 = scmp.ne.s32.totalorder %s5943_s4, %s4243_s9  ;;  %p4250_p5 = scmp.lt.u32.totalorder %s4243_s9, %s5943_s4 }
 0x28f   : > { %p4246_p12 = pnand %p4244_p6, %p5930_p8 }
 0x291   : > { %p4247_p13 = pneg %p4246_p12 }
 0x293   : > { %p4252_p9 = pnand %p4250_p5, %p4247_p13 }
 0x295   : > { %4255 = shalt.err (!%p4252_p9)
}
 0x296   : > { %s4256_s13 = scalar_lea.vmem %s1073_s24, 16  ;;  %s4263_s6 = scalar_lea.vmem %s1073_s24, 32 }
 0x297   : > { %p4257_p7 = scmp.ne.s32.totalorder %s1073_s24, %s4256_s13  ;;  %p4264_p4 = scmp.lt.s32.totalorder %s1073_s24, %s1073_s24 }
 0x298   : > { %p4265_p3 = scmp.lt.s32.totalorder %s4263_s6, %s4256_s13 }
 0x299   : > { %p4259_p0 = pnand %p4257_p7, %p5930_p8 }
 0x29a   : > { %p4266_p10 = por %p4265_p3, %p4264_p4 }
 0x29b   : > { %p4260_p2 = pneg %p4259_p0 }
 0x29d   : > { %p4267_p11 = pnand %p4266_p10, %p4260_p2 }
 0x29f   : > { %4270 = shalt.err (!%p4267_p11)
}
 0x2a0   : > { %s5944_s8 = sld [smem:[#allocation70_spill]]  ;;  %s1087_s17 = scalar_lea.vmem [#allocation2], %s5114_s22 }
 0x2a1   : > { %3375 = dma.hbm_to_vmem [thread:$0]  (!%p5931_p1), %s5943_s4, 16, %s1073_s24, [#allocation42]  }
 0x2a2   : > { %s1094_s9 = sshll.u32 %s1087_s17, 4  ;;  %s5945_s7 = sand.u32 1, %s4623_s16   ;;  %s5331_s9 = int_to_ptr.vmem [resolvable:$true] %s1094_s9 }
 0x2a3   : > { %s1084_s6 = scalar_lea.sflag [#allocation3], %s5945_s7  ;;  %s4271_s21 = scalar_lea.hbm %s5318_s20, 128 }
 0x2a4   : > { %p4272_p8 = scmp.ne.s32.totalorder %s5318_s20, %s4271_s21  ;;  %p5946_p6 = scmp.ne.s32.totalorder %s5929_s14, 0 }
 0x2a5   : > { %s4276_s27 = scalar_lea.hbm %s5942_s12, 256  ;;  %p4277_p5 = scmp.lt.u32.totalorder %s5318_s20, %s5942_s12 }
 0x2a6   : > { %s5335_s13 = scalar_lea.hbm %s5944_s8, %s5117_s11  ;;  %p4274_p12 = pnand %p4272_p8, %p5946_p6 }
 0x2a7   : > { %p4278_p9 = scmp.lt.u32.totalorder %s4276_s27, %s4271_s21  ;;  %p4280_p0 = scmp.lt.u32.totalorder %s4271_s21, %s5318_s20 }
 0x2a8   : > { %p4275_p13 = pneg %p4274_p12 }
 0x2a9   : > { %p4279_p7 = por %p4278_p9, %p4277_p5 }
 0x2ab   : > { %p4281_p2 = por %p4280_p0, %p4279_p7 }
 0x2ad   : > { %p4282_p1 = pnand %p4281_p2, %p4275_p13 }
 0x2af   : > { %4285 = shalt.err (!%p4282_p1)
}
 0x2b0   : > { %s4286_s24 = scalar_lea.vmem %s5331_s9, 128  ;;  %s4710_s17 = smov [#allocation2]  }
 0x2b1   : > { %p4287_p4 = scmp.ne.s32.totalorder %s5331_s9, %s4286_s24  ;;  %s4291_s7 = sshll.u32 %s4710_s17, 4  ;;  %s4292_s7 = int_to_ptr.vmem [resolvable:$false] %s4291_s7 }
 0x2b2   : > { %s4293_s4 = scalar_lea.vmem %s4292_s7, 256  ;;  %p4294_p11 = scmp.lt.s32.totalorder %s5331_s9, %s4292_s7 }
 0x2b3   : > { %p4289_p3 = pnand %p4287_p4, %p5946_p6  ;;  %p4295_p8 = scmp.lt.s32.totalorder %s4293_s4, %s4286_s24 }
 0x2b5   : > { %p4290_p10 = pneg %p4289_p3  ;;  %p4296_p12 = por %p4295_p8, %p4294_p11 }
 0x2b7   : > { %p4297_p5 = pnand %p4296_p12, %p4290_p10 }
 0x2b9   : > { %4300 = shalt.err (!%p4297_p5)
}
 0x2ba   : > { %p5947_p13 = scmp.ne.s32.totalorder %s5928_s3, 0  ;;  %s5948_s27 = sld [smem:[#allocation71_spill]] }
 0x2bb   : > { %s1123_s21 = scalar_lea.vmem [#allocation7], %s5114_s22  ;;  %s4301_s17 = scalar_lea.hbm %s5335_s13, 128 }
 0x2bc   : > { %3379 = dma.hbm_to_vmem [thread:$0]  (!%p5947_p13), %s5318_s20, 128, %s5331_s9, %s1084_s6  }
 0x2bd   : > { %s1130_s4 = sshll.u32 %s1123_s21, 4  ;;  %p4302_p9 = scmp.ne.s32.totalorder %s5335_s13, %s4301_s17  ;;  %s1131_s4 = int_to_ptr.vmem [resolvable:$true] %s1130_s4 }
 0x2be   : > { %s4306_s7 = scalar_lea.hbm %s5944_s8, 256  ;;  %p4307_p2 = scmp.lt.u32.totalorder %s5335_s13, %s5944_s8 }
 0x2bf   : > { %p4304_p7 = pnand %p4302_p9, %p5946_p6  ;;  %p4308_p1 = scmp.lt.u32.totalorder %s4306_s7, %s4301_s17 }
 0x2c0   : > { %s5359_s24 = scalar_lea.hbm %s5948_s27, %s5117_s11  ;;  %p4310_p3 = scmp.lt.u32.totalorder %s4301_s17, %s5335_s13 }
 0x2c1   : > { %p4305_p0 = pneg %p4304_p7  ;;  %p4309_p4 = por %p4308_p1, %p4307_p2 }
 0x2c3   : > { %p4311_p10 = por %p4310_p3, %p4309_p4 }
 0x2c5   : > { %p4312_p11 = pnand %p4311_p10, %p4305_p0 }
 0x2c7   : > { %4315 = shalt.err (!%p4312_p11)
}
 0x2c8   : > { %s4316_s12 = scalar_lea.vmem %s1131_s4, 128  ;;  %s4711_s11 = smov [#allocation7]  }
 0x2c9   : > { %p4317_p8 = scmp.ne.s32.totalorder %s1131_s4, %s4316_s12  ;;  %s4321_s20 = sshll.u32 %s4711_s11, 4  ;;  %s4322_s20 = int_to_ptr.vmem [resolvable:$false] %s4321_s20 }
 0x2ca   : > { %s4323_s9 = scalar_lea.vmem %s4322_s20, 256  ;;  %p4324_p9 = scmp.lt.s32.totalorder %s1131_s4, %s4322_s20 }
 0x2cb   : > { %p4319_p12 = pnand %p4317_p8, %p5946_p6  ;;  %p4325_p7 = scmp.lt.s32.totalorder %s4323_s9, %s4316_s12 }
 0x2cd   : > { %p4320_p5 = pneg %p4319_p12  ;;  %p4326_p13 = por %p4325_p7, %p4324_p9 }
 0x2cf   : > { %p4327_p1 = pnand %p4326_p13, %p4320_p5 }
 0x2d1   : > { %4330 = shalt.err (!%p4327_p1)
}
 0x2d2   : > { %p5949_p2 = scmp.ne.s32.totalorder %s5928_s3, 0  ;;  %s1141_s6 = scalar_lea.vmem [#allocation8], %s5114_s22 }
 0x2d3   : > { %s1148_s21 = sshll.u32 %s1141_s6, 4  ;;  %s5950_s12 = sand.u32 1, %s4627_s18   ;;  %s1149_s21 = int_to_ptr.vmem [resolvable:$true] %s1148_s21 }
 0x2d4   : > { %3385 = dma.hbm_to_vmem [thread:$0]  (!%p5949_p2), %s5335_s13, 128, %s1131_s4, %s5133_s23  }
 0x2d5   : > { %s1138_s17 = scalar_lea.sflag [#allocation9], %s5950_s12  ;;  %s4331_s7 = scalar_lea.hbm %s5359_s24, 128 }
 0x2d6   : > { %p4332_p13 = scmp.ne.s32.totalorder %s5359_s24, %s4331_s7  ;;  %s4336_s11 = scalar_lea.hbm %s5948_s27, 256 }
 0x2d7   : > { %p4337_p3 = scmp.lt.u32.totalorder %s5359_s24, %s5948_s27  ;;  %p4338_p10 = scmp.lt.u32.totalorder %s4336_s11, %s4331_s7 }
 0x2d8   : > { %p4334_p0 = pnand %p4332_p13, %p5946_p6  ;;  %p4340_p8 = scmp.lt.u32.totalorder %s4331_s7, %s5359_s24 }
 0x2d9   : > { %p4339_p11 = por %p4338_p10, %p4337_p3 }
 0x2da   : > { %p4335_p4 = pneg %p4334_p0 }
 0x2db   : > { %p4341_p12 = por %p4340_p8, %p4339_p11 }
 0x2dd   : > { %p4342_p5 = pnand %p4341_p12, %p4335_p4 }
 0x2df   : > { %4345 = shalt.err (!%p4342_p5)
}
 0x2e0   : > { %s4346_s20 = scalar_lea.vmem %s1149_s21, 128  ;;  %s4712_s23 = smov [#allocation8]  }
 0x2e1   : > { %p4347_p9 = scmp.ne.s32.totalorder %s1149_s21, %s4346_s20  ;;  %s4351_s22 = sshll.u32 %s4712_s23, 4  ;;  %s4352_s22 = int_to_ptr.vmem [resolvable:$false] %s4351_s22 }
 0x2e2   : > { %s4353_s13 = scalar_lea.vmem %s4352_s22, 256  ;;  %p4354_p13 = scmp.lt.s32.totalorder %s1149_s21, %s4352_s22 }
 0x2e3   : > { %p4349_p7 = pnand %p4347_p9, %p5946_p6  ;;  %p4355_p0 = scmp.lt.s32.totalorder %s4353_s13, %s4346_s20 }
 0x2e5   : > { %p4350_p1 = pneg %p4349_p7  ;;  %p4356_p2 = por %p4355_p0, %p4354_p13 }
 0x2e7   : > { %p4357_p3 = pnand %p4356_p2, %p4350_p1 }
 0x2e9   : > { %4360 = shalt.err (!%p4357_p3)
}
 0x2ea   : > { %p5951_p10 = scmp.ne.s32.totalorder %s5928_s3, 0  ;;  %p5952_p4 = scmp.ne.s32.totalorder %s5919_s28, 0 }
 0x2eb   : > { %s5394_s14 = sand.u32 (!%p5952_p4), 1, %s4619_s15   ;;  %p5953_p6 = scmp.ne.s32.totalorder (!%p5952_p4), %s5925_s1, 0 }
 0x2ec   : > { %3388 = dma.hbm_to_vmem [thread:$0]  (!%p5951_p10), %s5359_s24, 128, %s1149_s21, %s1138_s17  }
 0x2ed   : > { %1157 = sbr.rel (%p5952_p4) target bundleno = 4622 (0x120e), region = 124  ;;  %s5397_s4 = sshll.u32 (!%p5952_p4), %s5394_s14, 3 }
 0x2ee   : > { %s1160_s9 = scalar_lea.sflag (!%p5952_p4), [#allocation3], %s5394_s14  ;;  %s1163_s6 = scalar_lea.vmem (!%p5952_p4), [#allocation2], %s5397_s4 }
 0x2f4   : > { %4542 = dma.done.wait (%p5953_p6), %s1160_s9, 128  }
 0x2f5   : > { %4544 = vsyncadd (%p5953_p6), %s1160_s9, 4294967168  ;;  %s5406_s3 = sand.u32 1, %s4909_s26   ;;  %s1172_s24 = scalar_lea.vmem [#allocation5], %s5397_s4 }
 0x2f6   : > { %s1169_s28 = scalar_lea.sflag [#allocation6], %s5406_s3 }
 0x2f7   : > { %4546 = dma.done.wait (%p5953_p6), %s1169_s28, 256  }
 0x2f8   : > { %4548 = vsyncadd (%p5953_p6), %s1169_s28, 4294967040  ;;  %s1181_s21 = scalar_lea.vmem [#allocation7], %s5397_s4  ;;  %s1187_s12 = scalar_lea.sflag [#allocation9], %s5406_s3 }
 0x2f9   : > { %s1190_s17 = scalar_lea.vmem [#allocation8], %s5397_s4 }
 0x2fa   : > { %4550 = dma.done.wait (%p5953_p6), %s1187_s12, 128  }
 0x2fb   : > { %4552 = vsyncadd (%p5953_p6), %s1187_s12, 4294967168  ;;  %p5954_p2 = scmp.eq.s32.totalorder %s4909_s26, 0 }
 0x2fd   : > { %4554 = dma.done.wait (%p5954_p2), [#allocation9], 1024   ;;  %p5955_p11 = pmov %p5954_p2 }
 0x2fe   : > { %p5956_p8 = pmov %p5954_p2 }
 0x2ff   : > { %4556 = vsyncadd (%p5955_p11), [#allocation9], 4294966272 }
 0x300   : > { %4558 = dma.done.wait (%p5956_p8), [#allocation12], 1088   ;;  %p5957_p12 = pmov %p5954_p2 }
 0x301   : > { %p5958_p5 = pmov %p5954_p2 }
 0x302   : > { %4560 = vsyncadd (%p5957_p12), [#allocation12], 4294966208 }
 0x303   : > { %4562 = dma.done.wait (%p5958_p5), [#allocation15], 320   ;;  %p5959_p9 = pmov %p5954_p2 }
 0x304   : > { %p5960_p7 = pmov %p5954_p2 }
 0x305   : > { %4564 = vsyncadd (%p5959_p9), [#allocation15], 4294966976 }
 0x306   : > { %4566 = dma.done.wait (%p5960_p7), [#allocation18], 32   ;;  %p5961_p1 = pmov %p5954_p2 }
 0x308   : > { %4568 = vsyncadd (%p5961_p1), [#allocation18], 4294967264  ;;  %p5962_p13 = pmov %p5961_p1 }
 0x309   : > { %p5963_p0 = pmov %p5961_p1 }
 0x30a   : > { %4570 = dma.done.wait (%p5962_p13), [#allocation21], 1040  }
 0x30b   : > { %4572 = vsyncadd (%p5963_p0), [#allocation21], 4294966256  ;;  %p5964_p3 = pmov %p5963_p0 }
 0x30c   : > { %p5965_p10 = pmov %p5963_p0 }
 0x30d   : > { %4574 = dma.done.wait (%p5964_p3), [#allocation24], 1088  }
 0x30e   : > { %4576 = vsyncadd (%p5965_p10), [#allocation24], 4294966208  ;;  %p5966_p4 = pmov %p5963_p0 }
 0x30f   : > { %p5967_p6 = pmov %p5963_p0 }
 0x310   : > { %4578 = dma.done.wait (%p5966_p4), [#allocation27], 320  }
 0x311   : > { %4580 = vsyncadd (%p5967_p6), [#allocation27], 4294966976  ;;  %p5968_p2 = pmov %p5963_p0 }
 0x312   : > { %p5969_p11 = pmov %p5963_p0 }
 0x313   : > { %4582 = dma.done.wait (%p5968_p2), [#allocation30], 32  }
 0x314   : > { %4584 = vsyncadd (%p5969_p11), [#allocation30], 4294967264  ;;  %p5970_p8 = pmov %p5963_p0 }
 0x315   : > { %p5971_p12 = pmov %p5963_p0 }
 0x316   : > { %4586 = dma.done.wait (%p5970_p8), [#allocation33], 528  }
 0x317   : > { %4588 = vsyncadd (%p5971_p12), [#allocation33], 4294966768  ;;  %p5972_p5 = pmov %p5963_p0 }
 0x318   : > { %p5973_p9 = pmov %p5963_p0 }
 0x319   : > { %4590 = dma.done.wait (%p5972_p5), [#allocation36], 544  }
 0x31a   : > { %4592 = vsyncadd (%p5973_p9), [#allocation36], 4294966752  ;;  %p5974_p7 = pmov %p5963_p0 }
 0x31b   : > { %p5975_p1 = pmov %p5963_p0 }
 0x31c   : > { %4594 = dma.done.wait (%p5974_p7), [#allocation39], 32  }
 0x31d   : > { %4596 = vsyncadd (%p5975_p1), [#allocation39], 4294967264  ;;  %p5976_p13 = pmov %p5963_p0 }
 0x31f   : > { %4598 = dma.done.wait (%p5976_p13), [#allocation42], 16  }
 0x320   : > { %4600 = vsyncadd (%p5963_p0), [#allocation42], 4294967280  ;;  %s5470_s1 = sshll.u32 %s5394_s14, 5  ;;  %v5474_v0 = vld [vmem:[%s1163_s6] sm:$0xff]  ;;  %v5478_v1 = vld [vmem:[%s1172_s24] sm:$0xff]  ;;  %v5495_v5 = vmov 0.0  }
 0x321   : > { %v5482_v2 = vld [vmem:[%s1181_s21] sm:$0xff]  ;;  %v5486_v3 = vpack.c.bf16 %v5474_v0, %v5474_v0  ;;  %v1394_v4 = vpack.c.bf16 %v5478_v1, %v5478_v1  ;;  %s1368_s11 = scalar_lea.vmem [#allocation44], %s5470_s1  ;;  %s5869_s20 = scalar_lea.vmem [#allocation46], %s5470_s1 }
 0x322   : > { %s1382_s23 = scalar_lea.vmem [#allocation47], %s5470_s1  ;;  %s5868_s22 = scalar_lea.vmem [#allocation49], %s5470_s1 }
 0x323   : > { %s5497_s13 = smov 0  }
 0x324 LB: >> { %v4713_v6 = vmov 0.0   ;;  %s3079_s9 = sshll.u32 %s4635_s13, 4  ;;  %vm4714_vm0 = vmmov 0   ;;  %vm1430_vm1 = vcmask 261120   ;;  %s3023_s24 = sshll.u32 %s4635_s13, 3  ;;  %vm1543_vm2 = vcmask 64512   ;;  %s4635_s13 = sphi %s5497_s13, %s1401_s13   ;;  %v4631_v5 = vphi %v5495_v5, %v5977_v5  }
 0x325   : >> { %3127 = vmatprep.subr.bf16.mxu1 %v4713_v6  ;;  %3119 = vmatprep.subr.bf16.mxu0 %v4713_v6  ;;  %s1476_s6 = scalar_lea.vmem [#allocation13], %s3079_s9  ;;  %s1405_s28 = scalar_lea.vmem [#allocation10], %s3079_s9  ;;  %vm1617_vm3 = vcmask 1043456  }
 0x326   : >> { %3131 = vmatprep.mubr.msk.bf16.mxu1 %vm4714_vm0, %v4713_v6  ;;  %3123 = vmatprep.mubr.msk.bf16.mxu0 %vm4714_vm0, %v4713_v6  ;;  %v3597_v7 = vld [vmem:[%s1476_s6] sm:$0xff]   ;;  %v3599_v9 = vld [vmem:[%s1476_s6 + $0x8] sm:$0xff]   ;;  %s1481_s21 = scalar_lea.vmem [#allocation14], %s4635_s13  ;;  %s1410_s12 = scalar_lea.vmem [#allocation11], %s4635_s13 }
 0x327   : >> { %v3598_v8 = vld [vmem:[%s1405_s28] sm:$0xff]   ;;  %3128 = vmatpush3.bf16.msra.mxu1 %v3597_v7  ;;  %v3600_v10 = vld [vmem:[%s1405_s28 + $0x8] sm:$0xff]   ;;  %s1542_s9 = scalar_lea.vmem %s1368_s11, %s3023_s24 [#allocation44]  ;;  %s3026_s6 = sshll.u32 %s4635_s13, 2 }
 0x328   : >> { %3129 = vmatprep.subr.bf16.mxu1 %v4713_v6  ;;  %3120 = vmatpush3.bf16.msra.mxu0 %v3598_v8  ;;  %v3019_v11 = vld [vmem:[%s1481_s21] ss:$0 sm:$0xff]  ;;  %s4715_s28 = smov 120   ;;  %s1663_s21 = scalar_lea.vmem [#allocation16], %s3026_s6 }
 0x329   : >> { %3121 = vmatprep.subr.bf16.mxu0 %v4713_v6  ;;  %v3014_v12 = vld [vmem:[%s1410_s12] ss:$0 sm:$0xff]  ;;  %s1549_s12 = scalar_lea.vmem %s5869_s20, %s3023_s24 [#allocation46]  ;;  %s1401_s13 = sadd.s32 1, %s4635_s13  }
 0x32a   : >> { %v1664_v26 = vld [vmem:[%s1663_s21] sm:$0xf]  ;;  %p1398_p3 = scmp.ge.s32.totalorder %s1401_s13, 4  }
 0x32b   : >> { %3130 = vmatpush3.bf16.msra.mxu1 %v3599_v9  ;;  %v1669_v28 = vsel %vm1617_vm3, %v1664_v26, 0  ;;  %v3028_v57 = vld [vmem:[#allocation17] ss:$0 sm:$0xff] (%p1398_p3)  ;;  %s5557_s13 = smov (%p1398_p3), 0  }
 0x32c   : >> { %3122 = vmatpush3.bf16.msra.mxu0 %v3600_v10  ;;  %3141 = vmatprep.subr.bf16.mxu1 %v4713_v6  ;;  %v5549_v7 = vld [vmem:[%s1190_s17] sm:$0xff] (%p1398_p3) }
 0x32d   : >> { %3135 = vmatprep.subr.bf16.mxu0 %v4713_v6  ;;  %v3029_v10 = vld [vmem:[#allocation19] ss:$0 sm:$0xff] (%p1398_p3) }
 0x32e   : >> { %3132 = vmatmul.mubr.msk.bf16.vlgmr.msra.gmra.mrb[0].mxu1 %vm1430_vm1, %v5486_v3 }
 0x32f   : >> { %3124 = vmatmul.mubr.msk.bf16.vlgmr.msra.gmra.mrb[0].mxu0 %vm1430_vm1, %v5486_v3  ;;  %3143 = vmatprep.mubr.msk.bf16.mxu1 %vm4714_vm0, %v4713_v6 }
 0x330   : >> { %3137 = vmatprep.mubr.msk.bf16.mxu0 %vm4714_vm0, %v4713_v6 }
 0x401   : >> { %v1535_v13 = vpop.f32.mrb[0].mxu1 }
 0x402   : >> { %v1536_v14 = vadd.f32 %v3019_v11, %v1535_v13  ;;  %v3133_v15 = vpop.f32.mrb[1].mxu1  ;;  %v1468_v16 = vpop.f32.mrb[0].mxu0  ;;  %v3030_v11 = vld [vmem:[#allocation20] ss:$0 sm:$0xff] (%p1398_p3) }
 0x403   : >> { %v1538_v17 = vpop.f32.mrb[2].mxu1  ;;  %v1469_v18 = vadd.f32 %v3014_v12, %v1468_v16  ;;  %v3125_v19 = vpop.f32.mrb[1].mxu0  ;;  %v5555_v15 = vmov (%p1398_p3), 0.0  }
 0x404   : >> { %1544 = vst.msk [vmem:[%s1542_s9] sm:$0xff] %vm1543_vm2, %v1536_v14  ;;  %v3134_v20 = vpop.f32.mrb[3].mxu1  ;;  %v1552_v21 = vpack.c.bf16 %v1536_v14, %v1536_v14  ;;  %v1471_v22 = vpop.f32.mrb[2].mxu0 }
 0x405   : >> { %v3126_v23 = vpop.f32.mrb[3].mxu0  ;;  %v1474_v24 = vmul.f32 0.35355338, %v1469_v18 }
 0x406   : >> { %1612 = vrot.lane.b32.xlu1 %v1552_v21, %s4715_s28  ;;  %v1557_v25 = vsel %vm1543_vm2, %v1552_v21, 0 }
 0x407   : >> { %3136 = vmatpush3.bf16.xpose.msra.mxu0 %v1557_v25  ;;  %v1551_v27 = vpack.c.bf16 %v1474_v24, %v1474_v24 }
 0x408   : >> { %3147 = vmatprep.subr.bf16.mxu0 %v4713_v6 }
 0x40a   : >> { %1546 = vrot.lane.b32.xlu1 %v1536_v14, %s4715_s28 }
 0x40e   : >> { %3138 = vmatmul.mubr.msk.bf16.vlgmr.msra.gmra.mrb[4].mxu0 %vm1543_vm2, %v1551_v27 }
 0x40f   : >> { %3148 = vmatpush3.bf16.msra.mxu0 %v1669_v28  ;;  %3149 = vmatprep.mubr.msk.bf16.mxu0 %vm4714_vm0, %v4713_v6 }
 0x478   : >> { %v1613_v29 = vpop.permute.xlu1 %1612 }
 0x479   : >> { %v1619_v30 = vsel %vm1617_vm3, %v1613_v29, 0 }
 0x47a   : >> { %3142 = vmatpush3.bf16.msra.mxu1 %v1619_v30 }
 0x47c   : >> { %v1547_v31 = vpop.permute.xlu1 %1546 }
 0x47d   : >> { %1550 = vst.msk [vmem:[%s1549_s12] sm:$0xff] %vm1543_vm2, %v1547_v31 }
 0x4e1   : >> { %v1593_v32 = vpop.f32.mrb[4].mxu0 }
 0x4e2   : >> { %v1594_v33 = vadd.f32 %v1593_v32, %v5482_v2  ;;  %v3139_v34 = vpop.f32.mrb[5].mxu0 }
 0x4e3   : >> { %v1596_v35 = vpop.f32.mrb[6].mxu0 }
 0x4e4   : >> { %v3140_v36 = vpop.f32.mrb[7].mxu0  ;;  %v1599_v37 = vsel %vm1543_vm2, %v1594_v33, -inf }
 0x4e5   : >> { %1600 = vmax.xlane.f32.xlu0 %v1599_v37 }
 0x572   : >> { %v1601_v38 = vpop.xlane.xlu0 %1600 }
 0x573   : >> { %v1602_v39 = vsub.f32 %v1594_v33, %v1601_v38 }
 0x575   : >> { %v1603_v40 = vmul.f32 1.442695, %v1602_v39 }
 0x577   : >> { %3601 = vpow2.f32 %v1603_v40 }
 0x581   : >> { %v3602_v41 = vpop.eup %3601 }
 0x582   : >> { %v1605_v42 = vsel %vm1543_vm2, %v3602_v41, 0.0 }
 0x583   : >> { %1606 = vadd.xlane.f32.xlu0 %v1605_v42 }
 0x610   : >> { %v1607_v43 = vpop.xlane.xlu0 %1606 }
 0x611   : >> { %3603 = vrcp.f32 %v1607_v43 }
 0x61b   : >> { %v3604_v44 = vpop.eup %3603 }
 0x61c   : >> { %v1609_v45 = vmul.f32 %v3604_v44, %v3602_v41 }
 0x61e   : >> { %v1610_v46 = vpack.c.bf16 %v1609_v45, %v1609_v45 }
 0x620   : >> { %3144 = vmatmul.mubr.msk.bf16.vlgmr.msra.gmra.mrb[4].mxu1 %vm1543_vm2, %v1610_v46 }
 0x6f3   : >> { %v1655_v47 = vpop.f32.mrb[4].mxu1 }
 0x6f4   : >> { %v1661_v48 = vpack.c.bf16 %v1655_v47, %v1655_v47  ;;  %v3145_v49 = vpop.f32.mrb[5].mxu1 }
 0x6f5   : >> { %v1658_v50 = vpop.f32.mrb[6].mxu1 }
 0x6f6   : >> { %v3146_v51 = vpop.f32.mrb[7].mxu1  ;;  %3150 = vmatmul.mubr.msk.bf16.vlgmr.msra.gmra.mrb[8].mxu0 %vm1543_vm2, %v1661_v48 }
 0x7c6   : > { %1400 = sbr.rel (!%p1398_p3) target bundleno = 804 (0x324), region = 426 }
 0x7c9   : >> { %v1705_v52 = vpop.f32.mrb[8].mxu0 }
 0x7ca   : >> { %v1711_v53 = vadd.f32 %v4631_v5, %v1705_v52   ;;  %v3151_v54 = vpop.f32.mrb[9].mxu0 }
 0x7cb   : >> { %v1708_v55 = vpop.f32.mrb[10].mxu0 }
 0x7cc   : >> { %v3152_v56 = vpop.f32.mrb[11].mxu0  ;;  %v5977_v5 = vmov %v1711_v53  ;;  %v1719_v58 = vadd.f32 (%p1398_p3), %v3028_v57, %v1711_v53 }
 0x7ce   : > { %v1720_v59 = vadd.f32 %v1719_v58, %v5474_v0 }
 0x7d0   : > { %v1722_v60 = vsel %vm1430_vm1, %v1720_v59, 0.0 }
 0x7d1   : > { %1723 = vadd.xlane.f32.xlu0 %v1722_v60 }
 0x85e   : > { %v1724_v61 = vpop.xlane.xlu0 %1723 }
 0x85f   : > { %v1726_v62 = vmul.f32 0.03125, %v1724_v61 }
 0x861   : > { %v1727_v63 = vsub.f32 %v1720_v59, %v1726_v62 }
 0x863   : > { %v1728_v5 = vmul.f32 %v1727_v63, %v1727_v63 }
 0x865   : > { %v1729_v6 = vsel %vm1430_vm1, %v1728_v5, 0.0 }
 0x866   : > { %1730 = vadd.xlane.f32.xlu0 %v1729_v6 }
 0x8f3   : > { %v1731_v8 = vpop.xlane.xlu0 %1730 }
 0x8f4   : > { %v1732_v9 = vmul.f32 0.03125, %v1731_v8 }
 0x8f6   : > { %v1733_v2 = vadd.f32 1e-05, %v1732_v9 }
 0x8f8   : > { %3605 = vrsqrt.f32 %v1733_v2 }
 0x902   : > { %v3606_v3 = vpop.eup %3605 }
 0x903   : > { %v1735_v0 = vmul.f32 %v3606_v3, %v1727_v63 }
 0x905   : > { %v1743_v12 = vmul.f32 %v3029_v10, %v1735_v0 }
 0x907   : > { %v5551_v13 = vadd.f32 %v3030_v11, %v1743_v12 }
 0x909   : > { %v1752_v14 = vpack.c.bf16 %v5551_v13, %v5551_v13 }
 0x90a LB: >> { %v4716_v16 = vmov 0.0   ;;  %s3081_s17 = sshll.u32 %s4643_s13, 4  ;;  %vm4717_vm4 = vmmov 0   ;;  %s3042_s6 = sshll.u32 %s4643_s13, 3  ;;  %s4643_s13 = sphi %s5557_s13, %s1759_s13   ;;  %v4639_v15 = vphi %v5555_v15, %v5978_v15  }
 0x90b   : >> { %3161 = vmatprep.subr.bf16.mxu1 %v4716_v16  ;;  %3153 = vmatprep.subr.bf16.mxu0 %v4716_v16  ;;  %s1833_s24 = scalar_lea.vmem [#allocation25], %s3081_s17  ;;  %s1763_s9 = scalar_lea.vmem [#allocation22], %s3081_s17 }
 0x90c   : >> { %3165 = vmatprep.mubr.msk.bf16.mxu1 %vm4717_vm4, %v4716_v16  ;;  %3157 = vmatprep.mubr.msk.bf16.mxu0 %vm4717_vm4, %v4716_v16  ;;  %v3607_v17 = vld [vmem:[%s1833_s24] sm:$0xff]   ;;  %v3609_v19 = vld [vmem:[%s1833_s24 + $0x8] sm:$0xff]   ;;  %s1838_s28 = scalar_lea.vmem [#allocation26], %s4643_s13  ;;  %s1768_s21 = scalar_lea.vmem [#allocation23], %s4643_s13 }
 0x90d   : >> { %v3608_v18 = vld [vmem:[%s1763_s9] sm:$0xff]   ;;  %3162 = vmatpush3.bf16.msra.mxu1 %v3607_v17  ;;  %v3610_v20 = vld [vmem:[%s1763_s9 + $0x8] sm:$0xff]   ;;  %s1902_s12 = scalar_lea.vmem %s1382_s23, %s3042_s6 [#allocation47]  ;;  %s4718_s17 = smov 120  }
 0x90e   : >> { %3163 = vmatprep.subr.bf16.mxu1 %v4716_v16  ;;  %3154 = vmatpush3.bf16.msra.mxu0 %v3608_v18  ;;  %v3038_v21 = vld [vmem:[%s1838_s28] ss:$0 sm:$0xff]  ;;  %s1909_s24 = scalar_lea.vmem %s5868_s22, %s3042_s6 [#allocation49]  ;;  %s3045_s9 = sshll.u32 %s4643_s13, 2 }
 0x90f   : >> { %3155 = vmatprep.subr.bf16.mxu0 %v4716_v16  ;;  %v3033_v22 = vld [vmem:[%s1768_s21] ss:$0 sm:$0xff]  ;;  %s2023_s6 = scalar_lea.vmem [#allocation28], %s3045_s9  ;;  %s1759_s13 = sadd.s32 1, %s4643_s13  }
 0x910   : >> { %v2024_v51 = vld [vmem:[%s2023_s6] sm:$0xf]  ;;  %p1756_p10 = scmp.ge.s32.totalorder %s1759_s13, 4  }
 0x911   : >> { %3164 = vmatpush3.bf16.msra.mxu1 %v3609_v19  ;;  %v2029_v52 = vsel %vm1617_vm3, %v2024_v51, 0  ;;  %v3047_v9 = vld [vmem:[#allocation29] ss:$0 sm:$0xff] (%p1756_p10)  ;;  %s5611_s13 = smov (%p1756_p10), 0  }
 0x912   : >> { %3156 = vmatpush3.bf16.msra.mxu0 %v3610_v20  ;;  %3175 = vmatprep.subr.bf16.mxu1 %v4716_v16 }
 0x913   : >> { %3169 = vmatprep.subr.bf16.mxu0 %v4716_v16 }
 0x914   : >> { %3166 = vmatmul.mubr.msk.bf16.vlgmr.msra.gmra.mrb[0].mxu1 %vm1430_vm1, %v1394_v4  ;;  %v3049_v4 = vld [vmem:[#allocation32] ss:$0 sm:$0xff] (%p1756_p10) }
 0x915   : >> { %3158 = vmatmul.mubr.msk.bf16.vlgmr.msra.gmra.mrb[0].mxu0 %vm1430_vm1, %v1752_v14  ;;  %3177 = vmatprep.mubr.msk.bf16.mxu1 %vm4717_vm4, %v4716_v16 }
 0x916   : >> { %3171 = vmatprep.mubr.msk.bf16.mxu0 %vm4717_vm4, %v4716_v16 }
 0x9e7   : >> { %v1895_v23 = vpop.f32.mrb[0].mxu1 }
 0x9e8   : >> { %v1896_v24 = vadd.f32 %v3038_v21, %v1895_v23  ;;  %v3167_v25 = vpop.f32.mrb[1].mxu1  ;;  %v1825_v26 = vpop.f32.mrb[0].mxu0  ;;  %v3048_v21 = vld [vmem:[#allocation31] ss:$0 sm:$0xff] (%p1756_p10) }
 0x9e9   : >> { %v1898_v27 = vpop.f32.mrb[2].mxu1  ;;  %v1826_v28 = vadd.f32 %v3033_v22, %v1825_v26  ;;  %v3159_v29 = vpop.f32.mrb[1].mxu0  ;;  %v4645_v22 = vmov (%p1756_p10), 0.0  }
 0x9ea   : >> { %v3168_v30 = vpop.f32.mrb[3].mxu1  ;;  %v1912_v31 = vpack.c.bf16 %v1896_v24, %v1896_v24  ;;  %v1828_v32 = vpop.f32.mrb[2].mxu0  ;;  %1904 = vst.msk [vmem:[%s1902_s12] sm:$0xff] %vm1543_vm2, %v1896_v24 }
 0x9eb   : >> { %v3160_v33 = vpop.f32.mrb[3].mxu0  ;;  %v1831_v34 = vmul.f32 0.35355338, %v1826_v28 }
 0x9ec   : >> { %1972 = vrot.lane.b32.xlu1 %v1912_v31, %s4718_s17  ;;  %v1917_v35 = vsel %vm1543_vm2, %v1912_v31, 0 }
 0x9ed   : >> { %3170 = vmatpush3.bf16.xpose.msra.mxu0 %v1917_v35  ;;  %v1911_v36 = vpack.c.bf16 %v1831_v34, %v1831_v34 }
 0x9ee   : >> { %3181 = vmatprep.subr.bf16.mxu0 %v4716_v16 }
 0x9f0   : >> { %1906 = vrot.lane.b32.xlu1 %v1896_v24, %s4718_s17 }
 0x9f4   : >> { %3172 = vmatmul.mubr.msk.bf16.vlgmr.msra.gmra.mrb[4].mxu0 %vm1543_vm2, %v1911_v36 }
 0x9f5   : >> { %3183 = vmatprep.mubr.msk.bf16.mxu0 %vm4717_vm4, %v4716_v16  ;;  %3182 = vmatpush3.bf16.msra.mxu0 %v2029_v52 }
 0xa5e   : >> { %v1973_v37 = vpop.permute.xlu1 %1972 }
 0xa5f   : >> { %v1979_v38 = vsel %vm1617_vm3, %v1973_v37, 0 }
 0xa60   : >> { %3176 = vmatpush3.bf16.msra.mxu1 %v1979_v38 }
 0xa62   : >> { %v1907_v39 = vpop.permute.xlu1 %1906 }
 0xa63   : >> { %1910 = vst.msk [vmem:[%s1909_s24] sm:$0xff] %vm1543_vm2, %v1907_v39 }
 0xac7   : >> { %v1953_v40 = vpop.f32.mrb[4].mxu0 }
 0xac8   : >> { %v1954_v41 = vadd.f32 %v1953_v40, %v5549_v7  ;;  %v3173_v42 = vpop.f32.mrb[5].mxu0 }
 0xac9   : >> { %v1956_v43 = vpop.f32.mrb[6].mxu0 }
 0xaca   : >> { %v3174_v44 = vpop.f32.mrb[7].mxu0  ;;  %v1959_v45 = vsel %vm1543_vm2, %v1954_v41, -inf }
 0xacb   : >> { %1960 = vmax.xlane.f32.xlu0 %v1959_v45 }
 0xb58   : >> { %v1961_v46 = vpop.xlane.xlu0 %1960 }
 0xb59   : >> { %v1962_v47 = vsub.f32 %v1954_v41, %v1961_v46 }
 0xb5b   : >> { %v1963_v48 = vmul.f32 1.442695, %v1962_v47 }
 0xb5d   : >> { %3611 = vpow2.f32 %v1963_v48 }
 0xb67   : >> { %v3612_v49 = vpop.eup %3611 }
 0xb68   : >> { %v1965_v50 = vsel %vm1543_vm2, %v3612_v49, 0.0 }
 0xb69   : >> { %1966 = vadd.xlane.f32.xlu0 %v1965_v50 }
 0xbf6   : >> { %v1967_v53 = vpop.xlane.xlu0 %1966 }
 0xbf7   : >> { %3613 = vrcp.f32 %v1967_v53 }
 0xc01   : >> { %v3614_v54 = vpop.eup %3613 }
 0xc02   : >> { %v1969_v55 = vmul.f32 %v3614_v54, %v3612_v49 }
 0xc04   : >> { %v1970_v56 = vpack.c.bf16 %v1969_v55, %v1969_v55 }
 0xc06   : >> { %3178 = vmatmul.mubr.msk.bf16.vlgmr.msra.gmra.mrb[4].mxu1 %vm1543_vm2, %v1970_v56 }
 0xcd9   : >> { %v2015_v57 = vpop.f32.mrb[4].mxu1 }
 0xcda   : >> { %v2021_v58 = vpack.c.bf16 %v2015_v57, %v2015_v57  ;;  %v3179_v59 = vpop.f32.mrb[5].mxu1 }
 0xcdb   : >> { %v2018_v60 = vpop.f32.mrb[6].mxu1 }
 0xcdc   : >> { %v3180_v61 = vpop.f32.mrb[7].mxu1  ;;  %3184 = vmatmul.mubr.msk.bf16.vlgmr.msra.gmra.mrb[8].mxu0 %vm1543_vm2, %v2021_v58 }
 0xdac   : > { %1758 = sbr.rel (!%p1756_p10) target bundleno = 2314 (0x90a), region = 437 }
 0xdaf   : >> { %v2065_v62 = vpop.f32.mrb[8].mxu0 }
 0xdb0   : >> { %v2071_v63 = vadd.f32 %v4639_v15, %v2065_v62   ;;  %v3185_v5 = vpop.f32.mrb[9].mxu0 }
 0xdb1   : >> { %v2068_v6 = vpop.f32.mrb[10].mxu0 }
 0xdb2   : >> { %v3186_v8 = vpop.f32.mrb[11].mxu0  ;;  %v5978_v15 = vmov %v2071_v63  ;;  %v2079_v2 = vadd.f32 (%p1756_p10), %v3047_v9, %v2071_v63 }
 0xdb4   : > { %v2080_v3 = vadd.f32 %v2079_v2, %v5551_v13 }
 0xdb6   : > { %v2081_v10 = vsel %vm1430_vm1, %v2080_v3, 0.0 }
 0xdb7   : > { %2082 = vadd.xlane.f32.xlu0 %v2081_v10 }
 0xe44   : > { %v2083_v0 = vpop.xlane.xlu0 %2082 }
 0xe45   : > { %v2084_v11 = vmul.f32 0.03125, %v2083_v0 }
 0xe47   : > { %v2085_v12 = vsub.f32 %v2080_v3, %v2084_v11 }
 0xe49   : > { %v2086_v15 = vmul.f32 %v2085_v12, %v2085_v12 }
 0xe4b   : > { %v2087_v16 = vsel %vm1430_vm1, %v2086_v15, 0.0 }
 0xe4c   : > { %2088 = vadd.xlane.f32.xlu0 %v2087_v16 }
 0xed9   : > { %v2089_v17 = vpop.xlane.xlu0 %2088 }
 0xeda   : > { %v2090_v18 = vmul.f32 0.03125, %v2089_v17 }
 0xedc   : > { %v2091_v19 = vadd.f32 1e-05, %v2090_v18 }
 0xede   : > { %3615 = vrsqrt.f32 %v2091_v19 }
 0xee8   : > { %v3616_v20 = vpop.eup %3615 }
 0xee9   : > { %v2093_v1 = vmul.f32 %v3616_v20, %v2085_v12 }
 0xeeb   : > { %v2101_v7 = vmul.f32 %v3048_v21, %v2093_v1 }
 0xeed   : > { %v2109_v13 = vadd.f32 %v3049_v4, %v2101_v7 }
 0xeef   : > { %v2110_v14 = vpack.c.bf16 %v2109_v13, %v2109_v13 }
 0xef0 LB: >> { %v4719_v23 = vmov 0.0   ;;  %vm4720_vm5 = vmmov 0   ;;  %s3083_s28 = sshll.u32 %s4651_s13, 4  ;;  %s2125_s17 = scalar_lea.vmem [#allocation35], %s4651_s13  ;;  %s4651_s13 = sphi %s5611_s13, %s2116_s13   ;;  %v4647_v22 = vphi %v4645_v22, %v4646_v22  }
 0xef1   : >> { %3187 = vmatprep.subr.bf16.mxu0 %v4719_v23  ;;  %3191 = vmatprep.mubr.msk.bf16.mxu0 %vm4720_vm5, %v4719_v23  ;;  %s2120_s21 = scalar_lea.vmem [#allocation34], %s3083_s28  ;;  %s2199_s12 = scalar_lea.vmem [#allocation37], %s3083_s28  ;;  %v3052_v28 = vld [vmem:[%s2125_s17] ss:$0 sm:$0xff] }
 0xef2   : >> { %3195 = vmatprep.subr.bf16.mxu1 %v4719_v23  ;;  %3199 = vmatprep.mubr.msk.bf16.mxu1 %vm4720_vm5, %v4719_v23  ;;  %v3617_v24 = vld [vmem:[%s2120_s21] sm:$0xff]   ;;  %v3618_v25 = vld [vmem:[%s2120_s21 + $0x8] sm:$0xff]   ;;  %s2116_s13 = sadd.s32 1, %s4651_s13  }
 0xef3   : >> { %3188 = vmatpush3.bf16.msra.mxu0 %v3617_v24  ;;  %v3619_v26 = vld [vmem:[%s2199_s12] sm:$0xff]   ;;  %v3620_v27 = vld [vmem:[%s2199_s12 + $0x8] sm:$0xff]   ;;  %p2113_p4 = scmp.ge.s32.totalorder %s2116_s13, 2  }
 0xef4   : >> { %3189 = vmatprep.subr.bf16.mxu0 %v4719_v23  ;;  %3196 = vmatpush3.bf16.msra.mxu1 %v3619_v26  ;;  %v3060_v49 = vld [vmem:[#allocation38] ss:$0 sm:$0xff] (%p2113_p4)  ;;  %s5630_s24 = sshll.u32 (%p2113_p4), %s4909_s26, 9  ;;  %s2346_s6 = sshll.u32 (%p2113_p4), %s1368_s11, 4  ;;  %s5638_s6 = int_to_ptr.vmem [resolvable:$true] %s2346_s6 }
 0xef5   : >> { %3197 = vmatprep.subr.bf16.mxu1 %v4719_v23  ;;  %s5634_s9 = scalar_lea.hbm (%p2113_p4), %s5904_s19, %s5630_s24  ;;  %s5871_s13 = scalar_lea.sflag (%p2113_p4), [#allocation45], %s5406_s3 }
 0xef6   : > { %s4361_s28 = scalar_lea.vmem (%p2113_p4), %s5638_s6, 512  ;;  %p5979_p2 = scmp.ne.s32.totalorder (%p2113_p4), %s5926_s5, 0 }
 0xef7   : >> { %3190 = vmatpush3.bf16.msra.mxu0 %v3618_v25  ;;  %p4362_p6 = scmp.ne.s32.totalorder (%p2113_p4), %s5638_s6, %s4361_s28  ;;  %s4721_s21 = smov (%p2113_p4), [#allocation44]  }
 0xef8   : >> { %3198 = vmatpush3.bf16.msra.mxu1 %v3620_v27  ;;  %s4365_s12 = sshll.u32 (%p2113_p4), %s4721_s21, 4  ;;  %s4366_s12 = int_to_ptr.vmem [resolvable:$false] %s4365_s12 }
 0xef9   : > { %p4363_p11 = pnand (%p2113_p4), %p4362_p6, %p5979_p2  ;;  %s4367_s17 = scalar_lea.vmem (%p2113_p4), %s4366_s12, 1024 }
 0xefa   : >> { %3192 = vmatmul.mubr.msk.bf16.vlgmr.msra.gmra.mrb[0].mxu0 %vm1430_vm1, %v2110_v14  ;;  %p4368_p12 = scmp.lt.s32.totalorder (%p2113_p4), %s5638_s6, %s4366_s12  ;;  %p4369_p5 = scmp.lt.s32.totalorder (%p2113_p4), %s4367_s17, %s4361_s28 }
 0xefb   : > { %p4364_p8 = pneg (%p2113_p4), %p4363_p11 }
 0xefc   : > { %p4370_p9 = por (%p2113_p4), %p4369_p5, %p4368_p12 }
 0xefe   : > { %p4371_p7 = pnand (%p2113_p4), %p4370_p9, %p4364_p8 }
 0xfcd   : >> { %v2182_v29 = vpop.f32.mrb[0].mxu0 }
 0xfce   : >> { %v2183_v30 = vadd.f32 %v3052_v28, %v2182_v29  ;;  %v3193_v31 = vpop.f32.mrb[1].mxu0 }
 0xfcf   : >> { %v2185_v32 = vpop.f32.mrb[2].mxu0 }
 0xfd0   : >> { %v2188_v33 = vmul.f32 %v2183_v30, %v2183_v30  ;;  %v3194_v34 = vpop.f32.mrb[3].mxu0 }
 0xfd2   : >> { %v2189_v35 = vmul.f32 %v2188_v33, %v2183_v30 }
 0xfd4   : >> { %v2190_v36 = vmul.f32 0.044715, %v2189_v35 }
 0xfd6   : >> { %v2191_v37 = vadd.f32 %v2190_v36, %v2183_v30 }
 0xfd8   : >> { %v2192_v38 = vmul.f32 0.7978846, %v2191_v37 }
 0xfda   : >> { %3621 = vtanh.f32 %v2192_v38 }
 0xfe4   : >> { %v3622_v39 = vpop.eup %3621 }
 0xfe5   : >> { %v2194_v40 = vadd.f32 1.0, %v3622_v39 }
 0xfe7   : >> { %v2195_v41 = vmul.f32 0.5, %v2194_v40 }
 0xfe9   : >> { %v2196_v42 = vmul.f32 %v2195_v41, %v2183_v30 }
 0xfeb   : >> { %v2197_v43 = vpack.c.bf16 %v2196_v42, %v2196_v42 }
 0xfed   : >> { %3200 = vmatmul.mubr.msk.bf16.vlgmr.msra.gmra.mrb[0].mxu1 %vm1430_vm1, %v2197_v43 }
0x10bd   : > { %2115 = sbr.rel (!%p2113_p4) target bundleno = 3824 (0xef0), region = 448 }
0x10c0   : >> { %v2253_v44 = vpop.f32.mrb[0].mxu1 }
0x10c1   : >> { %v2259_v45 = vadd.f32 %v4647_v22, %v2253_v44   ;;  %v3201_v46 = vpop.f32.mrb[1].mxu1 }
0x10c2   : >> { %v2256_v47 = vpop.f32.mrb[2].mxu1 }
0x10c3   : >> { %v3202_v48 = vpop.f32.mrb[3].mxu1  ;;  %v4646_v22 = vmov %v2259_v45   ;;  %v2267_v50 = vadd.f32 (%p2113_p4), %v3060_v49, %v2259_v45 }
0x10c5   : > { %v2268_v51 = vadd.f32 %v2267_v50, %v2109_v13 }
0x10c7   : > { %v2269_v52 = vsel %vm1430_vm1, %v2268_v51, 0.0 }
0x10c8   : > { %2270 = vadd.xlane.f32.xlu0 %v2269_v52 }
0x1155   : > { %v2271_v53 = vpop.xlane.xlu0 %2270 }
0x1156   : > { %v2272_v54 = vmul.f32 0.03125, %v2271_v53 }
0x1158   : > { %v5624_v55 = vsub.f32 %v2268_v51, %v2272_v54 }
0x115a   : > { %v2274_v56 = vmul.f32 %v5624_v55, %v5624_v55 }
0x115c   : > { %v2275_v57 = vsel %vm1430_vm1, %v2274_v56, 0.0 }
0x115d   : > { %2276 = vadd.xlane.f32.xlu0 %v2275_v57 }
0x115e   : > { %4374 = shalt.err (!%p4371_p7)
}
0x115f   : > { %s4375_s11 = scalar_lea.hbm %s5634_s9, 512  ;;  %s4379_s21 = scalar_lea.hbm %s5904_s19, 1024 }
0x1160   : > { %p4376_p1 = scmp.ne.s32.totalorder %s5634_s9, %s4375_s11  ;;  %p4380_p3 = scmp.lt.u32.totalorder %s5634_s9, %s5904_s19 }
0x1161   : > { %p4381_p10 = scmp.lt.u32.totalorder %s4379_s21, %s4375_s11  ;;  %p4383_p6 = scmp.lt.u32.totalorder %s4375_s11, %s5634_s9 }
0x1162   : > { %p4377_p13 = pnand %p4376_p1, %p5979_p2 }
0x1163   : > { %p4382_p4 = por %p4381_p10, %p4380_p3 }
0x1164   : > { %p4378_p0 = pneg %p4377_p13 }
0x1165   : > { %p4384_p11 = por %p4383_p6, %p4382_p4 }
0x1167   : > { %p4385_p8 = pnand %p4384_p11, %p4378_p0 }
0x1169   : > { %4388 = shalt.err (!%p4385_p8)
}
0x116a   : > { %s4722_s28 = smov 128   ;;  %s4723_s12 = smov 8  }
0x116b   : > { %3300 = dma.vmem_to_hbm [thread:$0]  (%p5979_p2), %s5638_s6, 512, %s5634_s9, %s5871_s13, %s4722_s28, %s4722_s28, %s4723_s12  }
0x116c   : > { %s5665_s17 = scalar_lea.hbm %s4881_s30, %s5630_s24  ;;  %s2378_s11 = sshll.u32 %s1382_s23, 4  ;;  %s5669_s11 = int_to_ptr.vmem [resolvable:$true] %s2378_s11 }
0x116d   : > { %s5873_s21 = scalar_lea.sflag [#allocation48], %s5406_s3  ;;  %s4389_s7 = scalar_lea.vmem %s5669_s11, 512 }
0x116e   : > { %p4390_p12 = scmp.ne.s32.totalorder %s5669_s11, %s4389_s7  ;;  %s4724_s22 = smov [#allocation47]  }
0x116f   : > { %s4393_s20 = sshll.u32 %s4724_s22, 4  ;;  %s4394_s20 = int_to_ptr.vmem [resolvable:$false] %s4393_s20 }
0x1170   : > { %p4391_p5 = pnand %p4390_p12, %p5979_p2  ;;  %s4395_s8 = scalar_lea.vmem %s4394_s20, 1024 }
0x1171   : > { %p4396_p7 = scmp.lt.s32.totalorder %s5669_s11, %s4394_s20  ;;  %p4397_p1 = scmp.lt.s32.totalorder %s4395_s8, %s4389_s7 }
0x1172   : > { %p4392_p9 = pneg %p4391_p5 }
0x1173   : > { %p4398_p13 = por %p4397_p1, %p4396_p7 }
0x1175   : > { %p4399_p0 = pnand %p4398_p13, %p4392_p9 }
0x1177   : > { %4402 = shalt.err (!%p4399_p0)
}
0x1178   : > { %s4403_s23 = scalar_lea.hbm %s5665_s17, 512  ;;  %s4407_s22 = scalar_lea.hbm %s4881_s30, 1024 }
0x1179   : > { %p4404_p3 = scmp.ne.s32.totalorder %s5665_s17, %s4403_s23  ;;  %p4408_p6 = scmp.lt.u32.totalorder %s5665_s17, %s4881_s30 }
0x117a   : > { %p4409_p11 = scmp.lt.u32.totalorder %s4407_s22, %s4403_s23  ;;  %p4411_p12 = scmp.lt.u32.totalorder %s4403_s23, %s5665_s17 }
0x117b   : > { %p4405_p10 = pnand %p4404_p3, %p5979_p2 }
0x117c   : > { %p4410_p8 = por %p4409_p11, %p4408_p6 }
0x117d   : > { %p4406_p4 = pneg %p4405_p10 }
0x117e   : > { %p4412_p5 = por %p4411_p12, %p4410_p8 }
0x1180   : > { %p4413_p9 = pnand %p4412_p5, %p4406_p4 }
0x1182   : > { %4416 = shalt.err (!%p4413_p9)
}
0x1183   : > { %s5980_s8 = sld [smem:[#allocation96_spill]]  ;;  %s5981_s7 = sld [smem:[#allocation97_spill]] }
0x1184   : > { %3302 = dma.vmem_to_hbm [thread:$0]  (%p5979_p2), %s5669_s11, 512, %s5665_s17, %s5873_s21, %s4722_s28, %s4722_s28, %s4723_s12  }
0x1185   : > { %s5982_s9 = scalar_lea.vmem [#allocation46], %s5470_s1  ;;  %s5983_s22 = scalar_lea.vmem [#allocation49], %s5470_s1 }
0x1186   : > { %s2362_s6 = sshll.u32 %s5982_s9, 4  ;;  %s5708_s13 = sshll.u32 %s5983_s22, 4  ;;  %s5704_s6 = int_to_ptr.vmem [resolvable:$true] %s2362_s6  ;;  %s5733_s13 = int_to_ptr.vmem [resolvable:$true] %s5708_s13 }
0x1187   : > { %s4417_s19 = scalar_lea.vmem %s5704_s6, 512  ;;  %s4725_s17 = smov [#allocation46]  }
0x1188   : > { %p4418_p7 = scmp.ne.s32.totalorder %s5704_s6, %s4417_s19  ;;  %s4421_s11 = sshll.u32 %s4725_s17, 4  ;;  %s4422_s11 = int_to_ptr.vmem [resolvable:$false] %s4421_s11 }
0x1189   : > { %s5696_s20 = scalar_lea.hbm %s5980_s8, %s5630_s24  ;;  %s5702_s23 = scalar_lea.hbm %s5981_s7, %s5630_s24 }
0x118a   : > { %p4419_p1 = pnand %p4418_p7, %p5979_p2  ;;  %s4423_s21 = scalar_lea.vmem %s4422_s11, 1024 }
0x118b   : > { %p4424_p0 = scmp.lt.s32.totalorder %s5704_s6, %s4422_s11  ;;  %p4425_p3 = scmp.lt.s32.totalorder %s4423_s21, %s4417_s19 }
0x118c   : > { %p4420_p13 = pneg %p4419_p1 }
0x118d   : > { %p4426_p10 = por %p4425_p3, %p4424_p0 }
0x118f   : > { %p4427_p4 = pnand %p4426_p10, %p4420_p13 }
0x1191   : > { %4430 = shalt.err (!%p4427_p4)
}
0x1192   : > { %s4431_s1 = scalar_lea.hbm %s5696_s20, 512  ;;  %s4435_s24 = scalar_lea.hbm %s5980_s8, 1024 }
0x1193   : > { %p4432_p6 = scmp.ne.s32.totalorder %s5696_s20, %s4431_s1  ;;  %p4436_p12 = scmp.lt.u32.totalorder %s5696_s20, %s5980_s8 }
0x1194   : > { %p4437_p5 = scmp.lt.u32.totalorder %s4435_s24, %s4431_s1  ;;  %p4439_p7 = scmp.lt.u32.totalorder %s4431_s1, %s5696_s20 }
0x1195   : > { %p4433_p11 = pnand %p4432_p6, %p5979_p2 }
0x1196   : > { %p4438_p9 = por %p4437_p5, %p4436_p12 }
0x1197   : > { %p4434_p8 = pneg %p4433_p11 }
0x1198   : > { %p4440_p1 = por %p4439_p7, %p4438_p9 }
0x119a   : > { %p4441_p13 = pnand %p4440_p1, %p4434_p8 }
0x119c   : > { %4444 = shalt.err (!%p4441_p13)
}
0x119d   : > { %s5984_s19 = scalar_lea.sflag [#allocation45], %s5406_s3  ;;  %s4445_s21 = scalar_lea.vmem %s5733_s13, 512 }
0x119e   : > { %3301 = dma.vmem_to_hbm [thread:$0]  (%p5979_p2), %s5704_s6, 512, %s5696_s20, %s5984_s19, %s4722_s28, %s4722_s28, %s4723_s12  }
0x119f   : > { %p4446_p0 = scmp.ne.s32.totalorder %s5733_s13, %s4445_s21  ;;  %s4726_s9 = smov [#allocation49]  }
0x11a0   : > { %s4449_s22 = sshll.u32 %s4726_s9, 4  ;;  %s4450_s22 = int_to_ptr.vmem [resolvable:$false] %s4449_s22 }
0x11a1   : > { %p4447_p3 = pnand %p4446_p0, %p5979_p2  ;;  %s4451_s17 = scalar_lea.vmem %s4450_s22, 1024 }
0x11a2   : > { %p4452_p4 = scmp.lt.s32.totalorder %s5733_s13, %s4450_s22  ;;  %p4453_p6 = scmp.lt.s32.totalorder %s4451_s17, %s4445_s21 }
0x11a3   : > { %p4448_p10 = pneg %p4447_p3 }
0x11a4   : > { %p4454_p11 = por %p4453_p6, %p4452_p4 }
0x11a6   : > { %p4455_p8 = pnand %p4454_p11, %p4448_p10 }
0x11a8   : > { %4458 = shalt.err (!%p4455_p8)
}
0x11a9   : > { %s4459_s20 = scalar_lea.hbm %s5702_s23, 512  ;;  %s4463_s6 = scalar_lea.hbm %s5981_s7, 1024 }
0x11aa   : > { %p4460_p12 = scmp.ne.s32.totalorder %s5702_s23, %s4459_s20  ;;  %p4464_p7 = scmp.lt.u32.totalorder %s5702_s23, %s5981_s7 }
0x11ab   : > { %p4465_p1 = scmp.lt.u32.totalorder %s4463_s6, %s4459_s20  ;;  %p4467_p0 = scmp.lt.u32.totalorder %s4459_s20, %s5702_s23 }
0x11ac   : > { %p4461_p5 = pnand %p4460_p12, %p5979_p2 }
0x11ad   : > { %p4466_p13 = por %p4465_p1, %p4464_p7 }
0x11ae   : > { %p4462_p9 = pneg %p4461_p5 }
0x11af   : > { %p4468_p3 = por %p4467_p0, %p4466_p13 }
0x11b1   : > { %p4469_p10 = pnand %p4468_p3, %p4462_p9 }
0x11b3   : > { %4472 = shalt.err (!%p4469_p10)
}
0x11b4   : > { %s5985_s11 = scalar_lea.sflag [#allocation48], %s5406_s3  ;;  %s5986_s1 = sld [smem:[#allocation94_spill]]  ;;  %v3061_v62 = vld [vmem:[#allocation40] ss:$0 sm:$0xff]  ;;  %v3062_v5 = vld [vmem:[#allocation41] ss:$0 sm:$0xff] }
0x11b5   : > { %3303 = dma.vmem_to_hbm [thread:$0]  (%p5979_p2), %s5733_s13, 512, %s5702_s23, %s5985_s11, %s4722_s28, %s4722_s28, %s4723_s12  }
0x11b6   : > { %s3068_s24 = sshll.u32 %s4909_s26, 7  ;;  %s5987_s3 = scalar_lea.vmem [#allocation43], %s5397_s4 }
0x11b7   : > { %s2333_s19 = sshll.u32 %s5987_s3, 4  ;;  %s5988_s13 = smov %s5987_s3  ;;  %s5764_s19 = int_to_ptr.vmem [resolvable:$true] %s2333_s19 }
0x11b8   : > { %s2300_s28 = scalar_lea.sflag [#allocation4], %s5394_s14  ;;  %s4473_s12 = scalar_lea.vmem %s5764_s19, 128 }
0x11b9   : > { %p4474_p4 = scmp.ne.s32.totalorder %s5764_s19, %s4473_s12  ;;  %s4727_s26 = smov [#allocation43]  }
0x11ba   : > { %s5762_s21 = scalar_lea.hbm %s5986_s1, %s3068_s24  ;;  %s4477_s23 = sshll.u32 %s4727_s26, 4  ;;  %s4478_s23 = int_to_ptr.vmem [resolvable:$false] %s4477_s23 }
0x11bb   : > { %p4475_p6 = pnand %p4474_p4, %p5979_p2  ;;  %s4479_s9 = scalar_lea.vmem %s4478_s23, 256 }
0x11bc   : > { %p4480_p8 = scmp.lt.s32.totalorder %s5764_s19, %s4478_s23  ;;  %p4481_p12 = scmp.lt.s32.totalorder %s4479_s9, %s4473_s12 }
0x11bd   : > { %p4476_p11 = pneg %p4475_p6 }
0x11be   : > { %p4482_p5 = por %p4481_p12, %p4480_p8 }
0x11c0   : > { %p4483_p9 = pnand %p4482_p5, %p4476_p11 }
0x11ea   : > { %v2277_v58 = vpop.xlane.xlu0 %2276 }
0x11eb   : > { %v2278_v59 = vmul.f32 0.03125, %v2277_v58 }
0x11ed   : > { %v2279_v60 = vadd.f32 1e-05, %v2278_v59 }
0x11ef   : > { %3623 = vrsqrt.f32 %v2279_v60 }
0x11f9   : > { %v3624_v61 = vpop.eup %3623 }
0x11fa   : > { %v2281_v63 = vmul.f32 %v3624_v61, %v5624_v55 }
0x11fc   : > { %v2289_v6 = vmul.f32 %v3061_v62, %v2281_v63 }
0x11fe   : > { %v2297_v8 = vadd.f32 %v3062_v5, %v2289_v6 }
0x1200   : > { %2298 = vst.msk [vmem:[%s5988_s13] sm:$0xff] %vm1430_vm1, %v2297_v8 }
0x1201   : > { %4486 = shalt.err (!%p4483_p9)
}
0x1202   : > { %s4487_s14 = scalar_lea.hbm %s5762_s21, 128  ;;  %s4491_s4 = scalar_lea.hbm %s5986_s1, 256 }
0x1203   : > { %p4488_p7 = scmp.ne.s32.totalorder %s5762_s21, %s4487_s14  ;;  %p4492_p0 = scmp.lt.u32.totalorder %s5762_s21, %s5986_s1 }
0x1204   : > { %p4493_p3 = scmp.lt.u32.totalorder %s4491_s4, %s4487_s14  ;;  %p4495_p4 = scmp.lt.u32.totalorder %s4487_s14, %s5762_s21 }
0x1205   : > { %p4489_p1 = pnand %p4488_p7, %p5979_p2 }
0x1206   : > { %p4494_p10 = por %p4493_p3, %p4492_p0 }
0x1207   : > { %p4490_p13 = pneg %p4489_p1 }
0x1208   : > { %p4496_p6 = por %p4495_p4, %p4494_p10 }
0x120a   : > { %p4497_p11 = pnand %p4496_p6, %p4490_p13 }
0x120c   : > { %4500 = shalt.err (!%p4497_p11)
}
0x120d   : > { %3299 = dma.vmem_to_hbm [thread:$0]  (%p5979_p2), %s5764_s19, 128, %s5762_s21, %s2300_s28  }
0x120e PF: > { %s2409_s22 = sand.u32 1, %s4615_s0   ;;  %p5989_p8 = scmp.ne.s32.totalorder %s5927_s10, 0 }
0x120f   : > { %p5990_p12 = scmp.ge.s32.totalorder %s4627_s18, 2  ;;  %s2410_s17 = scalar_lea.sflag [#allocation4], %s2409_s22 }
0x1211   : > { %p3390_p5 = pnand %p5990_p12, %p5989_p8 }
0x1213   : > { %4602 = dma.done.wait (!%p3390_p5), %s2410_s17, 128  }
0x1214   : > { %4604 = vsyncadd (!%p3390_p5), %s2410_s17, 4294967168  ;;  %s5991_s20 = sadd.s32 4294967294, %s4627_s18  }
0x1215   : > { %s2418_s6 = sand.u32 1, %s5991_s20  }
0x1216   : > { %s2419_s11 = scalar_lea.sflag [#allocation45], %s2418_s6 }
0x1217   : > { %4606 = dma.done.wait (!%p3390_p5), %s2419_s11, 1024  }
0x1218   : > { %4608 = vsyncadd (!%p3390_p5), %s2419_s11, 4294966272  ;;  %s2437_s5 = scalar_lea.sflag [#allocation48], %s2418_s6 }
0x1219   : > { %4610 = dma.done.wait (!%p3390_p5), %s2437_s5, 1024  }
0x121a   : > { %4612 = vsyncadd (!%p3390_p5), %s2437_s5, 4294966272  ;;  %p98_p2 = scmp.ge.s32.totalorder %s5080_s2, 4   ;;  %s5992_s0 = smov %s4619_s15 }
0x121b   : > { %s5993_s15 = smov %s4623_s16  ;;  %s5994_s16 = smov %s5092_s25 }
0x121c   : > { %s5995_s18 = smov %s5080_s2  ;;  %100 = sbr.rel (!%p98_p2) target bundleno = 92 (0x5c), region = 459 }
0x1223   :  { %2451 = vsyncpa [#allocation3], 1 }
0x1224   :  { %2453 = vsyncpa [#allocation3 + $0x1], 1 }
0x1225   :  { %2454 = vsyncpa [#allocation6], 1 }
0x1226   :  { %2456 = vsyncpa [#allocation6 + $0x1], 1 }
0x1227   :  { %2457 = vsyncpa [#allocation9], 1 }
0x1228   :  { %2459 = vsyncpa [#allocation9 + $0x1], 1 }
0x1229   :  { %2460 = vsyncpa [#allocation12], 1 }
0x122a   :  { %2461 = vsyncpa [#allocation15], 1 }
0x122b   :  { %2462 = vsyncpa [#allocation18], 1 }
0x122c   :  { %2463 = vsyncpa [#allocation21], 1 }
0x122d   :  { %2464 = vsyncpa [#allocation24], 1 }
0x122e   :  { %2465 = vsyncpa [#allocation27], 1 }
0x122f   :  { %2466 = vsyncpa [#allocation30], 1 }
0x1230   :  { %2467 = vsyncpa [#allocation33], 1 }
0x1231   :  { %2468 = vsyncpa [#allocation36], 1 }
0x1232   :  { %2469 = vsyncpa [#allocation39], 1 }
0x1233   :  { %2470 = vsyncpa [#allocation42], 1 }
0x1234   :  { %2471 = vsyncpa [#allocation4], 1 }
0x1235   :  { %2473 = vsyncpa [#allocation4 + $0x1], 1 }
0x1236   :  { %2474 = vsyncpa [#allocation45], 1 }
0x1237   :  { %2476 = vsyncpa [#allocation45 + $0x1], 1 }
0x1238   :  { %2477 = vsyncpa [#allocation48], 1 }
0x1239   :  { %2479 = vsyncpa [#allocation48 + $0x1], 1 }

</bundles_post_ra>
